<compile_context>
chip_gen: v7x
topology: tpu7x:2x2x1
jax: 0.10.0
libtpu: 0.0.40
codegen_flags: <defaults>
</compile_context>

<pallas_src>
import functools
import math

import jax
import jax.numpy as jnp
from jax import lax
from jax.experimental import pallas as pl
from jax.experimental.pallas import tpu as pltpu

# Explicit scoped-VMEM limit (review: raise above the 16/32 MiB defaults so the
# all-weights-resident plan still fits at production D on v5e/v6e; stays within
# v7x's 64 MiB physical VMEM).
VMEM_LIMIT = 64 * 1024 * 1024


# ----------------------------- in-kernel helpers -----------------------------

def _layernorm(x, scale, shift, eps=1e-5):
    # x: (ts, D) f32, scale/shift: (1, D) f32   (biased variance, matches torch)
    mean = jnp.mean(x, axis=-1, keepdims=True)
    var = jnp.mean((x - mean) ** 2, axis=-1, keepdims=True)
    return scale * ((x - mean) * lax.rsqrt(var + eps)) + shift   # rsqrt -> EUP


def _gelu_tanh(x):
    c = jnp.float32(math.sqrt(2.0 / math.pi))
    return 0.5 * x * (1.0 + jnp.tanh(c * (x + 0.044715 * x * x * x)))


# ------------------------- kernel 1: LayerNorm1 + QKV ------------------------

def _ln_qkv_kernel(x_ref, n1s_ref, n1b_ref, wqkv_ref, q_ref, k_ref, v_ref, *, num_heads):
    x = x_ref[0].astype(jnp.float32)                       # (ts, D)
    D = x.shape[-1]
    hd = D // num_heads
    xn = _layernorm(x, n1s_ref[...], n1b_ref[...])
    # one fused MXU matmul for Q, K, V (bf16 in, f32 accumulate)
    qkv = jnp.dot(xn.astype(jnp.bfloat16), wqkv_ref[...],
                  preferred_element_type=jnp.float32)      # (ts, 3D)
    inv_sqrt_hd = jnp.float32(1.0 / math.sqrt(hd))
    q_ref[0] = (qkv[:, :D] * inv_sqrt_hd).astype(q_ref.dtype)   # fold 1/sqrt(hd) into Q
    k_ref[0] = qkv[:, D:2 * D].astype(k_ref.dtype)
    v_ref[0] = qkv[:, 2 * D:].astype(v_ref.dtype)


def ln_qkv(x, n1s, n1b, wqkv, num_heads, ts):
    B, S, D = x.shape
    kernel = functools.partial(_ln_qkv_kernel, num_heads=num_heads)
    act_spec = pl.BlockSpec((1, ts, D), lambda b, s: (b, s, 0))
    out_sd = jax.ShapeDtypeStruct((B, S, D), jnp.bfloat16)
    return pl.pallas_call(
        kernel,
        out_shape=(out_sd, out_sd, out_sd),
        grid_spec=pltpu.PrefetchScalarGridSpec(
            num_scalar_prefetch=0,
            grid=(B, S // ts),
            in_specs=[
                act_spec,
                pl.BlockSpec((1, D), lambda b, s: (0, 0)),
                pl.BlockSpec((1, D), lambda b, s: (0, 0)),
                # TODO(synk): on v7x, single-buffer this grid-invariant weight block
                # to halve its VMEM residency.
                pl.BlockSpec((D, 3 * D), lambda b, s: (0, 0)),
            ],
            out_specs=(act_spec, act_spec, act_spec),
        ),
        compiler_params=pltpu.CompilerParams(
            dimension_semantics=("parallel", "parallel"),
            vmem_limit_bytes=VMEM_LIMIT),
    )(x, n1s, n1b, wqkv)


# ---------------- kernel 2: causal flash attention (online softmax) ----------

def _flash_attn_kernel(q_ref, k_ref, v_ref, o_ref, m_sc, l_sc, acc_sc):
    # q_ref: (1, H, tq, hd) bf16 (pre-scaled), k_ref/v_ref: (1, H, tk, hd) bf16
    q_i = pl.program_id(1)
    kv_i = pl.program_id(2)
    tq = q_ref.shape[2]
    tk = k_ref.shape[2]

    @pl.when(kv_i == 0)
    def _():
        m_sc[...] = jnp.full_like(m_sc, -jnp.inf)
        l_sc[...] = jnp.zeros_like(l_sc)
        acc_sc[...] = jnp.zeros_like(acc_sc)

    @pl.when(kv_i <= q_i)   # causal: skip fully-masked KV blocks (tq == tk)
    def _():
        q = q_ref[0]        # (H, tq, hd)
        k = k_ref[0]
        v = v_ref[0]
        s = jnp.einsum('hqd,hkd->hqk', q, k,
                       preferred_element_type=jnp.float32)        # (H, tq, tk)
        q_pos = q_i * tq + lax.broadcasted_iota(jnp.int32, (tq, tk), 0)
        k_pos = kv_i * tk + lax.broadcasted_iota(jnp.int32, (tq, tk), 1)
        # large finite negative (not -inf) so an all-masked row could never NaN
        s = jnp.where((k_pos <= q_pos)[None, :, :], s, jnp.float32(-1e30))

        m_prev = m_sc[...]
        m_new = jnp.maximum(m_prev, jnp.max(s, axis=-1, keepdims=True))
        alpha = jnp.exp(m_prev - m_new)
        p = jnp.exp(s - m_new)
        l_sc[...] = alpha * l_sc[...] + jnp.sum(p, axis=-1, keepdims=True)
        acc_sc[...] = alpha * acc_sc[...] + jnp.einsum(
            'hqk,hkd->hqd', p.astype(v.dtype), v,
            preferred_element_type=jnp.float32)
        m_sc[...] = m_new

    @pl.when(kv_i == q_i)   # diagonal block is the last KV block a query tile needs
    def _():
        inv_l = pl.reciprocal(l_sc[...], approx=True)
        o_ref[0] = (acc_sc[...] * inv_l).astype(o_ref.dtype)


def flash_attention(q, k, v, ts):
    B, H, S, hd = q.shape
    q_spec = pl.BlockSpec((1, H, ts, hd), lambda b, qi, ki: (b, 0, qi, 0))
    kv_spec = pl.BlockSpec((1, H, ts, hd), lambda b, qi, ki: (b, 0, ki, 0))
    return pl.pallas_call(
        _flash_attn_kernel,
        out_shape=jax.ShapeDtypeStruct((B, H, S, hd), jnp.bfloat16),
        grid_spec=pltpu.PrefetchScalarGridSpec(
            num_scalar_prefetch=0,
            grid=(B, S // ts, S // ts),
            in_specs=[q_spec, kv_spec, kv_spec],
            out_specs=q_spec,
            scratch_shapes=[
                pltpu.VMEM((H, ts, 1), jnp.float32),    # running max
                pltpu.VMEM((H, ts, 1), jnp.float32),    # running denom
                pltpu.VMEM((H, ts, hd), jnp.float32),   # running numerator
            ]),
        compiler_params=pltpu.CompilerParams(
            dimension_semantics=("parallel", "parallel", "arbitrary"),
            vmem_limit_bytes=VMEM_LIMIT),
    )(q, k, v)


# --------- kernel 3: out-proj + residual + LayerNorm2 + FF(GELU) + residual ---

def _out_proj_ffn_kernel(ctx_ref, x_ref, wo_ref, bo_ref, n2s_ref, n2b_ref,
                         w1_ref, b1_ref, w2_ref, b2_ref, o_ref):
    attn = jnp.dot(ctx_ref[0], wo_ref[...],
                   preferred_element_type=jnp.float32) + bo_ref[...]
    x1 = attn + x_ref[0].astype(jnp.float32)             # residual (dropout(0)==id)
    xn2 = _layernorm(x1, n2s_ref[...], n2b_ref[...])
    h = jnp.dot(xn2.astype(jnp.bfloat16), w1_ref[...],
                preferred_element_type=jnp.float32) + b1_ref[...]
    h = _gelu_tanh(h)                                     # f32 VPU/EUP math
    y = jnp.dot(h.astype(jnp.bfloat16), w2_ref[...],
                preferred_element_type=jnp.float32) + b2_ref[...]
    o_ref[0] = (y + x1).astype(o_ref.dtype)               # residual (dropout(0)==id)


def attn_out_ffn(ctx, x, wo, bo, n2s, n2b, w1, b1, w2, b2, ts):
    B, S, D = x.shape
    H4 = w1.shape[1]
    act_spec = pl.BlockSpec((1, ts, D), lambda b, s: (b, s, 0))
    const = lambda shape: pl.BlockSpec(shape, lambda b, s: (0, 0))
    return pl.pallas_call(
        _out_proj_ffn_kernel,
        out_shape=jax.ShapeDtypeStruct((B, S, D), jnp.float32),
        grid_spec=pltpu.PrefetchScalarGridSpec(
            num_scalar_prefetch=0,
            grid=(B, S // ts),
            in_specs=[
                act_spec, act_spec,
                const((D, D)), const((1, D)),
                const((1, D)), const((1, D)),
                const((D, H4)), const((1, H4)),
                const((H4, D)), const((1, D)),
            ],
            out_specs=act_spec,
        ),
        compiler_params=pltpu.CompilerParams(
            dimension_semantics=("parallel", "parallel"),
            vmem_limit_bytes=VMEM_LIMIT),
    )(ctx, x, wo, bo, n2s, n2b, w1, b1, w2, b2)


# ------------------- kernel 4: final LayerNorm + LM head ---------------------

def _final_norm_head_kernel(x_ref, fs_ref, fb_ref, w_ref, o_ref):
    x = x_ref[0].astype(jnp.float32)
    xn = _layernorm(x, fs_ref[...], fb_ref[...])
    o_ref[0] = jnp.dot(xn.astype(jnp.bfloat16), w_ref[...],
                       preferred_element_type=jnp.float32).astype(o_ref.dtype)


def final_norm_head(x, fs, fb, w_out, ts, tv):
    B, S, D = x.shape
    V = w_out.shape[1]
    return pl.pallas_call(
        _final_norm_head_kernel,
        out_shape=jax.ShapeDtypeStruct((B, S, V), jnp.float32),
        grid_spec=pltpu.PrefetchScalarGridSpec(
            num_scalar_prefetch=0,
            grid=(B, S // ts, V // tv),
            in_specs=[
                pl.BlockSpec((1, ts, D), lambda b, s, v: (b, s, 0)),
                pl.BlockSpec((1, D), lambda b, s, v: (0, 0)),
                pl.BlockSpec((1, D), lambda b, s, v: (0, 0)),
                pl.BlockSpec((D, tv), lambda b, s, v: (0, v)),
            ],
            out_specs=pl.BlockSpec((1, ts, tv), lambda b, s, v: (b, s, v)),
        ),
        compiler_params=pltpu.CompilerParams(
            dimension_semantics=("parallel", "parallel", "parallel"),
            vmem_limit_bytes=VMEM_LIMIT),
    )(x, fs, fb, w_out)


# ------------------------------ model wrapper --------------------------------

def gpt_forward(in_idx, params, *, num_heads):
    B, S = in_idx.shape
    tok_emb = params['tok_emb']
    pos_emb = params['pos_emb']
    D = tok_emb.shape[1]
    hd = D // num_heads

    # TODO(synk): the nn.Embedding row gather is data-dependent; it is left to XLA's
    # native gather here instead of a scalar-prefetch Pallas gather kernel.
    x = jnp.take(tok_emb, in_idx, axis=0) + pos_emb[None, :S, :]
    # drop_emb(rate=0.0) == identity

    ts = 128 if S % 128 == 0 else S          # sequence tile (query and kv tile)

    for lp in params['layers']:
        q, k, v = ln_qkv(x, lp['n1s'], lp['n1b'], lp['wqkv'], num_heads, ts)
        # layout plumbing (XLA, not compute): (B,S,D) -> (B,H,S,hd) head-major so the
        # attention kernel runs one batched-head einsum with no in-kernel transposes.
        to_heads = lambda t: t.reshape(B, S, num_heads, hd).transpose(0, 2, 1, 3)
        ctx = flash_attention(to_heads(q), to_heads(k), to_heads(v), ts)
        ctx = ctx.transpose(0, 2, 1, 3).reshape(B, S, D)
        x = attn_out_ffn(ctx, x, lp['wo'], lp['bo'], lp['n2s'], lp['n2b'],
                         lp['w1'], lp['b1'], lp['w2'], lp['b2'], ts)

    V = params['w_out'].shape[1]
    tv = 512 if (V > 512 and V % 512 == 0) else V   # vocab tile for the head matmul
    return final_norm_head(x, params['fs'], params['fb'], params['w_out'], ts, tv)


def init_params(key, vocab_size, context_length, emb_dim, n_layers):
    D, V, C, H4 = emb_dim, vocab_size, context_length, 4 * emb_dim
    s = 0.02
    bf16 = jnp.bfloat16
    k_emb, k_pos, k_head, k_layers = jax.random.split(key, 4)

    def layer(k):
        ks = jax.random.split(k, 4)
        return dict(
            n1s=jnp.ones((1, D), jnp.float32), n1b=jnp.zeros((1, D), jnp.float32),
            # matmul weights stored in bf16 (MXU inputs; halves weight DMA / VMEM)
            wqkv=(s * jax.random.normal(ks[0], (D, 3 * D), jnp.float32)).astype(bf16),
            wo=(s * jax.random.normal(ks[1], (D, D), jnp.float32)).astype(bf16),
            bo=jnp.zeros((1, D), jnp.float32),
            n2s=jnp.ones((1, D), jnp.float32), n2b=jnp.zeros((1, D), jnp.float32),
            w1=(s * jax.random.normal(ks[2], (D, H4), jnp.float32)).astype(bf16),
            b1=jnp.zeros((1, H4), jnp.float32),
            w2=(s * jax.random.normal(ks[3], (H4, D), jnp.float32)).astype(bf16),
            b2=jnp.zeros((1, D), jnp.float32),
        )

    return dict(
        tok_emb=s * jax.random.normal(k_emb, (V, D), jnp.float32),
        pos_emb=s * jax.random.normal(k_pos, (C, D), jnp.float32),
        layers=[layer(k) for k in jax.random.split(k_layers, n_layers)],
        fs=jnp.ones((1, D), jnp.float32), fb=jnp.zeros((1, D), jnp.float32),
        w_out=(s * jax.random.normal(k_head, (D, V), jnp.float32)).astype(bf16),
    )


if __name__ == "__main__":
    # cfg: vocab_size=64, context_length=8, emb_dim=32, n_heads=4, n_layers=2,
    #      drop_rate=0.0, qkv_bias=False
    B, S = 2, 8
    V, C, D, NH, NL = 64, 8, 32, 4, 2

    key = jax.random.PRNGKey(0)
    k_idx, k_par = jax.random.split(key)
    in_idx = jax.random.randint(k_idx, (B, S), 0, V, dtype=jnp.int32)
    params = init_params(k_par, V, C, D, NL)

    fwd = jax.jit(functools.partial(gpt_forward, num_heads=NH))
    logits = fwd(in_idx, params)
    jax.block_until_ready(logits)

    assert logits.shape == (B, S, V)
    assert bool(jnp.all(jnp.isfinite(logits)))
    print("KERNEL_OK")
</pallas_src>

<mosaic_0001>
module attributes {stable_mosaic.version = 11 : i64} {
  func.func @_ln_qkv_kernel(%arg0: i32, %arg1: i32, %arg2: memref<1x8x32xf32, #tpu.memory_space<vmem>>, %arg3: memref<1x32xf32, #tpu.memory_space<vmem>>, %arg4: memref<1x32xf32, #tpu.memory_space<vmem>>, %arg5: memref<32x96xbf16, #tpu.memory_space<vmem>>, %arg6: memref<1x8x32xbf16, #tpu.memory_space<vmem>>, %arg7: memref<1x8x32xbf16, #tpu.memory_space<vmem>>, %arg8: memref<1x8x32xbf16, #tpu.memory_space<vmem>>) attributes {dimension_semantics = [#tpu.dimension_semantics<parallel>, #tpu.dimension_semantics<parallel>], iteration_bounds = array<i64: 2, 1>, scalar_prefetch = 0 : i64, scratch_operands = 0 : i64, tpu.core_type = #tpu.core_type<tc>, window_params = [{transform_indices = @transform_0, window_bounds = array<i64: 1, 8, 32>}, {pipeline_mode = #tpu.pipeline_mode<synchronous>, transform_indices = @transform_1, window_bounds = array<i64: 1, 32>}, {pipeline_mode = #tpu.pipeline_mode<synchronous>, transform_indices = @transform_2, window_bounds = array<i64: 1, 32>}, {pipeline_mode = #tpu.pipeline_mode<synchronous>, transform_indices = @transform_3, window_bounds = array<i64: 32, 96>}, {transform_indices = @transform_4, window_bounds = array<i64: 1, 8, 32>}, {transform_indices = @transform_5, window_bounds = array<i64: 1, 8, 32>}, {transform_indices = @transform_6, window_bounds = array<i64: 1, 8, 32>}]} {
    %c0 = arith.constant 0 : index
    %c0_0 = arith.constant 0 : index
    %c0_1 = arith.constant 0 : index
    %0 = vector.load %arg2[%c0, %c0_0, %c0_1] : memref<1x8x32xf32, #tpu.memory_space<vmem>>, vector<1x8x32xf32>
    %1 = vector.shape_cast %0 : vector<1x8x32xf32> to vector<8x32xf32>
    %c0_2 = arith.constant 0 : index
    %c0_3 = arith.constant 0 : index
    %2 = vector.load %arg3[%c0_2, %c0_3] : memref<1x32xf32, #tpu.memory_space<vmem>>, vector<1x32xf32>
    %c0_4 = arith.constant 0 : index
    %c0_5 = arith.constant 0 : index
    %3 = vector.load %arg4[%c0_4, %c0_5] : memref<1x32xf32, #tpu.memory_space<vmem>>, vector<1x32xf32>
    %cst = arith.constant dense<0.000000e+00> : vector<8xf32>
    %4 = vector.multi_reduction <add>, %1, %cst [1] : vector<8x32xf32> to vector<8xf32>
    %5 = vector.shape_cast %4 : vector<8xf32> to vector<8x1xf32>
    %cst_6 = arith.constant 3.200000e+01 : f32
    %6 = vector.broadcast %cst_6 : f32 to vector<8x1xf32>
    %7 = arith.divf %5, %6 : vector<8x1xf32>
    %8 = vector.broadcast %7 : vector<8x1xf32> to vector<8x32xf32>
    %9 = arith.subf %1, %8 : vector<8x32xf32>
    %10 = arith.mulf %9, %9 : vector<8x32xf32>
    %cst_7 = arith.constant dense<0.000000e+00> : vector<8xf32>
    %11 = vector.multi_reduction <add>, %10, %cst_7 [1] : vector<8x32xf32> to vector<8xf32>
    %12 = vector.shape_cast %11 : vector<8xf32> to vector<8x1xf32>
    %cst_8 = arith.constant 3.200000e+01 : f32
    %13 = vector.broadcast %cst_8 : f32 to vector<8x1xf32>
    %14 = arith.divf %12, %13 : vector<8x1xf32>
    %15 = vector.broadcast %7 : vector<8x1xf32> to vector<8x32xf32>
    %16 = arith.subf %1, %15 : vector<8x32xf32>
    %cst_9 = arith.constant 9.99999974E-6 : f32
    %17 = vector.broadcast %cst_9 : f32 to vector<8x1xf32>
    %18 = arith.addf %14, %17 : vector<8x1xf32>
    %19 = math.rsqrt %18 : vector<8x1xf32>
    %20 = vector.broadcast %19 : vector<8x1xf32> to vector<8x32xf32>
    %21 = arith.mulf %16, %20 : vector<8x32xf32>
    %22 = vector.broadcast %2 : vector<1x32xf32> to vector<8x32xf32>
    %23 = arith.mulf %22, %21 : vector<8x32xf32>
    %24 = vector.broadcast %3 : vector<1x32xf32> to vector<8x32xf32>
    %25 = arith.addf %23, %24 : vector<8x32xf32>
    %26 = arith.truncf %25 : vector<8x32xf32> to vector<8x32xbf16>
    %c0_10 = arith.constant 0 : index
    %c0_11 = arith.constant 0 : index
    %27 = vector.load %arg5[%c0_10, %c0_11] : memref<32x96xbf16, #tpu.memory_space<vmem>>, vector<32x96xbf16>
    %cst_12 = arith.constant dense<0.000000e+00> : vector<8x96xf32>
    %28 = tpu.matmul %26, %27, %cst_12 {dimension_numbers = #tpu.dot_dimension_numbers<[1], [0], [0], [1], [0, 0, 1, 1], [], []>} : vector<8x32xbf16>, vector<32x96xbf16>, vector<8x96xf32> -> vector<8x96xf32>
    %29 = vector.extract_strided_slice %28 {offsets = [0, 0], sizes = [8, 32], strides = [1, 1]} : vector<8x96xf32> to vector<8x32xf32>
    %cst_13 = arith.constant 0.353553385 : f32
    %30 = vector.broadcast %cst_13 : f32 to vector<8x32xf32>
    %31 = arith.mulf %29, %30 : vector<8x32xf32>
    %32 = arith.truncf %31 : vector<8x32xf32> to vector<8x32xbf16>
    %c0_14 = arith.constant 0 : index
    %c0_15 = arith.constant 0 : index
    %c0_16 = arith.constant 0 : index
    %33 = vector.load %arg6[%c0_14, %c0_15, %c0_16] : memref<1x8x32xbf16, #tpu.memory_space<vmem>>, vector<1x8x32xbf16>
    %34 = vector.shape_cast %33 : vector<1x8x32xbf16> to vector<8x32xbf16>
    %35 = vector.shape_cast %32 : vector<8x32xbf16> to vector<1x8x32xbf16>
    tpu.vector_store %arg6[%c0_14, %c0_15, %c0_16], %35 {strides = array<i32>} : memref<1x8x32xbf16, #tpu.memory_space<vmem>>, vector<1x8x32xbf16>,
    %36 = vector.extract_strided_slice %28 {offsets = [0, 32], sizes = [8, 32], strides = [1, 1]} : vector<8x96xf32> to vector<8x32xf32>
    %37 = arith.truncf %36 : vector<8x32xf32> to vector<8x32xbf16>
    %c0_17 = arith.constant 0 : index
    %c0_18 = arith.constant 0 : index
    %c0_19 = arith.constant 0 : index
    %38 = vector.load %arg7[%c0_17, %c0_18, %c0_19] : memref<1x8x32xbf16, #tpu.memory_space<vmem>>, vector<1x8x32xbf16>
    %39 = vector.shape_cast %38 : vector<1x8x32xbf16> to vector<8x32xbf16>
    %40 = vector.shape_cast %37 : vector<8x32xbf16> to vector<1x8x32xbf16>
    tpu.vector_store %arg7[%c0_17, %c0_18, %c0_19], %40 {strides = array<i32>} : memref<1x8x32xbf16, #tpu.memory_space<vmem>>, vector<1x8x32xbf16>,
    %41 = vector.extract_strided_slice %28 {offsets = [0, 64], sizes = [8, 32], strides = [1, 1]} : vector<8x96xf32> to vector<8x32xf32>
    %42 = arith.truncf %41 : vector<8x32xf32> to vector<8x32xbf16>
    %c0_20 = arith.constant 0 : index
    %c0_21 = arith.constant 0 : index
    %c0_22 = arith.constant 0 : index
    %43 = vector.load %arg8[%c0_20, %c0_21, %c0_22] : memref<1x8x32xbf16, #tpu.memory_space<vmem>>, vector<1x8x32xbf16>
    %44 = vector.shape_cast %43 : vector<1x8x32xbf16> to vector<8x32xbf16>
    %45 = vector.shape_cast %42 : vector<8x32xbf16> to vector<1x8x32xbf16>
    tpu.vector_store %arg8[%c0_20, %c0_21, %c0_22], %45 {strides = array<i32>} : memref<1x8x32xbf16, #tpu.memory_space<vmem>>, vector<1x8x32xbf16>,
    return
  }
  func.func @transform_0(%arg0: i32, %arg1: i32) -> (i32, i32, i32) {
    %c0_i32 = arith.constant 0 : i32
    %c0_i32_0 = arith.constant 0 : i32
    return %arg0, %arg1, %c0_i32 : i32, i32, i32
  }
  func.func @transform_1(%arg0: i32, %arg1: i32) -> (i32, i32) {
    %c0_i32 = arith.constant 0 : i32
    %c0_i32_0 = arith.constant 0 : i32
    %c0_i32_1 = arith.constant 0 : i32
    return %c0_i32, %c0_i32_0 : i32, i32
  }
  func.func @transform_2(%arg0: i32, %arg1: i32) -> (i32, i32) {
    %c0_i32 = arith.constant 0 : i32
    %c0_i32_0 = arith.constant 0 : i32
    %c0_i32_1 = arith.constant 0 : i32
    return %c0_i32, %c0_i32_0 : i32, i32
  }
  func.func @transform_3(%arg0: i32, %arg1: i32) -> (i32, i32) {
    %c0_i32 = arith.constant 0 : i32
    %c0_i32_0 = arith.constant 0 : i32
    %c0_i32_1 = arith.constant 0 : i32
    return %c0_i32, %c0_i32_0 : i32, i32
  }
  func.func @transform_4(%arg0: i32, %arg1: i32) -> (i32, i32, i32) {
    %c0_i32 = arith.constant 0 : i32
    %c0_i32_0 = arith.constant 0 : i32
    return %arg0, %arg1, %c0_i32 : i32, i32, i32
  }
  func.func @transform_5(%arg0: i32, %arg1: i32) -> (i32, i32, i32) {
    %c0_i32 = arith.constant 0 : i32
    %c0_i32_0 = arith.constant 0 : i32
    return %arg0, %arg1, %c0_i32 : i32, i32, i32
  }
  func.func @transform_6(%arg0: i32, %arg1: i32) -> (i32, i32, i32) {
    %c0_i32 = arith.constant 0 : i32
    %c0_i32_0 = arith.constant 0 : i32
    return %arg0, %arg1, %c0_i32 : i32, i32, i32
  }
}

module attributes {stable_mosaic.version = 11 : i64} {
  func.func @_flash_attn_kernel(%arg0: i32, %arg1: i32, %arg2: i32, %arg3: memref<1x4x8x8xbf16, #tpu.memory_space<vmem>>, %arg4: memref<1x4x8x8xbf16, #tpu.memory_space<vmem>>, %arg5: memref<1x4x8x8xbf16, #tpu.memory_space<vmem>>, %arg6: memref<1x4x8x8xbf16, #tpu.memory_space<vmem>>, %arg7: memref<4x8x1xf32, #tpu.memory_space<vmem>>, %arg8: memref<4x8x1xf32, #tpu.memory_space<vmem>>, %arg9: memref<4x8x8xf32, #tpu.memory_space<vmem>>) attributes {dimension_semantics = [#tpu.dimension_semantics<parallel>, #tpu.dimension_semantics<parallel>, #tpu.dimension_semantics<arbitrary>], iteration_bounds = array<i64: 2, 1, 1>, scalar_prefetch = 0 : i64, scratch_operands = 3 : i64, tpu.core_type = #tpu.core_type<tc>, window_params = [{transform_indices = @transform_0, window_bounds = array<i64: 1, 4, 8, 8>}, {transform_indices = @transform_1, window_bounds = array<i64: 1, 4, 8, 8>}, {transform_indices = @transform_2, window_bounds = array<i64: 1, 4, 8, 8>}, {transform_indices = @transform_3, window_bounds = array<i64: 1, 4, 8, 8>}]} {
    %c0_i32 = arith.constant 0 : i32
    %0 = arith.cmpi eq, %arg2, %c0_i32 : i32
    %1 = arith.extui %0 : i1 to i32
    %c0_i32_0 = arith.constant 0 : i32
    %2 = arith.cmpi ne, %1, %c0_i32_0 : i32
    scf.if %2 {
      %cst = arith.constant 0xFF800000 : f32
      %9 = vector.broadcast %cst : f32 to vector<4x8x1xf32>
      %c0 = arith.constant 0 : index
      %c0_3 = arith.constant 0 : index
      %c0_4 = arith.constant 0 : index
      %10 = vector.load %arg7[%c0, %c0_3, %c0_4] : memref<4x8x1xf32, #tpu.memory_space<vmem>>, vector<4x8x1xf32>
      tpu.vector_store %arg7[%c0, %c0_3, %c0_4], %9 {strides = array<i32>} : memref<4x8x1xf32, #tpu.memory_space<vmem>>, vector<4x8x1xf32>,
      %cst_5 = arith.constant 0.000000e+00 : f32
      %11 = vector.broadcast %cst_5 : f32 to vector<4x8x1xf32>
      %c0_6 = arith.constant 0 : index
      %c0_7 = arith.constant 0 : index
      %c0_8 = arith.constant 0 : index
      %12 = vector.load %arg8[%c0_6, %c0_7, %c0_8] : memref<4x8x1xf32, #tpu.memory_space<vmem>>, vector<4x8x1xf32>
      tpu.vector_store %arg8[%c0_6, %c0_7, %c0_8], %11 {strides = array<i32>} : memref<4x8x1xf32, #tpu.memory_space<vmem>>, vector<4x8x1xf32>,
      %cst_9 = arith.constant 0.000000e+00 : f32
      %13 = vector.broadcast %cst_9 : f32 to vector<4x8x8xf32>
      %c0_10 = arith.constant 0 : index
      %c0_11 = arith.constant 0 : index
      %c0_12 = arith.constant 0 : index
      %14 = vector.load %arg9[%c0_10, %c0_11, %c0_12] : memref<4x8x8xf32, #tpu.memory_space<vmem>>, vector<4x8x8xf32>
      tpu.vector_store %arg9[%c0_10, %c0_11, %c0_12], %13 {strides = array<i32>} : memref<4x8x8xf32, #tpu.memory_space<vmem>>, vector<4x8x8xf32>,
    } else {
    }
    %3 = arith.cmpi sle, %arg2, %arg1 : i32
    %4 = arith.extui %3 : i1 to i32
    %c0_i32_1 = arith.constant 0 : i32
    %5 = arith.cmpi ne, %4, %c0_i32_1 : i32
    scf.if %5 {
      %c0 = arith.constant 0 : index
      %c0_3 = arith.constant 0 : index
      %c0_4 = arith.constant 0 : index
      %c0_5 = arith.constant 0 : index
      %9 = vector.load %arg3[%c0, %c0_3, %c0_4, %c0_5] : memref<1x4x8x8xbf16, #tpu.memory_space<vmem>>, vector<1x4x8x8xbf16>
      %10 = vector.shape_cast %9 : vector<1x4x8x8xbf16> to vector<4x8x8xbf16>
      %c0_6 = arith.constant 0 : index
      %c0_7 = arith.constant 0 : index
      %c0_8 = arith.constant 0 : index
      %c0_9 = arith.constant 0 : index
      %11 = vector.load %arg4[%c0_6, %c0_7, %c0_8, %c0_9] : memref<1x4x8x8xbf16, #tpu.memory_space<vmem>>, vector<1x4x8x8xbf16>
      %12 = vector.shape_cast %11 : vector<1x4x8x8xbf16> to vector<4x8x8xbf16>
      %c0_10 = arith.constant 0 : index
      %c0_11 = arith.constant 0 : index
      %c0_12 = arith.constant 0 : index
      %c0_13 = arith.constant 0 : index
      %13 = vector.load %arg5[%c0_10, %c0_11, %c0_12, %c0_13] : memref<1x4x8x8xbf16, #tpu.memory_space<vmem>>, vector<1x4x8x8xbf16>
      %14 = vector.shape_cast %13 : vector<1x4x8x8xbf16> to vector<4x8x8xbf16>
      "tpu.trace_start"() <{level = 10 : i32, message = "hqd,hkd->hqk"}> : () -> ()
      %cst = arith.constant dense<0.000000e+00> : vector<4x8x8xf32>
      %15 = tpu.matmul %10, %12, %cst {dimension_numbers = #tpu.dot_dimension_numbers<[2], [2], [1], [1], [0, 0, 0, 1, 1, 1], [0], [0]>} : vector<4x8x8xbf16>, vector<4x8x8xbf16>, vector<4x8x8xf32> -> vector<4x8x8xf32>
      "tpu.trace_stop"() : () -> ()
      %c8_i32 = arith.constant 8 : i32
      %16 = arith.muli %arg1, %c8_i32 : i32
      %17 = tpu.iota {dimensions = array<i32: 0>} : vector<8x8xi32>
      %18 = vector.broadcast %16 : i32 to vector<8x8xi32>
      %19 = arith.addi %18, %17 : vector<8x8xi32>
      %c8_i32_14 = arith.constant 8 : i32
      %20 = arith.muli %arg2, %c8_i32_14 : i32
      %21 = tpu.iota {dimensions = array<i32: 1>} : vector<8x8xi32>
      %22 = vector.broadcast %20 : i32 to vector<8x8xi32>
      %23 = arith.addi %22, %21 : vector<8x8xi32>
      %24 = arith.cmpi sle, %23, %19 : vector<8x8xi32>
      %25 = vector.shape_cast %24 : vector<8x8xi1> to vector<1x8x8xi1>
      %cst_15 = arith.constant -1.000000e+30 : f32
      %26 = vector.shape_cast %25 : vector<1x8x8xi1> to vector<1x8x8xi1>
      %27 = vector.broadcast %26 : vector<1x8x8xi1> to vector<4x8x8xi1>
      %28 = vector.broadcast %cst_15 : f32 to vector<4x8x8xf32>
      %29 = arith.select %27, %15, %28 : vector<4x8x8xi1>, vector<4x8x8xf32>
      %c0_16 = arith.constant 0 : index
      %c0_17 = arith.constant 0 : index
      %c0_18 = arith.constant 0 : index
      %30 = vector.load %arg7[%c0_16, %c0_17, %c0_18] : memref<4x8x1xf32, #tpu.memory_space<vmem>>, vector<4x8x1xf32>
      %cst_19 = arith.constant dense<0xFF800000> : vector<4x8xf32>
      %31 = vector.multi_reduction <maximumf>, %29, %cst_19 [2] : vector<4x8x8xf32> to vector<4x8xf32>
      %32 = vector.shape_cast %31 : vector<4x8xf32> to vector<4x8x1xf32>
      %33 = arith.maximumf %30, %32 : vector<4x8x1xf32>
      %34 = arith.subf %30, %33 : vector<4x8x1xf32>
      %35 = math.exp %34 : vector<4x8x1xf32>
      %36 = vector.broadcast %33 : vector<4x8x1xf32> to vector<4x8x8xf32>
      %37 = arith.subf %29, %36 : vector<4x8x8xf32>
      %38 = math.exp %37 : vector<4x8x8xf32>
      %c0_20 = arith.constant 0 : index
      %c0_21 = arith.constant 0 : index
      %c0_22 = arith.constant 0 : index
      %39 = vector.load %arg8[%c0_20, %c0_21, %c0_22] : memref<4x8x1xf32, #tpu.memory_space<vmem>>, vector<4x8x1xf32>
      %40 = arith.mulf %35, %39 : vector<4x8x1xf32>
      %cst_23 = arith.constant dense<0.000000e+00> : vector<4x8xf32>
      %41 = vector.multi_reduction <add>, %38, %cst_23 [2] : vector<4x8x8xf32> to vector<4x8xf32>
      %42 = vector.shape_cast %41 : vector<4x8xf32> to vector<4x8x1xf32>
      %43 = arith.addf %40, %42 : vector<4x8x1xf32>
      %c0_24 = arith.constant 0 : index
      %c0_25 = arith.constant 0 : index
      %c0_26 = arith.constant 0 : index
      %44 = vector.load %arg8[%c0_24, %c0_25, %c0_26] : memref<4x8x1xf32, #tpu.memory_space<vmem>>, vector<4x8x1xf32>
      tpu.vector_store %arg8[%c0_24, %c0_25, %c0_26], %43 {strides = array<i32>} : memref<4x8x1xf32, #tpu.memory_space<vmem>>, vector<4x8x1xf32>,
      %c0_27 = arith.constant 0 : index
      %c0_28 = arith.constant 0 : index
      %c0_29 = arith.constant 0 : index
      %45 = vector.load %arg9[%c0_27, %c0_28, %c0_29] : memref<4x8x8xf32, #tpu.memory_space<vmem>>, vector<4x8x8xf32>
      %46 = vector.broadcast %35 : vector<4x8x1xf32> to vector<4x8x8xf32>
      %47 = arith.mulf %46, %45 : vector<4x8x8xf32>
      %48 = arith.truncf %38 : vector<4x8x8xf32> to vector<4x8x8xbf16>
      "tpu.trace_start"() <{level = 10 : i32, message = "hqk,hkd->hqd"}> : () -> ()
      %cst_30 = arith.constant dense<0.000000e+00> : vector<4x8x8xf32>
      %49 = tpu.matmul %48, %14, %cst_30 {dimension_numbers = #tpu.dot_dimension_numbers<[2], [1], [1], [2], [0, 0, 0, 1, 1, 2], [0], [0]>} : vector<4x8x8xbf16>, vector<4x8x8xbf16>, vector<4x8x8xf32> -> vector<4x8x8xf32>
      "tpu.trace_stop"() : () -> ()
      %50 = arith.addf %47, %49 : vector<4x8x8xf32>
      %c0_31 = arith.constant 0 : index
      %c0_32 = arith.constant 0 : index
      %c0_33 = arith.constant 0 : index
      %51 = vector.load %arg9[%c0_31, %c0_32, %c0_33] : memref<4x8x8xf32, #tpu.memory_space<vmem>>, vector<4x8x8xf32>
      tpu.vector_store %arg9[%c0_31, %c0_32, %c0_33], %50 {strides = array<i32>} : memref<4x8x8xf32, #tpu.memory_space<vmem>>, vector<4x8x8xf32>,
      %c0_34 = arith.constant 0 : index
      %c0_35 = arith.constant 0 : index
      %c0_36 = arith.constant 0 : index
      %52 = vector.load %arg7[%c0_34, %c0_35, %c0_36] : memref<4x8x1xf32, #tpu.memory_space<vmem>>, vector<4x8x1xf32>
      tpu.vector_store %arg7[%c0_34, %c0_35, %c0_36], %33 {strides = array<i32>} : memref<4x8x1xf32, #tpu.memory_space<vmem>>, vector<4x8x1xf32>,
    } else {
    }
    %6 = arith.cmpi eq, %arg2, %arg1 : i32
    %7 = arith.extui %6 : i1 to i32
    %c0_i32_2 = arith.constant 0 : i32
    %8 = arith.cmpi ne, %7, %c0_i32_2 : i32
    scf.if %8 {
      %c0 = arith.constant 0 : index
      %c0_3 = arith.constant 0 : index
      %c0_4 = arith.constant 0 : index
      %9 = vector.load %arg8[%c0, %c0_3, %c0_4] : memref<4x8x1xf32, #tpu.memory_space<vmem>>, vector<4x8x1xf32>
      %10 = tpu.reciprocal %9 {approx = true} : vector<4x8x1xf32> -> vector<4x8x1xf32>
      %c0_5 = arith.constant 0 : index
      %c0_6 = arith.constant 0 : index
      %c0_7 = arith.constant 0 : index
      %11 = vector.load %arg9[%c0_5, %c0_6, %c0_7] : memref<4x8x8xf32, #tpu.memory_space<vmem>>, vector<4x8x8xf32>
      %12 = vector.broadcast %10 : vector<4x8x1xf32> to vector<4x8x8xf32>
      %13 = arith.mulf %11, %12 : vector<4x8x8xf32>
      %14 = arith.truncf %13 : vector<4x8x8xf32> to vector<4x8x8xbf16>
      %c0_8 = arith.constant 0 : index
      %c0_9 = arith.constant 0 : index
      %c0_10 = arith.constant 0 : index
      %c0_11 = arith.constant 0 : index
      %15 = vector.load %arg6[%c0_8, %c0_9, %c0_10, %c0_11] : memref<1x4x8x8xbf16, #tpu.memory_space<vmem>>, vector<1x4x8x8xbf16>
      %16 = vector.shape_cast %15 : vector<1x4x8x8xbf16> to vector<4x8x8xbf16>
      %17 = vector.shape_cast %14 : vector<4x8x8xbf16> to vector<1x4x8x8xbf16>
      tpu.vector_store %arg6[%c0_8, %c0_9, %c0_10, %c0_11], %17 {strides = array<i32>} : memref<1x4x8x8xbf16, #tpu.memory_space<vmem>>, vector<1x4x8x8xbf16>,
    } else {
    }
    return
  }
  func.func @transform_0(%arg0: i32, %arg1: i32, %arg2: i32) -> (i32, i32, i32, i32) {
    %c0_i32 = arith.constant 0 : i32
    %c0_i32_0 = arith.constant 0 : i32
    %c0_i32_1 = arith.constant 0 : i32
    return %arg0, %c0_i32, %arg1, %c0_i32_0 : i32, i32, i32, i32
  }
  func.func @transform_1(%arg0: i32, %arg1: i32, %arg2: i32) -> (i32, i32, i32, i32) {
    %c0_i32 = arith.constant 0 : i32
    %c0_i32_0 = arith.constant 0 : i32
    %c0_i32_1 = arith.constant 0 : i32
    return %arg0, %c0_i32, %arg2, %c0_i32_0 : i32, i32, i32, i32
  }
  func.func @transform_2(%arg0: i32, %arg1: i32, %arg2: i32) -> (i32, i32, i32, i32) {
    %c0_i32 = arith.constant 0 : i32
    %c0_i32_0 = arith.constant 0 : i32
    %c0_i32_1 = arith.constant 0 : i32
    return %arg0, %c0_i32, %arg2, %c0_i32_0 : i32, i32, i32, i32
  }
  func.func @transform_3(%arg0: i32, %arg1: i32, %arg2: i32) -> (i32, i32, i32, i32) {
    %c0_i32 = arith.constant 0 : i32
    %c0_i32_0 = arith.constant 0 : i32
    %c0_i32_1 = arith.constant 0 : i32
    return %arg0, %c0_i32, %arg1, %c0_i32_0 : i32, i32, i32, i32
  }
}

module attributes {stable_mosaic.version = 11 : i64} {
  func.func @_final_norm_head_kernel(%arg0: i32, %arg1: i32, %arg2: i32, %arg3: memref<1x8x32xf32, #tpu.memory_space<vmem>>, %arg4: memref<1x32xf32, #tpu.memory_space<vmem>>, %arg5: memref<1x32xf32, #tpu.memory_space<vmem>>, %arg6: memref<32x64xbf16, #tpu.memory_space<vmem>>, %arg7: memref<1x8x64xf32, #tpu.memory_space<vmem>>) attributes {dimension_semantics = [#tpu.dimension_semantics<parallel>, #tpu.dimension_semantics<parallel>, #tpu.dimension_semantics<parallel>], iteration_bounds = array<i64: 2, 1, 1>, scalar_prefetch = 0 : i64, scratch_operands = 0 : i64, tpu.core_type = #tpu.core_type<tc>, window_params = [{transform_indices = @transform_0, window_bounds = array<i64: 1, 8, 32>}, {pipeline_mode = #tpu.pipeline_mode<synchronous>, transform_indices = @transform_1, window_bounds = array<i64: 1, 32>}, {pipeline_mode = #tpu.pipeline_mode<synchronous>, transform_indices = @transform_2, window_bounds = array<i64: 1, 32>}, {transform_indices = @transform_3, window_bounds = array<i64: 32, 64>}, {transform_indices = @transform_4, window_bounds = array<i64: 1, 8, 64>}]} {
    %c0 = arith.constant 0 : index
    %c0_0 = arith.constant 0 : index
    %c0_1 = arith.constant 0 : index
    %0 = vector.load %arg3[%c0, %c0_0, %c0_1] : memref<1x8x32xf32, #tpu.memory_space<vmem>>, vector<1x8x32xf32>
    %1 = vector.shape_cast %0 : vector<1x8x32xf32> to vector<8x32xf32>
    %c0_2 = arith.constant 0 : index
    %c0_3 = arith.constant 0 : index
    %2 = vector.load %arg4[%c0_2, %c0_3] : memref<1x32xf32, #tpu.memory_space<vmem>>, vector<1x32xf32>
    %c0_4 = arith.constant 0 : index
    %c0_5 = arith.constant 0 : index
    %3 = vector.load %arg5[%c0_4, %c0_5] : memref<1x32xf32, #tpu.memory_space<vmem>>, vector<1x32xf32>
    %cst = arith.constant dense<0.000000e+00> : vector<8xf32>
    %4 = vector.multi_reduction <add>, %1, %cst [1] : vector<8x32xf32> to vector<8xf32>
    %5 = vector.shape_cast %4 : vector<8xf32> to vector<8x1xf32>
    %cst_6 = arith.constant 3.200000e+01 : f32
    %6 = vector.broadcast %cst_6 : f32 to vector<8x1xf32>
    %7 = arith.divf %5, %6 : vector<8x1xf32>
    %8 = vector.broadcast %7 : vector<8x1xf32> to vector<8x32xf32>
    %9 = arith.subf %1, %8 : vector<8x32xf32>
    %10 = arith.mulf %9, %9 : vector<8x32xf32>
    %cst_7 = arith.constant dense<0.000000e+00> : vector<8xf32>
    %11 = vector.multi_reduction <add>, %10, %cst_7 [1] : vector<8x32xf32> to vector<8xf32>
    %12 = vector.shape_cast %11 : vector<8xf32> to vector<8x1xf32>
    %cst_8 = arith.constant 3.200000e+01 : f32
    %13 = vector.broadcast %cst_8 : f32 to vector<8x1xf32>
    %14 = arith.divf %12, %13 : vector<8x1xf32>
    %15 = vector.broadcast %7 : vector<8x1xf32> to vector<8x32xf32>
    %16 = arith.subf %1, %15 : vector<8x32xf32>
    %cst_9 = arith.constant 9.99999974E-6 : f32
    %17 = vector.broadcast %cst_9 : f32 to vector<8x1xf32>
    %18 = arith.addf %14, %17 : vector<8x1xf32>
    %19 = math.rsqrt %18 : vector<8x1xf32>
    %20 = vector.broadcast %19 : vector<8x1xf32> to vector<8x32xf32>
    %21 = arith.mulf %16, %20 : vector<8x32xf32>
    %22 = vector.broadcast %2 : vector<1x32xf32> to vector<8x32xf32>
    %23 = arith.mulf %22, %21 : vector<8x32xf32>
    %24 = vector.broadcast %3 : vector<1x32xf32> to vector<8x32xf32>
    %25 = arith.addf %23, %24 : vector<8x32xf32>
    %26 = arith.truncf %25 : vector<8x32xf32> to vector<8x32xbf16>
    %c0_10 = arith.constant 0 : index
    %c0_11 = arith.constant 0 : index
    %27 = vector.load %arg6[%c0_10, %c0_11] : memref<32x64xbf16, #tpu.memory_space<vmem>>, vector<32x64xbf16>
    %cst_12 = arith.constant dense<0.000000e+00> : vector<8x64xf32>
    %28 = tpu.matmul %26, %27, %cst_12 {dimension_numbers = #tpu.dot_dimension_numbers<[1], [0], [0], [1], [0, 0, 1, 1], [], []>} : vector<8x32xbf16>, vector<32x64xbf16>, vector<8x64xf32> -> vector<8x64xf32>
    %c0_13 = arith.constant 0 : index
    %c0_14 = arith.constant 0 : index
    %c0_15 = arith.constant 0 : index
    %29 = vector.load %arg7[%c0_13, %c0_14, %c0_15] : memref<1x8x64xf32, #tpu.memory_space<vmem>>, vector<1x8x64xf32>
    %30 = vector.shape_cast %29 : vector<1x8x64xf32> to vector<8x64xf32>
    %31 = vector.shape_cast %28 : vector<8x64xf32> to vector<1x8x64xf32>
    tpu.vector_store %arg7[%c0_13, %c0_14, %c0_15], %31 {strides = array<i32>} : memref<1x8x64xf32, #tpu.memory_space<vmem>>, vector<1x8x64xf32>,
    return
  }
  func.func @transform_0(%arg0: i32, %arg1: i32, %arg2: i32) -> (i32, i32, i32) {
    %c0_i32 = arith.constant 0 : i32
    %c0_i32_0 = arith.constant 0 : i32
    return %arg0, %arg1, %c0_i32 : i32, i32, i32
  }
  func.func @transform_1(%arg0: i32, %arg1: i32, %arg2: i32) -> (i32, i32) {
    %c0_i32 = arith.constant 0 : i32
    %c0_i32_0 = arith.constant 0 : i32
    %c0_i32_1 = arith.constant 0 : i32
    return %c0_i32, %c0_i32_0 : i32, i32
  }
  func.func @transform_2(%arg0: i32, %arg1: i32, %arg2: i32) -> (i32, i32) {
    %c0_i32 = arith.constant 0 : i32
    %c0_i32_0 = arith.constant 0 : i32
    %c0_i32_1 = arith.constant 0 : i32
    return %c0_i32, %c0_i32_0 : i32, i32
  }
  func.func @transform_3(%arg0: i32, %arg1: i32, %arg2: i32) -> (i32, i32) {
    %c0_i32 = arith.constant 0 : i32
    %c0_i32_0 = arith.constant 0 : i32
    return %c0_i32, %arg2 : i32, i32
  }
  func.func @transform_4(%arg0: i32, %arg1: i32, %arg2: i32) -> (i32, i32, i32) {
    %c0_i32 = arith.constant 0 : i32
    return %arg0, %arg1, %arg2 : i32, i32, i32
  }
}

module attributes {stable_mosaic.version = 11 : i64} {
  func.func @_out_proj_ffn_kernel(%arg0: i32, %arg1: i32, %arg2: memref<1x8x32xbf16, #tpu.memory_space<vmem>>, %arg3: memref<1x8x32xf32, #tpu.memory_space<vmem>>, %arg4: memref<32x32xbf16, #tpu.memory_space<vmem>>, %arg5: memref<1x32xf32, #tpu.memory_space<vmem>>, %arg6: memref<1x32xf32, #tpu.memory_space<vmem>>, %arg7: memref<1x32xf32, #tpu.memory_space<vmem>>, %arg8: memref<32x128xbf16, #tpu.memory_space<vmem>>, %arg9: memref<1x128xf32, #tpu.memory_space<vmem>>, %arg10: memref<128x32xbf16, #tpu.memory_space<vmem>>, %arg11: memref<1x32xf32, #tpu.memory_space<vmem>>, %arg12: memref<1x8x32xf32, #tpu.memory_space<vmem>>) attributes {dimension_semantics = [#tpu.dimension_semantics<parallel>, #tpu.dimension_semantics<parallel>], iteration_bounds = array<i64: 2, 1>, scalar_prefetch = 0 : i64, scratch_operands = 0 : i64, tpu.core_type = #tpu.core_type<tc>, window_params = [{transform_indices = @transform_0, window_bounds = array<i64: 1, 8, 32>}, {transform_indices = @transform_1, window_bounds = array<i64: 1, 8, 32>}, {pipeline_mode = #tpu.pipeline_mode<synchronous>, transform_indices = @transform_2, window_bounds = array<i64: 32, 32>}, {pipeline_mode = #tpu.pipeline_mode<synchronous>, transform_indices = @transform_3, window_bounds = array<i64: 1, 32>}, {pipeline_mode = #tpu.pipeline_mode<synchronous>, transform_indices = @transform_4, window_bounds = array<i64: 1, 32>}, {pipeline_mode = #tpu.pipeline_mode<synchronous>, transform_indices = @transform_5, window_bounds = array<i64: 1, 32>}, {pipeline_mode = #tpu.pipeline_mode<synchronous>, transform_indices = @transform_6, window_bounds = array<i64: 32, 128>}, {pipeline_mode = #tpu.pipeline_mode<synchronous>, transform_indices = @transform_7, window_bounds = array<i64: 1, 128>}, {pipeline_mode = #tpu.pipeline_mode<synchronous>, transform_indices = @transform_8, window_bounds = array<i64: 128, 32>}, {pipeline_mode = #tpu.pipeline_mode<synchronous>, transform_indices = @transform_9, window_bounds = array<i64: 1, 32>}, {transform_indices = @transform_10, window_bounds = array<i64: 1, 8, 32>}]} {
    %c0 = arith.constant 0 : index
    %c0_0 = arith.constant 0 : index
    %c0_1 = arith.constant 0 : index
    %0 = vector.load %arg2[%c0, %c0_0, %c0_1] : memref<1x8x32xbf16, #tpu.memory_space<vmem>>, vector<1x8x32xbf16>
    %1 = vector.shape_cast %0 : vector<1x8x32xbf16> to vector<8x32xbf16>
    %c0_2 = arith.constant 0 : index
    %c0_3 = arith.constant 0 : index
    %2 = vector.load %arg4[%c0_2, %c0_3] : memref<32x32xbf16, #tpu.memory_space<vmem>>, vector<32x32xbf16>
    %cst = arith.constant dense<0.000000e+00> : vector<8x32xf32>
    %3 = tpu.matmul %1, %2, %cst {dimension_numbers = #tpu.dot_dimension_numbers<[1], [0], [0], [1], [0, 0, 1, 1], [], []>} : vector<8x32xbf16>, vector<32x32xbf16>, vector<8x32xf32> -> vector<8x32xf32>
    %c0_4 = arith.constant 0 : index
    %c0_5 = arith.constant 0 : index
    %4 = vector.load %arg5[%c0_4, %c0_5] : memref<1x32xf32, #tpu.memory_space<vmem>>, vector<1x32xf32>
    %5 = vector.broadcast %4 : vector<1x32xf32> to vector<8x32xf32>
    %6 = arith.addf %3, %5 : vector<8x32xf32>
    %c0_6 = arith.constant 0 : index
    %c0_7 = arith.constant 0 : index
    %c0_8 = arith.constant 0 : index
    %7 = vector.load %arg3[%c0_6, %c0_7, %c0_8] : memref<1x8x32xf32, #tpu.memory_space<vmem>>, vector<1x8x32xf32>
    %8 = vector.shape_cast %7 : vector<1x8x32xf32> to vector<8x32xf32>
    %9 = arith.addf %6, %8 : vector<8x32xf32>
    %c0_9 = arith.constant 0 : index
    %c0_10 = arith.constant 0 : index
    %10 = vector.load %arg6[%c0_9, %c0_10] : memref<1x32xf32, #tpu.memory_space<vmem>>, vector<1x32xf32>
    %c0_11 = arith.constant 0 : index
    %c0_12 = arith.constant 0 : index
    %11 = vector.load %arg7[%c0_11, %c0_12] : memref<1x32xf32, #tpu.memory_space<vmem>>, vector<1x32xf32>
    %cst_13 = arith.constant dense<0.000000e+00> : vector<8xf32>
    %12 = vector.multi_reduction <add>, %9, %cst_13 [1] : vector<8x32xf32> to vector<8xf32>
    %13 = vector.shape_cast %12 : vector<8xf32> to vector<8x1xf32>
    %cst_14 = arith.constant 3.200000e+01 : f32
    %14 = vector.broadcast %cst_14 : f32 to vector<8x1xf32>
    %15 = arith.divf %13, %14 : vector<8x1xf32>
    %16 = vector.broadcast %15 : vector<8x1xf32> to vector<8x32xf32>
    %17 = arith.subf %9, %16 : vector<8x32xf32>
    %18 = arith.mulf %17, %17 : vector<8x32xf32>
    %cst_15 = arith.constant dense<0.000000e+00> : vector<8xf32>
    %19 = vector.multi_reduction <add>, %18, %cst_15 [1] : vector<8x32xf32> to vector<8xf32>
    %20 = vector.shape_cast %19 : vector<8xf32> to vector<8x1xf32>
    %cst_16 = arith.constant 3.200000e+01 : f32
    %21 = vector.broadcast %cst_16 : f32 to vector<8x1xf32>
    %22 = arith.divf %20, %21 : vector<8x1xf32>
    %23 = vector.broadcast %15 : vector<8x1xf32> to vector<8x32xf32>
    %24 = arith.subf %9, %23 : vector<8x32xf32>
    %cst_17 = arith.constant 9.99999974E-6 : f32
    %25 = vector.broadcast %cst_17 : f32 to vector<8x1xf32>
    %26 = arith.addf %22, %25 : vector<8x1xf32>
    %27 = math.rsqrt %26 : vector<8x1xf32>
    %28 = vector.broadcast %27 : vector<8x1xf32> to vector<8x32xf32>
    %29 = arith.mulf %24, %28 : vector<8x32xf32>
    %30 = vector.broadcast %10 : vector<1x32xf32> to vector<8x32xf32>
    %31 = arith.mulf %30, %29 : vector<8x32xf32>
    %32 = vector.broadcast %11 : vector<1x32xf32> to vector<8x32xf32>
    %33 = arith.addf %31, %32 : vector<8x32xf32>
    %34 = arith.truncf %33 : vector<8x32xf32> to vector<8x32xbf16>
    %c0_18 = arith.constant 0 : index
    %c0_19 = arith.constant 0 : index
    %35 = vector.load %arg8[%c0_18, %c0_19] : memref<32x128xbf16, #tpu.memory_space<vmem>>, vector<32x128xbf16>
    %cst_20 = arith.constant dense<0.000000e+00> : vector<8x128xf32>
    %36 = tpu.matmul %34, %35, %cst_20 {dimension_numbers = #tpu.dot_dimension_numbers<[1], [0], [0], [1], [0, 0, 1, 1], [], []>} : vector<8x32xbf16>, vector<32x128xbf16>, vector<8x128xf32> -> vector<8x128xf32>
    %c0_21 = arith.constant 0 : index
    %c0_22 = arith.constant 0 : index
    %37 = vector.load %arg9[%c0_21, %c0_22] : memref<1x128xf32, #tpu.memory_space<vmem>>, vector<1x128xf32>
    %38 = vector.broadcast %37 : vector<1x128xf32> to vector<8x128xf32>
    %39 = arith.addf %36, %38 : vector<8x128xf32>
    %cst_23 = arith.constant 5.000000e-01 : f32
    %40 = vector.broadcast %cst_23 : f32 to vector<8x128xf32>
    %41 = arith.mulf %40, %39 : vector<8x128xf32>
    %cst_24 = arith.constant 4.471500e-02 : f32
    %42 = vector.broadcast %cst_24 : f32 to vector<8x128xf32>
    %43 = arith.mulf %42, %39 : vector<8x128xf32>
    %44 = arith.mulf %43, %39 : vector<8x128xf32>
    %45 = arith.mulf %44, %39 : vector<8x128xf32>
    %46 = arith.addf %39, %45 : vector<8x128xf32>
    %cst_25 = arith.constant 0.797884583 : f32
    %47 = vector.broadcast %cst_25 : f32 to vector<8x128xf32>
    %48 = arith.mulf %47, %46 : vector<8x128xf32>
    %49 = math.tanh %48 : vector<8x128xf32>
    %cst_26 = arith.constant 1.000000e+00 : f32
    %50 = vector.broadcast %cst_26 : f32 to vector<8x128xf32>
    %51 = arith.addf %50, %49 : vector<8x128xf32>
    %52 = arith.mulf %41, %51 : vector<8x128xf32>
    %53 = arith.truncf %52 : vector<8x128xf32> to vector<8x128xbf16>
    %c0_27 = arith.constant 0 : index
    %c0_28 = arith.constant 0 : index
    %54 = vector.load %arg10[%c0_27, %c0_28] : memref<128x32xbf16, #tpu.memory_space<vmem>>, vector<128x32xbf16>
    %cst_29 = arith.constant dense<0.000000e+00> : vector<8x32xf32>
    %55 = tpu.matmul %53, %54, %cst_29 {dimension_numbers = #tpu.dot_dimension_numbers<[1], [0], [0], [1], [0, 0, 1, 1], [], []>} : vector<8x128xbf16>, vector<128x32xbf16>, vector<8x32xf32> -> vector<8x32xf32>
    %c0_30 = arith.constant 0 : index
    %c0_31 = arith.constant 0 : index
    %56 = vector.load %arg11[%c0_30, %c0_31] : memref<1x32xf32, #tpu.memory_space<vmem>>, vector<1x32xf32>
    %57 = vector.broadcast %56 : vector<1x32xf32> to vector<8x32xf32>
    %58 = arith.addf %55, %57 : vector<8x32xf32>
    %59 = arith.addf %58, %9 : vector<8x32xf32>
    %c0_32 = arith.constant 0 : index
    %c0_33 = arith.constant 0 : index
    %c0_34 = arith.constant 0 : index
    %60 = vector.load %arg12[%c0_32, %c0_33, %c0_34] : memref<1x8x32xf32, #tpu.memory_space<vmem>>, vector<1x8x32xf32>
    %61 = vector.shape_cast %60 : vector<1x8x32xf32> to vector<8x32xf32>
    %62 = vector.shape_cast %59 : vector<8x32xf32> to vector<1x8x32xf32>
    tpu.vector_store %arg12[%c0_32, %c0_33, %c0_34], %62 {strides = array<i32>} : memref<1x8x32xf32, #tpu.memory_space<vmem>>, vector<1x8x32xf32>,
    return
  }
  func.func @transform_0(%arg0: i32, %arg1: i32) -> (i32, i32, i32) {
    %c0_i32 = arith.constant 0 : i32
    %c0_i32_0 = arith.constant 0 : i32
    return %arg0, %arg1, %c0_i32 : i32, i32, i32
  }
  func.func @transform_1(%arg0: i32, %arg1: i32) -> (i32, i32, i32) {
    %c0_i32 = arith.constant 0 : i32
    %c0_i32_0 = arith.constant 0 : i32
    return %arg0, %arg1, %c0_i32 : i32, i32, i32
  }
  func.func @transform_2(%arg0: i32, %arg1: i32) -> (i32, i32) {
    %c0_i32 = arith.constant 0 : i32
    %c0_i32_0 = arith.constant 0 : i32
    %c0_i32_1 = arith.constant 0 : i32
    return %c0_i32, %c0_i32_0 : i32, i32
  }
  func.func @transform_3(%arg0: i32, %arg1: i32) -> (i32, i32) {
    %c0_i32 = arith.constant 0 : i32
    %c0_i32_0 = arith.constant 0 : i32
    %c0_i32_1 = arith.constant 0 : i32
    return %c0_i32, %c0_i32_0 : i32, i32
  }
  func.func @transform_4(%arg0: i32, %arg1: i32) -> (i32, i32) {
    %c0_i32 = arith.constant 0 : i32
    %c0_i32_0 = arith.constant 0 : i32
    %c0_i32_1 = arith.constant 0 : i32
    return %c0_i32, %c0_i32_0 : i32, i32
  }
  func.func @transform_5(%arg0: i32, %arg1: i32) -> (i32, i32) {
    %c0_i32 = arith.constant 0 : i32
    %c0_i32_0 = arith.constant 0 : i32
    %c0_i32_1 = arith.constant 0 : i32
    return %c0_i32, %c0_i32_0 : i32, i32
  }
  func.func @transform_6(%arg0: i32, %arg1: i32) -> (i32, i32) {
    %c0_i32 = arith.constant 0 : i32
    %c0_i32_0 = arith.constant 0 : i32
    %c0_i32_1 = arith.constant 0 : i32
    return %c0_i32, %c0_i32_0 : i32, i32
  }
  func.func @transform_7(%arg0: i32, %arg1: i32) -> (i32, i32) {
    %c0_i32 = arith.constant 0 : i32
    %c0_i32_0 = arith.constant 0 : i32
    %c0_i32_1 = arith.constant 0 : i32
    return %c0_i32, %c0_i32_0 : i32, i32
  }
  func.func @transform_8(%arg0: i32, %arg1: i32) -> (i32, i32) {
    %c0_i32 = arith.constant 0 : i32
    %c0_i32_0 = arith.constant 0 : i32
    %c0_i32_1 = arith.constant 0 : i32
    return %c0_i32, %c0_i32_0 : i32, i32
  }
  func.func @transform_9(%arg0: i32, %arg1: i32) -> (i32, i32) {
    %c0_i32 = arith.constant 0 : i32
    %c0_i32_0 = arith.constant 0 : i32
    %c0_i32_1 = arith.constant 0 : i32
    return %c0_i32, %c0_i32_0 : i32, i32
  }
  func.func @transform_10(%arg0: i32, %arg1: i32) -> (i32, i32, i32) {
    %c0_i32 = arith.constant 0 : i32
    %c0_i32_0 = arith.constant 0 : i32
    return %arg0, %arg1, %c0_i32 : i32, i32, i32
  }
}

</mosaic_0001>

<bundles_post_ra>
// kernel: gpt_forward.13
= control target key start
LH: loop header
LB: loop body
LE: loop exit
PB: predicated region body
PF: predicated region fallthrough
CT: control target
= control target key end

     0   :  { %9 = vsyncpa [#allocation3], 0  ;;  %s1168_s0 = inlined_call_operand.hbm [shape: f32[2,8,32], index: 0, kind: input, shape index: {}]   ;;  %s1169_s1 = inlined_call_operand.hbm [shape: f32[1,32], index: 1, kind: input, shape index: {}]   ;;  %s1170_s2 = inlined_call_operand.hbm [shape: f32[1,32], index: 2, kind: input, shape index: {}]   ;;  %s1171_s3 = inlined_call_operand.hbm [shape: bf16[32,64], index: 3, kind: input, shape index: {}]   ;;  %s1172_s4 = inlined_call_operand.hbm [shape: f32[2,8,64], index: 4, kind: output, shape index: {}]  }
   0x1   :  { %11 = vsyncpa [#allocation3 + $0x1], 0 }
   0x2   :  { %12 = vsyncpa [#allocation6], 0 }
   0x3   :  { %13 = vsyncpa [#allocation9], 0 }
   0x4   :  { %14 = vsyncpa [#allocation4], 0 }
   0x5   :  { %16 = vsyncpa [#allocation4 + $0x1], 0  ;;  %s888_s15 = smov 0   ;;  %s890_s16 = smov 0  }
   0x6   :  { %s892_s17 = smov 0   ;;  %s894_s18 = smov 0  }
   0x7   :  { %s896_s19 = smov 0   ;;  %s898_s20 = smov 0  }
   0x8 LB: > { %s512_s21 = sadd.s32 4294967295, %s852_s20   ;;  %s513_s22 = sadd.s32 4294967294, %s852_s20   ;;  %s852_s20 = sphi %s898_s20, %s22_s20   ;;  %s848_s19 = sphi %s896_s19, %s1196_s19   ;;  %s844_s18 = sphi %s894_s18, %s1195_s18   ;;  %s840_s17 = sphi %s892_s17, %s1194_s17   ;;  %s836_s16 = sphi %s890_s16, %s1193_s16   ;;  %s832_s15 = sphi %s888_s15, %s1192_s15  }
   0x9   : > { %p63_p0 = scmp.ne.s32.totalorder %s836_s16, %s832_s15  ;;  %p922_p1 = scmp.eq.s32.totalorder %s512_s21, 0 }
   0xa   : > { %p926_p2 = scmp.eq.s32.totalorder %s512_s21, 1  ;;  %p165_p3 = scmp.eq.s32.totalorder %s513_s22, 1 }
   0xb   : > { %s1177_s23 = scalar_select %p922_p1, 1, 0 }
   0xc   : > { %s1178_s24 = scalar_select %p926_p2, 1, 0 }
   0xd   : > { %p932_p4 = por %p922_p1, %p63_p0  ;;  %p514_p5 = scmp.ge.s32.totalorder %s852_s20, 1 }
   0xe   : > { %p937_p6 = por %p165_p3, %p63_p0  ;;  %p172_p7 = scmp.lt.s32.totalorder %s852_s20, 3 }
   0xf   : > { %s1179_s25 = scalar_select %p932_p4, 1, 0 }
  0x10   : > { %s1180_s26 = scalar_select %p937_p6, 1, 0 }
  0x11   : > { %p942_p8 = pnand %p514_p5, %p172_p7  ;;  %s854_s28 = smov [#allocation5]  }
  0x12   : > { %s185_s29 = sshll.u32 %s854_s28, 4  ;;  %s855_s30 = smov [#allocation7]   ;;  %s186_s29 = int_to_ptr.vmem [resolvable:$true] %s185_s29 }
  0x13   : > { %s1181_s27 = scalar_select %p942_p8, 1, 0 }
  0x14   : > { %p563_p10 = pneg %p942_p8  ;;  %s196_s5 = sshll.u32 %s855_s30, 4  ;;  %s955_s5 = int_to_ptr.vmem [resolvable:$true] %s196_s5 }
  0x15   : > { %s856_s7 = smov [#allocation8]   ;;  %s648_s11 = scalar_lea.hbm %s1169_s1, 16 }
  0x16   : > { %p951_p11 = pnand %p563_p10, %p922_p1  ;;  %s208_s8 = sshll.u32 %s856_s7, 4  ;;  %s957_s8 = int_to_ptr.vmem [resolvable:$true] %s208_s8 }
  0x17   : > { %p649_p12 = scmp.ne.s32.totalorder %s1169_s1, %s648_s11  ;;  %p655_p5 = scmp.lt.u32.totalorder %s648_s11, %s1169_s1 }
  0x18   : > { %p967_p13 = pneg %p951_p11 }
  0x1a   : > { %p651_p0 = pnand %p967_p13, %p649_p12 }
  0x1c   : > { %p652_p3 = pneg %p651_p0 }
  0x1e   : > { %p657_p7 = pnand %p655_p5, %p652_p3 }
  0x20   : > { %660 = shalt.err (!%p657_p7)
}
  0x21   : > { %s661_s28 = scalar_lea.vmem %s186_s29, 16  ;;  %s668_s30 = scalar_lea.vmem %s186_s29, 32 }
  0x22   : > { %p662_p10 = scmp.ne.s32.totalorder %s186_s29, %s661_s28  ;;  %p669_p1 = scmp.lt.s32.totalorder %s186_s29, %s186_s29 }
  0x23   : > { %p670_p4 = scmp.lt.s32.totalorder %s668_s30, %s661_s28 }
  0x24   : > { %p664_p9 = pnand %p662_p10, %p967_p13 }
  0x25   : > { %p671_p8 = por %p670_p4, %p669_p1 }
  0x26   : > { %p665_p6 = pneg %p664_p9 }
  0x28   : > { %p672_p2 = pnand %p671_p8, %p665_p6 }
  0x2a   : > { %675 = shalt.err (!%p672_p2)
}
  0x2b   : > { %566 = dma.hbm_to_vmem [thread:$0]  (!%p951_p11), %s1169_s1, 16, %s186_s29, [#allocation6]  }
  0x2c   : > { %s676_s12 = scalar_lea.hbm %s1170_s2, 16 }
  0x2d   : > { %p677_p9 = scmp.ne.s32.totalorder %s1170_s2, %s676_s12  ;;  %p683_p2 = scmp.lt.u32.totalorder %s676_s12, %s1170_s2 }
  0x2f   : > { %p679_p12 = pnand %p677_p9, %p967_p13 }
  0x31   : > { %p680_p1 = pneg %p679_p12 }
  0x33   : > { %p685_p4 = pnand %p683_p2, %p680_p1 }
  0x35   : > { %688 = shalt.err (!%p685_p4)
}
  0x36   : > { %s689_s29 = scalar_lea.vmem %s955_s5, 16  ;;  %s696_s30 = scalar_lea.vmem %s955_s5, 32 }
  0x37   : > { %p690_p6 = scmp.ne.s32.totalorder %s955_s5, %s689_s29  ;;  %p697_p3 = scmp.lt.s32.totalorder %s955_s5, %s955_s5 }
  0x38   : > { %p698_p5 = scmp.lt.s32.totalorder %s696_s30, %s689_s29 }
  0x39   : > { %p692_p8 = pnand %p690_p6, %p967_p13 }
  0x3a   : > { %p699_p7 = por %p698_p5, %p697_p3 }
  0x3b   : > { %p693_p0 = pneg %p692_p8 }
  0x3d   : > { %p700_p10 = pnand %p699_p7, %p693_p0 }
  0x3f   : > { %703 = shalt.err (!%p700_p10)
}
  0x40   : > { %569 = dma.hbm_to_vmem [thread:$0]  (!%p951_p11), %s1170_s2, 16, %s955_s5, [#allocation6]  }
  0x41   : > { %s704_s12 = scalar_lea.hbm %s1171_s3, 256 }
  0x42   : > { %p705_p9 = scmp.ne.s32.totalorder %s1171_s3, %s704_s12  ;;  %p711_p2 = scmp.lt.u32.totalorder %s704_s12, %s1171_s3 }
  0x44   : > { %p707_p12 = pnand %p705_p9, %p967_p13 }
  0x46   : > { %p708_p1 = pneg %p707_p12 }
  0x48   : > { %p713_p4 = pnand %p711_p2, %p708_p1 }
  0x4a   : > { %716 = shalt.err (!%p713_p4)
}
  0x4b   : > { %s717_s5 = scalar_lea.vmem %s957_s8, 256  ;;  %p725_p3 = scmp.lt.s32.totalorder %s957_s8, %s957_s8 }
  0x4c   : > { %p718_p6 = scmp.ne.s32.totalorder %s957_s8, %s717_s5  ;;  %p726_p5 = scmp.lt.s32.totalorder %s717_s5, %s717_s5 }
  0x4e   : > { %p720_p8 = pnand %p718_p6, %p967_p13  ;;  %p727_p7 = por %p726_p5, %p725_p3 }
  0x50   : > { %p721_p0 = pneg %p720_p8 }
  0x52   : > { %p728_p10 = pnand %p727_p7, %p721_p0 }
  0x54   : > { %731 = shalt.err (!%p728_p10)
}
  0x55   : > { %s857_s29 = smov 64   ;;  %s858_s14 = smov 4  }
  0x56   : > { %572 = dma.hbm_to_vmem [thread:$0]  (!%p951_p11), %s1171_s3, 256, %s957_s8, [#allocation9], %s857_s29, %s857_s29, %s858_s14  }
  0x57   : > { %s50_s9 = sadd.s32 1, %s840_s17  ;;  %s41_s10 = sadd.s32 1, %s848_s19 }
  0x58   : > { %p57_p13 = scmp.ne.s32.totalorder %s840_s17, %s836_s16  ;;  %p43_p9 = scmp.ge.s32.totalorder %s41_s10, 2 }
  0x59   : > { %p58_p12 = scmp.eq.s32.totalorder %s852_s20, 0  ;;  %p1184_p1 = scmp.ne.s32.totalorder %s1178_s24, 0 }
  0x5a   : > { %p584_p4 = scmp.lt.s32.totalorder %s852_s20, 2  ;;  %s1198_s10 = smov (%p43_p9, %s41_s10), 0 }
  0x5b   : > { %p1037_p2 = por %p1184_p1, %p57_p13  ;;  %p59_p6 = por %p58_p12, %p57_p13 }
  0x5c   : > { %s222_s6 = sand.u32 1, %s840_s17   ;;  %s45_s12 = ssub.s32 %s848_s19, %s1198_s10 }
  0x5d   : > { %p48_p8 = scmp.eq.s32.totalorder %s45_s12, 0  ;;  %s519_s8 = sshll.u32 %s222_s6, 3 }
  0x5e   : > { %s520_s13 = sshll.u32 %s848_s19, 7  ;;  %s226_s5 = scalar_lea.vmem [#allocation2], %s519_s8 }
  0x5f   : > { %s1049_s21 = scalar_select %p48_p8, %s840_s17, %s50_s9  }
  0x60   : > { %s1054_s24 = scalar_lea.hbm %s1168_s0, %s520_s13  ;;  %s234_s29 = sshll.u32 %s226_s5, 4  ;;  %s1056_s29 = int_to_ptr.vmem [resolvable:$true] %s234_s29 }
  0x61   : > { %p1060_p11 = pnand %p584_p4, %p59_p6  ;;  %s223_s30 = scalar_lea.sflag [#allocation3], %s222_s6 }
  0x62   : > { %s732_s7 = scalar_lea.hbm %s1054_s24, 128  ;;  %s737_s8 = scalar_lea.hbm %s1168_s0, 256 }
  0x63   : > { %p733_p0 = scmp.ne.s32.totalorder %s1054_s24, %s732_s7  ;;  %p734_p3 = pneg %p1060_p11 }
  0x64   : > { %p738_p10 = scmp.lt.u32.totalorder %s1054_s24, %s1168_s0  ;;  %p739_p13 = scmp.lt.u32.totalorder %s737_s8, %s732_s7 }
  0x65   : > { %p735_p5 = pnand %p734_p3, %p733_p0  ;;  %p741_p12 = scmp.lt.u32.totalorder %s732_s7, %s1054_s24 }
  0x66   : > { %p740_p9 = por %p739_p13, %p738_p10 }
  0x67   : > { %p736_p7 = pneg %p735_p5 }
  0x68   : > { %p742_p1 = por %p741_p12, %p740_p9 }
  0x6a   : > { %p743_p4 = pnand %p742_p1, %p736_p7 }
  0x6c   : > { %746 = shalt.err (!%p743_p4)
}
  0x6d   : > { %s747_s6 = scalar_lea.vmem %s1056_s29, 128  ;;  %s859_s28 = smov [#allocation2]  }
  0x6e   : > { %p748_p6 = scmp.ne.s32.totalorder %s1056_s29, %s747_s6  ;;  %s752_s5 = sshll.u32 %s859_s28, 4  ;;  %s753_s5 = int_to_ptr.vmem [resolvable:$false] %s752_s5 }
  0x6f   : > { %s754_s9 = scalar_lea.vmem %s753_s5, 256  ;;  %p755_p5 = scmp.lt.s32.totalorder %s1056_s29, %s753_s5 }
  0x70   : > { %p750_p8 = pnand %p748_p6, %p734_p3  ;;  %p756_p10 = scmp.lt.s32.totalorder %s754_s9, %s747_s6 }
  0x72   : > { %p751_p0 = pneg %p750_p8  ;;  %p757_p13 = por %p756_p10, %p755_p5 }
  0x74   : > { %p758_p9 = pnand %p757_p13, %p751_p0 }
  0x76   : > { %761 = shalt.err (!%p758_p9)
}
  0x77   : > { %576 = dma.hbm_to_vmem [thread:$0]  (!%p1060_p11), %s1054_s24, 128, %s1056_s29, %s223_s30  }
  0x78   : > { %p1187_p7 = scmp.ne.s32.totalorder %s1181_s27, 0 }
  0x79   : > { %s1092_s7 = sand.u32 (!%p1187_p7), 1, %s836_s16   ;;  %p1188_p3 = scmp.ne.s32.totalorder (!%p1187_p7), %s1179_s25, 0 }
  0x7a   : > { %243 = sbr.rel (%p1187_p7) target bundleno = 678 (0x2a6), region = 36  ;;  %s522_s12 = sshll.u32 (!%p1187_p7), %s1092_s7, 3 }
  0x7b   : > { %s246_s8 = scalar_lea.sflag (!%p1187_p7), [#allocation3], %s1092_s7  ;;  %s249_s13 = scalar_lea.vmem (!%p1187_p7), [#allocation2], %s522_s12 }
  0x81   : > { %815 = dma.done.wait (%p1188_p3), %s246_s8, 128  }
  0x82   : > { %817 = vsyncadd (%p1188_p3), %s246_s8, 4294967168  ;;  %p1189_p11 = scmp.ne.s32.totalorder %s1177_s23, 0 }
  0x84   : > { %819 = dma.done.wait (%p1189_p11), [#allocation6], 32  }
  0x85   : > { %821 = vsyncadd (%p1189_p11), [#allocation6], 4294967264 }
  0x86   : > { %823 = dma.done.wait (%p1189_p11), [#allocation9], 256  }
  0x87   : > { %825 = vsyncadd (%p1189_p11), [#allocation9], 4294967040  ;;  %vm290_vm0 = vcmask 261120   ;;  %v287_v0 = vld [vmem:[%s249_s13] sm:$0xff]  ;;  %v644_v7 = vld [vmem:[#allocation8] sm:$0xff]   ;;  %v860_v8 = vmov 0.0  }
  0x88   : > { %v291_v1 = vsel %vm290_vm0, %v287_v0, 0.0  ;;  %539 = vmatprep.subr.bf16.mxu0 %v860_v8  ;;  %v645_v9 = vld [vmem:[#allocation8 + $0x8] sm:$0xff]   ;;  %vm861_vm1 = vmmov 0   ;;  %v527_v14 = vld [vmem:[#allocation5] ss:$0 sm:$0xff]  ;;  %s533_s23 = sshll.u32 %s844_s18, 7 }
  0x89   : > { %292 = vadd.xlane.f32.xlu0 %v291_v1  ;;  %540 = vmatpush3.bf16.msra.mxu0 %v644_v7  ;;  %v528_v16 = vld [vmem:[#allocation7] ss:$0 sm:$0xff]  ;;  %s285_s25 = scalar_lea.vmem [#allocation10], %s522_s12  ;;  %vm379_vm2 = vcmask 523264   ;;  %s1119_s14 = scalar_lea.hbm %s1172_s4, %s533_s23 }
  0x8a   : > { %543 = vmatprep.mubr.msk.bf16.mxu0 %vm861_vm1, %v860_v8  ;;  %541 = vmatprep.subr.bf16.mxu0 %v860_v8  ;;  %s397_s27 = sshll.u32 %s285_s25, 4  ;;  %s382_s30 = scalar_lea.sflag [#allocation4], %s1092_s7  ;;  %s1121_s27 = int_to_ptr.vmem [resolvable:$true] %s397_s27 }
  0x8b   : > { %s762_s18 = scalar_lea.vmem %s1121_s27, 128  ;;  %s862_s22 = smov [#allocation10]  }
  0x8c   : > { %p763_p12 = scmp.ne.s32.totalorder %s1121_s27, %s762_s18  ;;  %s766_s6 = sshll.u32 %s862_s22, 4  ;;  %s767_s6 = int_to_ptr.vmem [resolvable:$false] %s766_s6 }
  0x8d   : > { %542 = vmatpush3.bf16.msra.mxu0 %v645_v9  ;;  %s768_s28 = scalar_lea.vmem %s767_s6, 256  ;;  %p769_p6 = scmp.lt.s32.totalorder %s1121_s27, %s767_s6 }
  0x8e   : > { %p764_p1 = pnand %p763_p12, %p1037_p2  ;;  %p770_p8 = scmp.lt.s32.totalorder %s768_s28, %s762_s18 }
  0x90   : > { %p765_p4 = pneg %p764_p1  ;;  %p771_p0 = por %p770_p8, %p769_p6 }
  0x92   : > { %p772_p5 = pnand %p771_p0, %p765_p4 }
 0x116   : > { %v293_v2 = vpop.xlane.xlu0 %292 }
 0x117   : > { %v295_v3 = vmul.f32 0.03125, %v293_v2 }
 0x119   : > { %v296_v4 = vsub.f32 %v287_v0, %v295_v3 }
 0x11b   : > { %v297_v5 = vmul.f32 %v296_v4, %v296_v4 }
 0x11d   : > { %v298_v6 = vsel %vm290_vm0, %v297_v5, 0.0 }
 0x11e   : > { %299 = vadd.xlane.f32.xlu0 %v298_v6 }
 0x1ab   : > { %v300_v10 = vpop.xlane.xlu0 %299 }
 0x1ac   : > { %v301_v11 = vmul.f32 0.03125, %v300_v10 }
 0x1ae   : > { %v302_v12 = vadd.f32 1e-05, %v301_v11 }
 0x1b0   : > { %646 = vrsqrt.f32 %v302_v12 }
 0x1ba   : > { %v647_v13 = vpop.eup %646 }
 0x1bb   : > { %v304_v15 = vmul.f32 %v647_v13, %v296_v4 }
 0x1bd   : > { %v311_v17 = vmul.f32 %v527_v14, %v304_v15 }
 0x1bf   : > { %v318_v18 = vadd.f32 %v528_v16, %v311_v17 }
 0x1c1   : > { %v319_v19 = vpack.c.bf16 %v318_v18, %v318_v18 }
 0x1c3   : > { %544 = vmatmul.mubr.msk.bf16.vlgmr.msra.gmra.mrb[0].mxu0 %vm290_vm0, %v319_v19 }
 0x296   : > { %v373_v20 = vpop.f32.mrb[0].mxu0 }
 0x297   : > { %380 = vst.msk [vmem:[%s285_s25] sm:$0xff] %vm379_vm2, %v373_v20  ;;  %v545_v21 = vpop.f32.mrb[1].mxu0 }
 0x298   : > { %v376_v22 = vpop.f32.mrb[2].mxu0 }
 0x299   : > { %775 = shalt.err (!%p772_p5)
}
 0x29a   : > { %s776_s5 = scalar_lea.hbm %s1119_s14, 128  ;;  %s780_s12 = scalar_lea.hbm %s1172_s4, 256 }
 0x29b   : > { %p777_p10 = scmp.ne.s32.totalorder %s1119_s14, %s776_s5  ;;  %p781_p7 = scmp.lt.u32.totalorder %s1119_s14, %s1172_s4 }
 0x29c   : > { %p782_p3 = scmp.lt.u32.totalorder %s780_s12, %s776_s5  ;;  %p784_p12 = scmp.lt.u32.totalorder %s776_s5, %s1119_s14 }
 0x29d   : > { %p778_p13 = pnand %p777_p10, %p1037_p2 }
 0x29e   : > { %p783_p11 = por %p782_p3, %p781_p7 }
 0x29f   : > { %p779_p9 = pneg %p778_p13 }
 0x2a0   : > { %p785_p1 = por %p784_p12, %p783_p11 }
 0x2a2   : > { %p786_p4 = pnand %p785_p1, %p779_p9 }
 0x2a4   : > { %789 = shalt.err (!%p786_p4)
}
 0x2a5   : > { %561 = dma.vmem_to_hbm [thread:$0]  (%p1037_p2), %s1121_s27, 128, %s1119_s14, %s382_s30   ;;  %v546_v23 = vpop.f32.mrb[3].mxu0 }
 0x2a6 PF: > { %s409_s23 = sand.u32 1, %s832_s15   ;;  %p1190_p6 = scmp.ne.s32.totalorder %s1180_s26, 0 }
 0x2a7   : > { %p1191_p8 = scmp.ge.s32.totalorder %s852_s20, 2  ;;  %s410_s25 = scalar_lea.sflag [#allocation4], %s409_s23 }
 0x2a9   : > { %p578_p0 = pnand %p1191_p8, %p1190_p6 }
 0x2ab   : > { %827 = dma.done.wait (!%p578_p0), %s410_s25, 128  }
 0x2ac   : > { %829 = vsyncadd (!%p578_p0), %s410_s25, 4294967168  ;;  %s22_s20 = sadd.s32 1, %s852_s20   ;;  %s1192_s15 = smov %s836_s16 }
 0x2ad   : > { %p19_p5 = scmp.ge.s32.totalorder %s22_s20, 4   ;;  %s1193_s16 = smov %s840_s17 }
 0x2ae   : > { %s1194_s17 = smov %s1049_s21  ;;  %s1195_s18 = smov %s848_s19 }
 0x2af   : > { %s1196_s19 = smov %s1198_s10  ;;  %21 = sbr.rel (!%p19_p5) target bundleno = 8 (0x8), region = 94 }
 0x2b6   :  { %415 = vsyncpa [#allocation3], 1 }
 0x2b7   :  { %417 = vsyncpa [#allocation3 + $0x1], 1 }
 0x2b8   :  { %418 = vsyncpa [#allocation6], 1 }
 0x2b9   :  { %419 = vsyncpa [#allocation9], 1 }
 0x2ba   :  { %420 = vsyncpa [#allocation4], 1 }
 0x2bb   :  { %422 = vsyncpa [#allocation4 + $0x1], 1 }

// kernel: gpt_forward.7
= control target key start
LH: loop header
LB: loop body
LE: loop exit
PB: predicated region body
PF: predicated region fallthrough
CT: control target
= control target key end

     0   :  { %12 = vsyncpa [#allocation3], 0  ;;  %s1508_s0 = inlined_call_operand.hbm [shape: f32[2,8,32], index: 0, kind: input, shape index: {}]   ;;  %s1509_s1 = inlined_call_operand.hbm [shape: f32[1,32], index: 1, kind: input, shape index: {}]   ;;  %s1510_s2 = inlined_call_operand.hbm [shape: f32[1,32], index: 2, kind: input, shape index: {}]   ;;  %s1511_s3 = inlined_call_operand.hbm [shape: bf16[32,96], index: 3, kind: input, shape index: {}]   ;;  %s1512_s4 = inlined_call_operand.hbm [shape: bf16[2,8,32], index: 4, kind: output, shape index: {0}]   ;;  %s1513_s5 = inlined_call_operand.hbm [shape: bf16[2,8,32], index: 5, kind: output, shape index: {1}]   ;;  %s1514_s6 = inlined_call_operand.hbm [shape: bf16[2,8,32], index: 6, kind: output, shape index: {2}]  }
   0x1   :  { %14 = vsyncpa [#allocation3 + $0x1], 0 }
   0x2   :  { %15 = vsyncpa [#allocation6], 0 }
   0x3   :  { %16 = vsyncpa [#allocation9], 0 }
   0x4   :  { %17 = vsyncpa [#allocation4], 0 }
   0x5   :  { %19 = vsyncpa [#allocation4 + $0x1], 0 }
   0x6   :  { %20 = vsyncpa [#allocation12], 0 }
   0x7   :  { %22 = vsyncpa [#allocation12 + $0x1], 0  ;;  %s1150_s21 = smov 0   ;;  %s1152_s22 = smov 0  }
   0x8   :  { %s1154_s23 = smov 0   ;;  %s1156_s24 = smov 0  }
   0x9   :  { %s1158_s25 = smov 0   ;;  %s1160_s26 = smov 0  }
   0xa LB: > { %s1181_s27 = sadd.s32 4294967295, %s1100_s26   ;;  %s1518_s28 = sadd.s32 4294967294, %s1100_s26   ;;  %s1100_s26 = sphi %s1160_s26, %s28_s26   ;;  %s1096_s25 = sphi %s1158_s25, %s1540_s25   ;;  %s1092_s24 = sphi %s1156_s24, %s1539_s24   ;;  %s1088_s23 = sphi %s1154_s23, %s1538_s23   ;;  %s1084_s22 = sphi %s1152_s22, %s1537_s22   ;;  %s1080_s21 = sphi %s1150_s21, %s1536_s21  }
   0xb   : > { %p62_p0 = scmp.ne.s32.totalorder %s1084_s22, %s1080_s21  ;;  %p1515_p1 = scmp.eq.s32.totalorder %s1181_s27, 0 }
   0xc   : > { %p157_p3 = scmp.eq.s32.totalorder %s1518_s28, 1  ;;  %p682_p5 = scmp.ge.s32.totalorder %s1100_s26, 1 }
   0xd   : > { %p1192_p4 = por %p1515_p1, %p62_p0  ;;  %p220_p7 = scmp.lt.s32.totalorder %s1100_s26, 3 }
   0xe   : > { %p1197_p6 = por %p157_p3, %p62_p0  ;;  %s1102_s8 = smov [#allocation5]  }
   0xf   : > { %s1519_s29 = scalar_select %p1192_p4, 1, 0 }
  0x10   : > { %s1520_s30 = scalar_select %p1197_p6, 1, 0 }
  0x11   : > { %p1202_p8 = pnand %p682_p5, %p220_p7  ;;  %s233_s9 = sshll.u32 %s1102_s8, 4  ;;  %s234_s9 = int_to_ptr.vmem [resolvable:$true] %s233_s9 }
  0x12   : > { %s1103_s10 = smov [#allocation7]   ;;  %s1104_s13 = smov [#allocation8]  }
  0x13   : > { %s1521_s7 = scalar_select %p1202_p8, 1, 0 }
  0x14   : > { %p743_p10 = pneg %p1202_p8  ;;  %s244_s11 = sshll.u32 %s1103_s10, 4  ;;  %s1215_s11 = int_to_ptr.vmem [resolvable:$true] %s244_s11 }
  0x15   : > { %s254_s14 = sshll.u32 %s1104_s13, 4  ;;  %s836_s17 = scalar_lea.hbm %s1509_s1, 16  ;;  %s1217_s14 = int_to_ptr.vmem [resolvable:$true] %s254_s14 }
  0x16   : > { %p1211_p11 = pnand %p743_p10, %p1515_p1  ;;  %p837_p12 = scmp.ne.s32.totalorder %s1509_s1, %s836_s17 }
  0x17   : > { %p843_p5 = scmp.lt.u32.totalorder %s836_s17, %s1509_s1 }
  0x18   : > { %p1227_p13 = pneg %p1211_p11 }
  0x1a   : > { %p839_p0 = pnand %p1227_p13, %p837_p12 }
  0x1c   : > { %p840_p3 = pneg %p839_p0 }
  0x1e   : > { %p845_p7 = pnand %p843_p5, %p840_p3 }
  0x20   : > { %848 = shalt.err (!%p845_p7)
}
  0x21   : > { %s849_s13 = scalar_lea.vmem %s234_s9, 16  ;;  %s856_s15 = scalar_lea.vmem %s234_s9, 32 }
  0x22   : > { %p850_p10 = scmp.ne.s32.totalorder %s234_s9, %s849_s13  ;;  %p857_p2 = scmp.lt.s32.totalorder %s234_s9, %s234_s9 }
  0x23   : > { %p858_p6 = scmp.lt.s32.totalorder %s856_s15, %s849_s13 }
  0x24   : > { %p852_p9 = pnand %p850_p10, %p1227_p13 }
  0x25   : > { %p859_p4 = por %p858_p6, %p857_p2 }
  0x26   : > { %p853_p1 = pneg %p852_p9 }
  0x28   : > { %p860_p8 = pnand %p859_p4, %p853_p1 }
  0x2a   : > { %863 = shalt.err (!%p860_p8)
}
  0x2b   : > { %746 = dma.hbm_to_vmem [thread:$0]  (!%p1211_p11), %s1509_s1, 16, %s234_s9, [#allocation6]  }
  0x2c   : > { %s864_s8 = scalar_lea.hbm %s1510_s2, 16 }
  0x2d   : > { %p865_p9 = scmp.ne.s32.totalorder %s1510_s2, %s864_s8  ;;  %p871_p1 = scmp.lt.u32.totalorder %s864_s8, %s1510_s2 }
  0x2f   : > { %p867_p12 = pnand %p865_p9, %p1227_p13 }
  0x31   : > { %p868_p2 = pneg %p867_p12 }
  0x33   : > { %p873_p4 = pnand %p871_p1, %p868_p2 }
  0x35   : > { %876 = shalt.err (!%p873_p4)
}
  0x36   : > { %s877_s9 = scalar_lea.vmem %s1215_s11, 16  ;;  %s884_s28 = scalar_lea.vmem %s1215_s11, 32 }
  0x37   : > { %p878_p6 = scmp.ne.s32.totalorder %s1215_s11, %s877_s9  ;;  %p885_p3 = scmp.lt.s32.totalorder %s1215_s11, %s1215_s11 }
  0x38   : > { %p886_p5 = scmp.lt.s32.totalorder %s884_s28, %s877_s9 }
  0x39   : > { %p880_p8 = pnand %p878_p6, %p1227_p13 }
  0x3a   : > { %p887_p7 = por %p886_p5, %p885_p3 }
  0x3b   : > { %p881_p0 = pneg %p880_p8 }
  0x3d   : > { %p888_p10 = pnand %p887_p7, %p881_p0 }
  0x3f   : > { %891 = shalt.err (!%p888_p10)
}
  0x40   : > { %749 = dma.hbm_to_vmem [thread:$0]  (!%p1211_p11), %s1510_s2, 16, %s1215_s11, [#allocation6]  }
  0x41   : > { %s892_s8 = scalar_lea.hbm %s1511_s3, 256 }
  0x42   : > { %p893_p9 = scmp.ne.s32.totalorder %s1511_s3, %s892_s8  ;;  %p899_p1 = scmp.lt.u32.totalorder %s892_s8, %s1511_s3 }
  0x44   : > { %p895_p12 = pnand %p893_p9, %p1227_p13 }
  0x46   : > { %p896_p2 = pneg %p895_p12 }
  0x48   : > { %p901_p4 = pnand %p899_p1, %p896_p2 }
  0x4a   : > { %904 = shalt.err (!%p901_p4)
}
  0x4b   : > { %s905_s11 = scalar_lea.vmem %s1217_s14, 256  ;;  %p913_p3 = scmp.lt.s32.totalorder %s1217_s14, %s1217_s14 }
  0x4c   : > { %p906_p6 = scmp.ne.s32.totalorder %s1217_s14, %s905_s11  ;;  %p914_p5 = scmp.lt.s32.totalorder %s905_s11, %s905_s11 }
  0x4e   : > { %p908_p8 = pnand %p906_p6, %p1227_p13  ;;  %p915_p7 = por %p914_p5, %p913_p3 }
  0x50   : > { %p909_p0 = pneg %p908_p8 }
  0x52   : > { %p916_p10 = pnand %p915_p7, %p909_p0 }
  0x54   : > { %919 = shalt.err (!%p916_p10)
}
  0x55   : > { %s1105_s28 = smov 64   ;;  %s1106_s20 = smov 4  }
  0x56   : > { %752 = dma.hbm_to_vmem [thread:$0]  (!%p1211_p11), %s1511_s3, 256, %s1217_s14, [#allocation9], %s1105_s28, %s1105_s28, %s1106_s20  }
  0x57   : > { %s49_s17 = sadd.s32 1, %s1088_s23  ;;  %s40_s19 = sadd.s32 1, %s1096_s25 }
  0x58   : > { %p56_p13 = scmp.ne.s32.totalorder %s1088_s23, %s1084_s22  ;;  %p42_p9 = scmp.ge.s32.totalorder %s40_s19, 2 }
  0x59   : > { %p57_p12 = scmp.eq.s32.totalorder %s1100_s26, 0  ;;  %p1524_p2 = scmp.eq.s32.totalorder %s1181_s27, 1 }
  0x5a   : > { %p770_p4 = scmp.lt.s32.totalorder %s1100_s26, 2  ;;  %s1542_s19 = smov (%p42_p9, %s40_s19), 0 }
  0x5b   : > { %p1297_p1 = por %p1524_p2, %p56_p13  ;;  %p58_p6 = por %p57_p12, %p56_p13 }
  0x5c   : > { %s268_s12 = sand.u32 1, %s1088_s23   ;;  %s44_s10 = ssub.s32 %s1096_s25, %s1542_s19 }
  0x5d   : > { %p47_p8 = scmp.eq.s32.totalorder %s44_s10, 0  ;;  %s687_s14 = sshll.u32 %s268_s12, 3 }
  0x5e   : > { %s688_s13 = sshll.u32 %s1096_s25, 7  ;;  %s272_s20 = scalar_lea.vmem [#allocation2], %s687_s14 }
  0x5f   : > { %s1309_s15 = scalar_select %p47_p8, %s1088_s23, %s49_s17  }
  0x60   : > { %s1314_s28 = scalar_lea.hbm %s1508_s0, %s688_s13  ;;  %s280_s16 = sshll.u32 %s272_s20, 4  ;;  %s1316_s16 = int_to_ptr.vmem [resolvable:$true] %s280_s16 }
  0x61   : > { %p1320_p11 = pnand %p770_p4, %p58_p6  ;;  %s269_s17 = scalar_lea.sflag [#allocation3], %s268_s12 }
  0x62   : > { %s920_s10 = scalar_lea.hbm %s1314_s28, 128  ;;  %s925_s9 = scalar_lea.hbm %s1508_s0, 256 }
  0x63   : > { %p921_p0 = scmp.ne.s32.totalorder %s1314_s28, %s920_s10  ;;  %p922_p3 = pneg %p1320_p11 }
  0x64   : > { %p926_p10 = scmp.lt.u32.totalorder %s1314_s28, %s1508_s0  ;;  %p927_p13 = scmp.lt.u32.totalorder %s925_s9, %s920_s10 }
  0x65   : > { %p923_p5 = pnand %p922_p3, %p921_p0  ;;  %p929_p12 = scmp.lt.u32.totalorder %s920_s10, %s1314_s28 }
  0x66   : > { %p928_p9 = por %p927_p13, %p926_p10 }
  0x67   : > { %p924_p7 = pneg %p923_p5 }
  0x68   : > { %p930_p2 = por %p929_p12, %p928_p9 }
  0x6a   : > { %p931_p4 = pnand %p930_p2, %p924_p7 }
  0x6c   : > { %934 = shalt.err (!%p931_p4)
}
  0x6d   : > { %s935_s12 = scalar_lea.vmem %s1316_s16, 128  ;;  %s1107_s14 = smov [#allocation2]  }
  0x6e   : > { %p936_p6 = scmp.ne.s32.totalorder %s1316_s16, %s935_s12  ;;  %s940_s13 = sshll.u32 %s1107_s14, 4  ;;  %s941_s13 = int_to_ptr.vmem [resolvable:$false] %s940_s13 }
  0x6f   : > { %s942_s11 = scalar_lea.vmem %s941_s13, 256  ;;  %p943_p5 = scmp.lt.s32.totalorder %s1316_s16, %s941_s13 }
  0x70   : > { %p938_p8 = pnand %p936_p6, %p922_p3  ;;  %p944_p10 = scmp.lt.s32.totalorder %s942_s11, %s935_s12 }
  0x72   : > { %p939_p0 = pneg %p938_p8  ;;  %p945_p13 = por %p944_p10, %p943_p5 }
  0x74   : > { %p946_p9 = pnand %p945_p13, %p939_p0 }
  0x76   : > { %949 = shalt.err (!%p946_p9)
}
  0x77   : > { %756 = dma.hbm_to_vmem [thread:$0]  (!%p1320_p11), %s1314_s28, 128, %s1316_s16, %s269_s17  }
  0x78   : > { %p1527_p7 = scmp.ne.s32.totalorder %s1521_s7, 0 }
  0x79   : > { %s1352_s10 = sand.u32 (!%p1527_p7), 1, %s1084_s22   ;;  %p1528_p3 = scmp.ne.s32.totalorder (!%p1527_p7), %s1519_s29, 0 }
  0x7a   : > { %289 = sbr.rel (%p1527_p7) target bundleno = 819 (0x333), region = 36  ;;  %s690_s9 = sshll.u32 (!%p1527_p7), %s1352_s10, 3 }
  0x7b   : > { %s292_s20 = scalar_lea.sflag (!%p1527_p7), [#allocation3], %s1352_s10  ;;  %s295_s12 = scalar_lea.vmem (!%p1527_p7), [#allocation2], %s690_s9 }
  0x81   : > { %1059 = dma.done.wait (%p1528_p3), %s292_s20, 128  }
  0x82   : > { %1061 = vsyncadd (%p1528_p3), %s292_s20, 4294967168  ;;  %p1529_p12 = scmp.eq.s32.totalorder %s1181_s27, 0 }
  0x84   : > { %1063 = dma.done.wait (%p1529_p12), [#allocation6], 32   ;;  %p1530_p11 = pmov %p1529_p12 }
  0x86   : > { %1065 = vsyncadd (%p1530_p11), [#allocation6], 4294967264  ;;  %p1531_p2 = pmov %p1530_p11 }
  0x88   : > { %1067 = dma.done.wait (%p1531_p2), [#allocation9], 256   ;;  %p1532_p4 = pmov %p1531_p2 }
  0x89   : > { %vm350_vm0 = vcmask 261120   ;;  %v347_v0 = vld [vmem:[%s295_s12] sm:$0xff]  ;;  %v832_v7 = vld [vmem:[#allocation8] sm:$0xff]   ;;  %v1108_v8 = vmov 0.0   ;;  %vm1109_vm1 = vmmov 0   ;;  %s1372_s29 = sshll.u32 %s1352_s10, 2 }
  0x8a   : > { %1069 = vsyncadd (%p1532_p4), [#allocation9], 4294967040  ;;  %v351_v1 = vsel %vm350_vm0, %v347_v0, 0.0  ;;  %715 = vmatprep.subr.bf16.mxu0 %v1108_v8  ;;  %v833_v9 = vld [vmem:[#allocation8 + $0x8] sm:$0xff]   ;;  %719 = vmatprep.mubr.msk.bf16.mxu0 %vm1109_vm1, %v1108_v8  ;;  %v697_v14 = vld [vmem:[#allocation5] ss:$0 sm:$0xff] }
  0x8b   : > { %352 = vadd.xlane.f32.xlu0 %v351_v1  ;;  %716 = vmatpush3.bf16.msra.mxu0 %v832_v7  ;;  %v698_v16 = vld [vmem:[#allocation7] ss:$0 sm:$0xff]  ;;  %s1375_s7 = sshll.u32 %s1092_s24, 6  ;;  %s331_s28 = scalar_lea.vmem [#allocation10], %s1372_s29  ;;  %vm441_vm2 = vcmask 257024  }
  0x8c   : > { %717 = vmatprep.subr.bf16.mxu0 %v1108_v8  ;;  %s480_s16 = sshll.u32 %s331_s28, 4  ;;  %s1110_s18 = smov 96   ;;  %s1384_s16 = int_to_ptr.vmem [resolvable:$true] %s480_s16 }
  0x8d   : > { %s1382_s13 = scalar_lea.hbm %s1512_s4, %s1375_s7  ;;  %s456_s24 = scalar_lea.sflag [#allocation4], %s1352_s10 }
  0x8e   : > { %s950_s11 = scalar_lea.vmem %s1384_s16, 64  ;;  %s1111_s9 = smov [#allocation10]  }
  0x8f   : > { %718 = vmatpush3.bf16.msra.mxu0 %v833_v9  ;;  %p951_p6 = scmp.ne.s32.totalorder %s1384_s16, %s950_s11  ;;  %s954_s20 = sshll.u32 %s1111_s9, 4  ;;  %s955_s20 = int_to_ptr.vmem [resolvable:$false] %s954_s20 }
  0x90   : > { %s956_s12 = scalar_lea.vmem %s955_s20, 128  ;;  %p957_p5 = scmp.lt.s32.totalorder %s1384_s16, %s955_s20 }
  0x91   : > { %p952_p8 = pnand %p951_p6, %p1297_p1  ;;  %p958_p10 = scmp.lt.s32.totalorder %s956_s12, %s950_s11 }
  0x93   : > { %p953_p0 = pneg %p952_p8  ;;  %p959_p13 = por %p958_p10, %p957_p5 }
  0x95   : > { %p960_p9 = pnand %p959_p13, %p953_p0 }
 0x118   : > { %v353_v2 = vpop.xlane.xlu0 %352 }
 0x119   : > { %v355_v3 = vmul.f32 0.03125, %v353_v2 }
 0x11b   : > { %v356_v4 = vsub.f32 %v347_v0, %v355_v3 }
 0x11d   : > { %v357_v5 = vmul.f32 %v356_v4, %v356_v4 }
 0x11f   : > { %v358_v6 = vsel %vm350_vm0, %v357_v5, 0.0 }
 0x120   : > { %359 = vadd.xlane.f32.xlu0 %v358_v6 }
 0x1ad   : > { %v360_v10 = vpop.xlane.xlu0 %359 }
 0x1ae   : > { %v361_v11 = vmul.f32 0.03125, %v360_v10 }
 0x1b0   : > { %v362_v12 = vadd.f32 1e-05, %v361_v11 }
 0x1b2   : > { %834 = vrsqrt.f32 %v362_v12 }
 0x1bc   : > { %v835_v13 = vpop.eup %834 }
 0x1bd   : > { %v364_v15 = vmul.f32 %v835_v13, %v356_v4 }
 0x1bf   : > { %v371_v17 = vmul.f32 %v697_v14, %v364_v15 }
 0x1c1   : > { %v378_v18 = vadd.f32 %v698_v16, %v371_v17 }
 0x1c3   : > { %v379_v19 = vpack.c.bf16 %v378_v18, %v378_v18 }
 0x1c5   : > { %720 = vmatmul.mubr.msk.bf16.vlgmr.msra.gmra.mrb[0].mxu0 %vm350_vm0, %v379_v19 }
 0x298   : > { %v433_v20 = vpop.f32.mrb[0].mxu0 }
 0x299   : > { %v439_v21 = vmul.f32 0.35355338, %v433_v20  ;;  %v721_v22 = vpop.f32.mrb[1].mxu0  ;;  %v711_v23 = vpack.c.bf16 %v433_v20, %v433_v20 }
 0x29a   : > { %v436_v24 = vpop.f32.mrb[2].mxu0 }
 0x29b   : > { %v440_v25 = vpack.c.bf16 %v439_v21, %v439_v21  ;;  %447 = vrot.lane.b32.xlu1 %v711_v23, %s1110_s18  ;;  %v722_v26 = vpop.f32.mrb[3].mxu0 }
 0x29d   : > { %442 = vst.msk [vmem:[%s331_s28] sm:$0xf] %vm441_vm2, %v440_v25 }
 0x29e   : > { %963 = shalt.err (!%p960_p9)
}
 0x29f   : > { %s964_s10 = scalar_lea.hbm %s1382_s13, 64  ;;  %s968_s17 = scalar_lea.hbm %s1512_s4, 128 }
 0x2a0   : > { %p965_p7 = scmp.ne.s32.totalorder %s1382_s13, %s964_s10  ;;  %p969_p11 = scmp.lt.u32.totalorder %s1382_s13, %s1512_s4 }
 0x2a1   : > { %p970_p2 = scmp.lt.u32.totalorder %s968_s17, %s964_s10  ;;  %p972_p6 = scmp.lt.u32.totalorder %s964_s10, %s1382_s13 }
 0x2a2   : > { %p966_p3 = pnand %p965_p7, %p1297_p1 }
 0x2a3   : > { %p971_p4 = por %p970_p2, %p969_p11 }
 0x2a4   : > { %p967_p12 = pneg %p966_p3 }
 0x2a5   : > { %p973_p8 = por %p972_p6, %p971_p4 }
 0x2a7   : > { %p974_p0 = pnand %p973_p8, %p967_p12 }
 0x2a9   : > { %977 = shalt.err (!%p974_p0)
}
 0x2aa   : > { %737 = dma.vmem_to_hbm [thread:$0]  (%p1297_p1), %s1384_s16, 64, %s1382_s13, %s456_s24  }
 0x2ab   : > { %s1112_s11 = smov 64   ;;  %s460_s20 = sand.u32 1, %s1181_s27  }
 0x2ac   : > { %451 = vrot.lane.b32.xlu1 %v711_v23, %s1112_s11  ;;  %s338_s12 = scalar_lea.vmem [#allocation11], %s1372_s29  ;;  %s1415_s17 = scalar_lea.hbm %s1513_s5, %s1375_s7 }
 0x2ad   : > { %s494_s28 = sshll.u32 %s338_s12, 4  ;;  %s345_s14 = scalar_lea.vmem [#allocation13], %s1372_s29  ;;  %s1417_s28 = int_to_ptr.vmem [resolvable:$true] %s494_s28 }
 0x2ae   : > { %s1422_s9 = sshll.u32 %s345_s14, 4  ;;  %s1425_s27 = scalar_lea.sflag [#allocation12], %s460_s20  ;;  %s1456_s9 = int_to_ptr.vmem [resolvable:$true] %s1422_s9 }
 0x2af   : > { %s978_s16 = scalar_lea.vmem %s1417_s28, 64  ;;  %s1113_s13 = smov [#allocation11]  }
 0x2b0   : > { %p979_p5 = scmp.ne.s32.totalorder %s1417_s28, %s978_s16  ;;  %s982_s24 = sshll.u32 %s1113_s13, 4  ;;  %s983_s24 = int_to_ptr.vmem [resolvable:$false] %s982_s24 }
 0x2b1   : > { %s984_s11 = scalar_lea.vmem %s983_s24, 128  ;;  %p985_p9 = scmp.lt.s32.totalorder %s1417_s28, %s983_s24 }
 0x2b2   : > { %p980_p10 = pnand %p979_p5, %p1297_p1  ;;  %p986_p7 = scmp.lt.s32.totalorder %s984_s11, %s978_s16 }
 0x2b4   : > { %p981_p13 = pneg %p980_p10  ;;  %p987_p3 = por %p986_p7, %p985_p9 }
 0x2b6   : > { %p988_p12 = pnand %p987_p3, %p981_p13 }
 0x30d   : > { %v448_v27 = vpop.permute.xlu1 %447 }
 0x30e   : > { %450 = vst.msk [vmem:[%s338_s12] sm:$0xf] %vm441_vm2, %v448_v27 }
 0x30f   : > { %991 = shalt.err (!%p988_p12)
}
 0x310   : > { %s992_s20 = scalar_lea.hbm %s1415_s17, 64  ;;  %s996_s18 = scalar_lea.hbm %s1513_s5, 128 }
 0x311   : > { %p993_p11 = scmp.ne.s32.totalorder %s1415_s17, %s992_s20  ;;  %p997_p6 = scmp.lt.u32.totalorder %s1415_s17, %s1513_s5 }
 0x312   : > { %p998_p8 = scmp.lt.u32.totalorder %s996_s18, %s992_s20  ;;  %p1000_p5 = scmp.lt.u32.totalorder %s992_s20, %s1415_s17 }
 0x313   : > { %p994_p2 = pnand %p993_p11, %p1297_p1 }
 0x314   : > { %p999_p0 = por %p998_p8, %p997_p6 }
 0x315   : > { %p995_p4 = pneg %p994_p2 }
 0x316   : > { %p1001_p10 = por %p1000_p5, %p999_p0 }
 0x318   : > { %p1002_p13 = pnand %p1001_p10, %p995_p4 }
 0x31a   : > { %1005 = shalt.err (!%p1002_p13)
}
 0x31b   : > { %738 = dma.vmem_to_hbm [thread:$0]  (%p1297_p1), %s1417_s28, 64, %s1415_s17, %s1425_s27  }
 0x31c   : > { %s1453_s12 = scalar_lea.hbm %s1514_s6, %s1375_s7  ;;  %s1006_s20 = scalar_lea.vmem %s1456_s9, 64 }
 0x31d   : > { %p1007_p9 = scmp.ne.s32.totalorder %s1456_s9, %s1006_s20  ;;  %s1114_s28 = smov [#allocation13]  }
 0x31e   : > { %v452_v28 = vpop.permute.xlu1 %451  ;;  %s1010_s17 = sshll.u32 %s1114_s28, 4  ;;  %s1011_s17 = int_to_ptr.vmem [resolvable:$false] %s1010_s17 }
 0x31f   : > { %454 = vst.msk [vmem:[%s345_s14] sm:$0xf] %vm441_vm2, %v452_v28  ;;  %p1008_p7 = pnand %p1007_p9, %p1297_p1  ;;  %s1012_s10 = scalar_lea.vmem %s1011_s17, 128 }
 0x320   : > { %p1013_p12 = scmp.lt.s32.totalorder %s1456_s9, %s1011_s17  ;;  %p1014_p11 = scmp.lt.s32.totalorder %s1012_s10, %s1006_s20 }
 0x321   : > { %p1009_p3 = pneg %p1008_p7 }
 0x322   : > { %p1015_p2 = por %p1014_p11, %p1013_p12 }
 0x324   : > { %p1016_p4 = pnand %p1015_p2, %p1009_p3 }
 0x326   : > { %1019 = shalt.err (!%p1016_p4)
}
 0x327   : > { %s1020_s29 = scalar_lea.hbm %s1453_s12, 64  ;;  %s1024_s18 = scalar_lea.hbm %s1514_s6, 128 }
 0x328   : > { %p1021_p6 = scmp.ne.s32.totalorder %s1453_s12, %s1020_s29  ;;  %p1025_p5 = scmp.lt.u32.totalorder %s1453_s12, %s1514_s6 }
 0x329   : > { %p1026_p10 = scmp.lt.u32.totalorder %s1024_s18, %s1020_s29  ;;  %p1028_p9 = scmp.lt.u32.totalorder %s1020_s29, %s1453_s12 }
 0x32a   : > { %p1022_p8 = pnand %p1021_p6, %p1297_p1 }
 0x32b   : > { %p1027_p13 = por %p1026_p10, %p1025_p5 }
 0x32c   : > { %p1023_p0 = pneg %p1022_p8 }
 0x32d   : > { %p1029_p7 = por %p1028_p9, %p1027_p13 }
 0x32f   : > { %p1030_p3 = pnand %p1029_p7, %p1023_p0 }
 0x331   : > { %1033 = shalt.err (!%p1030_p3)
}
 0x332   : > { %739 = dma.vmem_to_hbm [thread:$0]  (%p1297_p1), %s1456_s9, 64, %s1453_s12, %s1425_s27  }
 0x333 PF: > { %s520_s16 = sand.u32 1, %s1080_s21   ;;  %p1533_p12 = scmp.ne.s32.totalorder %s1520_s30, 0 }
 0x334   : > { %p1534_p11 = scmp.ge.s32.totalorder %s1100_s26, 2  ;;  %s521_s11 = scalar_lea.sflag [#allocation4], %s520_s16 }
 0x336   : > { %p758_p2 = pnand %p1534_p11, %p1533_p12 }
 0x338   : > { %1071 = dma.done.wait (!%p758_p2), %s521_s11, 64  }
 0x339   : > { %1073 = vsyncadd (!%p758_p2), %s521_s11, 4294967232  ;;  %s1535_s20 = sadd.s32 4294967294, %s1100_s26  }
 0x33a   : > { %s529_s28 = sand.u32 1, %s1535_s20  }
 0x33b   : > { %s530_s17 = scalar_lea.sflag [#allocation12], %s529_s28 }
 0x33c   : > { %1075 = dma.done.wait (!%p758_p2), %s530_s17, 128  }
 0x33d   : > { %1077 = vsyncadd (!%p758_p2), %s530_s17, 4294967168  ;;  %s28_s26 = sadd.s32 1, %s1100_s26   ;;  %s1536_s21 = smov %s1084_s22 }
 0x33e   : > { %p25_p1 = scmp.ge.s32.totalorder %s28_s26, 4   ;;  %s1537_s22 = smov %s1088_s23 }
 0x33f   : > { %s1538_s23 = smov %s1309_s15  ;;  %s1539_s24 = smov %s1096_s25 }
 0x340   : > { %s1540_s25 = smov %s1542_s19  ;;  %27 = sbr.rel (!%p25_p1) target bundleno = 10 (0xa), region = 125 }
 0x347   :  { %544 = vsyncpa [#allocation3], 1 }
 0x348   :  { %546 = vsyncpa [#allocation3 + $0x1], 1 }
 0x349   :  { %547 = vsyncpa [#allocation6], 1 }
 0x34a   :  { %548 = vsyncpa [#allocation9], 1 }
 0x34b   :  { %549 = vsyncpa [#allocation4], 1 }
 0x34c   :  { %551 = vsyncpa [#allocation4 + $0x1], 1 }
 0x34d   :  { %552 = vsyncpa [#allocation12], 1 }
 0x34e   :  { %554 = vsyncpa [#allocation12 + $0x1], 1 }

// kernel: gpt_forward.9
= control target key start
LH: loop header
LB: loop body
LE: loop exit
PB: predicated region body
PF: predicated region fallthrough
CT: control target
= control target key end

     0   :  { %s2212_s0 = inlined_call_operand.hbm [shape: bf16[2,8,32], index: 0, kind: input, shape index: {}]   ;;  %s2213_s1 = inlined_call_operand.hbm [shape: f32[2,8,32], index: 1, kind: input, shape index: {}]   ;;  %s2214_s2 = inlined_call_operand.hbm [shape: bf16[32,32], index: 2, kind: input, shape index: {}]   ;;  %s2215_s3 = inlined_call_operand.hbm [shape: f32[1,32], index: 3, kind: input, shape index: {}]   ;;  %s2216_s4 = inlined_call_operand.hbm [shape: f32[1,32], index: 4, kind: input, shape index: {}]   ;;  %s2217_s5 = inlined_call_operand.hbm [shape: f32[1,32], index: 5, kind: input, shape index: {}]   ;;  %s2218_s6 = inlined_call_operand.hbm [shape: bf16[32,128], index: 6, kind: input, shape index: {}]   ;;  %s2219_s7 = inlined_call_operand.hbm [shape: f32[1,128], index: 7, kind: input, shape index: {}]   ;;  %s2220_s8 = inlined_call_operand.hbm [shape: bf16[128,32], index: 8, kind: input, shape index: {}]   ;;  %s2221_s9 = inlined_call_operand.hbm [shape: f32[1,32], index: 9, kind: input, shape index: {}]   ;;  %s2222_s10 = inlined_call_operand.hbm [shape: f32[2,8,32], index: 10, kind: output, shape index: {}]  }
   0x1   :  { %2232 = sst [smem:[#allocation30_spill]] %s2212_s0 }
   0x2   :  { %2233 = sst [smem:[#allocation31_spill]] %s2213_s1 }
   0x3   :  { %2234 = sst [smem:[#allocation32_spill]] %s2214_s2 }
   0x4   :  { %2235 = sst [smem:[#allocation33_spill]] %s2215_s3 }
   0x5   :  { %2236 = sst [smem:[#allocation34_spill]] %s2216_s4 }
   0x6   :  { %2237 = sst [smem:[#allocation35_spill]] %s2217_s5 }
   0x7   :  { %2238 = sst [smem:[#allocation36_spill]] %s2222_s10 }
   0x8   :  { %15 = vsyncpa [#allocation3], 0 }
   0x9   :  { %17 = vsyncpa [#allocation3 + $0x1], 0 }
   0xa   :  { %18 = vsyncpa [#allocation6], 0 }
   0xb   :  { %20 = vsyncpa [#allocation6 + $0x1], 0 }
   0xc   :  { %21 = vsyncpa [#allocation9], 0 }
   0xd   :  { %22 = vsyncpa [#allocation12], 0 }
   0xe   :  { %23 = vsyncpa [#allocation15], 0 }
   0xf   :  { %24 = vsyncpa [#allocation18], 0 }
  0x10   :  { %25 = vsyncpa [#allocation4], 0 }
  0x11   :  { %27 = vsyncpa [#allocation4 + $0x1], 0  ;;  %s1756_s13 = smov 0   ;;  %s1758_s14 = smov 0  }
  0x12   :  { %s1760_s15 = smov 0   ;;  %s1762_s16 = smov 0  }
  0x13   :  { %s1764_s17 = smov 0   ;;  %s1766_s18 = smov 0  }
  0x14 LB: > { %2239 = sst [smem:[#allocation28_spill]] %s1676_s16  ;;  %s1787_s19 = sadd.s32 4294967295, %s1684_s18   ;;  %s1684_s18 = sphi %s1766_s18, %s33_s18   ;;  %s1680_s17 = sphi %s1764_s17, %s2281_s17   ;;  %s1676_s16 = sphi %s1762_s16, %s2280_s16   ;;  %s1672_s15 = sphi %s1760_s15, %s2279_s15   ;;  %s1668_s14 = sphi %s1758_s14, %s2278_s14   ;;  %s1664_s13 = sphi %s1756_s13, %s2277_s13  }
  0x15   : > { %p1026_p0 = scmp.ge.s32.totalorder %s1684_s18, 1  ;;  %p2226_p1 = scmp.eq.s32.totalorder %s1787_s19, 0 }
  0x16   : > { %p302_p2 = scmp.lt.s32.totalorder %s1684_s18, 3  ;;  %s1686_s21 = smov [#allocation7]  }
  0x17   : > { %s314_s22 = sshll.u32 %s1686_s21, 4  ;;  %s1687_s24 = smov [#allocation8]   ;;  %s1796_s22 = int_to_ptr.vmem [resolvable:$true] %s314_s22 }
  0x18   : > { %p1792_p3 = pnand %p1026_p0, %p302_p2  ;;  %s328_s25 = sshll.u32 %s1687_s24, 4  ;;  %s1807_s25 = int_to_ptr.vmem [resolvable:$true] %s328_s25 }
  0x19   : > { %s1688_s26 = smov [#allocation11]   ;;  %s2243_s2 = sld [smem:[#allocation32_spill]] }
  0x1a   : > { %s2240_s20 = scalar_select %p1792_p3, 1, 0 }
  0x1b   : > { %p1164_p4 = pneg %p1792_p3  ;;  %s1809_s27 = sshll.u32 %s1688_s26, 4  ;;  %s351_s27 = int_to_ptr.vmem [resolvable:$true] %s1809_s27 }
  0x1c   : > { %2241 = sst [smem:[#allocation29_spill]] %s2240_s20 }
  0x1d   : > { %p1803_p6 = pnand %p1164_p4, %p2226_p1 }
  0x1f   : > { %s1294_s30 = scalar_lea.hbm %s2243_s2, 256  ;;  %p1819_p8 = pneg %p1803_p6 }
  0x20   : > { %p1295_p7 = scmp.ne.s32.totalorder %s2243_s2, %s1294_s30  ;;  %p1301_p11 = scmp.lt.u32.totalorder %s1294_s30, %s2243_s2 }
  0x22   : > { %p1297_p9 = pnand %p1819_p8, %p1295_p7 }
  0x24   : > { %p1298_p10 = pneg %p1297_p9 }
  0x26   : > { %p1303_p12 = pnand %p1301_p11, %p1298_p10 }
  0x28   : > { %1306 = shalt.err (!%p1303_p12)
}
  0x29   : > { %s1307_s28 = scalar_lea.vmem %s1796_s22, 256  ;;  %p1315_p4 = scmp.lt.s32.totalorder %s1796_s22, %s1796_s22 }
  0x2a   : > { %p1308_p13 = scmp.ne.s32.totalorder %s1796_s22, %s1307_s28  ;;  %p1316_p5 = scmp.lt.s32.totalorder %s1307_s28, %s1307_s28 }
  0x2c   : > { %p1310_p0 = pnand %p1308_p13, %p1819_p8  ;;  %p1317_p7 = por %p1316_p5, %p1315_p4 }
  0x2e   : > { %p1311_p2 = pneg %p1310_p0 }
  0x30   : > { %p1318_p9 = pnand %p1317_p7, %p1311_p2 }
  0x32   : > { %1321 = shalt.err (!%p1318_p9)
}
  0x33   : > { %s2228_s29 = smov 64   ;;  %s1690_s30 = smov 4  }
  0x34   : > { %1167 = dma.hbm_to_vmem [thread:$0]  (!%p1803_p6), %s2243_s2, 256, %s1796_s22, [#allocation6], %s2228_s29, %s2228_s29, %s1690_s30  }
  0x35   : > { %s2245_s3 = sld [smem:[#allocation33_spill]] }
  0x3b   : > { %s1322_s28 = scalar_lea.hbm %s2245_s3, 16 }
  0x3c   : > { %p1323_p5 = scmp.ne.s32.totalorder %s2245_s3, %s1322_s28  ;;  %p1329_p12 = scmp.lt.u32.totalorder %s1322_s28, %s2245_s3 }
  0x3e   : > { %p1325_p10 = pnand %p1323_p5, %p1819_p8 }
  0x40   : > { %p1326_p11 = pneg %p1325_p10 }
  0x42   : > { %p1331_p13 = pnand %p1329_p12, %p1326_p11 }
  0x44   : > { %1334 = shalt.err (!%p1331_p13)
}
  0x45   : > { %s1335_s22 = scalar_lea.vmem %s1807_s25, 16  ;;  %s1342_s10 = scalar_lea.vmem %s1807_s25, 32 }
  0x46   : > { %p1336_p0 = scmp.ne.s32.totalorder %s1807_s25, %s1335_s22  ;;  %p1343_p7 = scmp.lt.s32.totalorder %s1807_s25, %s1807_s25 }
  0x47   : > { %p1344_p9 = scmp.lt.s32.totalorder %s1342_s10, %s1335_s22 }
  0x48   : > { %p1338_p2 = pnand %p1336_p0, %p1819_p8 }
  0x49   : > { %p1345_p5 = por %p1344_p9, %p1343_p7 }
  0x4a   : > { %p1339_p4 = pneg %p1338_p2 }
  0x4c   : > { %p1346_p10 = pnand %p1345_p5, %p1339_p4 }
  0x4e   : > { %1349 = shalt.err (!%p1346_p10)
}
  0x4f   : > { %1170 = dma.hbm_to_vmem [thread:$0]  (!%p1803_p6), %s2245_s3, 16, %s1807_s25, [#allocation9]  }
  0x50   : > { %s2246_s5 = sld [smem:[#allocation35_spill]] }
  0x56   : > { %s1350_s12 = scalar_lea.hbm %s2246_s5, 16 }
  0x57   : > { %p1351_p11 = scmp.ne.s32.totalorder %s2246_s5, %s1350_s12  ;;  %p1357_p0 = scmp.lt.u32.totalorder %s1350_s12, %s2246_s5 }
  0x59   : > { %p1353_p12 = pnand %p1351_p11, %p1819_p8 }
  0x5b   : > { %p1354_p13 = pneg %p1353_p12 }
  0x5d   : > { %p1359_p2 = pnand %p1357_p0, %p1354_p13 }
  0x5f   : > { %1362 = shalt.err (!%p1359_p2)
}
  0x60   : > { %s1363_s10 = scalar_lea.vmem %s351_s27, 16  ;;  %s1370_s25 = scalar_lea.vmem %s351_s27, 32 }
  0x61   : > { %p1364_p4 = scmp.ne.s32.totalorder %s351_s27, %s1363_s10  ;;  %p1371_p5 = scmp.lt.s32.totalorder %s351_s27, %s351_s27 }
  0x62   : > { %p1372_p10 = scmp.lt.s32.totalorder %s1370_s25, %s1363_s10 }
  0x63   : > { %p1366_p7 = pnand %p1364_p4, %p1819_p8 }
  0x64   : > { %p1373_p1 = por %p1372_p10, %p1371_p5 }
  0x65   : > { %p1367_p9 = pneg %p1366_p7 }
  0x67   : > { %p1374_p3 = pnand %p1373_p1, %p1367_p9 }
  0x69   : > { %1377 = shalt.err (!%p1374_p3)
}
  0x6a   : > { %1176 = dma.hbm_to_vmem [thread:$0]  (!%p1803_p6), %s2246_s5, 16, %s351_s27, [#allocation12]  }
  0x6b   : > { %s1691_s20 = smov [#allocation14]   ;;  %s1692_s12 = smov [#allocation10]  }
  0x6c   : > { %s374_s11 = sshll.u32 %s1691_s20, 4  ;;  %s339_s24 = sshll.u32 %s1692_s12, 4  ;;  %s375_s11 = int_to_ptr.vmem [resolvable:$true] %s374_s11  ;;  %s340_s24 = int_to_ptr.vmem [resolvable:$true] %s339_s24 }
  0x6d   : > { %s1378_s22 = scalar_lea.hbm %s2219_s7, 16 }
  0x6e   : > { %p1379_p1 = scmp.ne.s32.totalorder %s2219_s7, %s1378_s22  ;;  %p1385_p12 = scmp.lt.u32.totalorder %s1378_s22, %s2219_s7 }
  0x70   : > { %p1381_p3 = pnand %p1379_p1, %p1819_p8 }
  0x72   : > { %p1382_p11 = pneg %p1381_p3 }
  0x74   : > { %p1387_p13 = pnand %p1385_p12, %p1382_p11 }
  0x76   : > { %1390 = shalt.err (!%p1387_p13)
}
  0x77   : > { %s1391_s27 = scalar_lea.vmem %s375_s11, 16  ;;  %s1398_s16 = scalar_lea.vmem %s375_s11, 32 }
  0x78   : > { %p1392_p0 = scmp.ne.s32.totalorder %s375_s11, %s1391_s27  ;;  %p1399_p7 = scmp.lt.s32.totalorder %s375_s11, %s375_s11 }
  0x79   : > { %p1400_p9 = scmp.lt.s32.totalorder %s1398_s16, %s1391_s27 }
  0x7a   : > { %p1394_p2 = pnand %p1392_p0, %p1819_p8 }
  0x7b   : > { %p1401_p5 = por %p1400_p9, %p1399_p7 }
  0x7c   : > { %p1395_p4 = pneg %p1394_p2 }
  0x7e   : > { %p1402_p10 = pnand %p1401_p5, %p1395_p4 }
  0x80   : > { %1405 = shalt.err (!%p1402_p10)
}
  0x81   : > { %1182 = dma.hbm_to_vmem [thread:$0]  (!%p1803_p6), %s2219_s7, 16, %s375_s11, [#allocation15]  }
  0x82   : > { %s2247_s4 = sld [smem:[#allocation34_spill]] }
  0x88   : > { %s1406_s28 = scalar_lea.hbm %s2247_s4, 16 }
  0x89   : > { %p1407_p1 = scmp.ne.s32.totalorder %s2247_s4, %s1406_s28  ;;  %p1413_p12 = scmp.lt.u32.totalorder %s1406_s28, %s2247_s4 }
  0x8b   : > { %p1409_p3 = pnand %p1407_p1, %p1819_p8 }
  0x8d   : > { %p1410_p11 = pneg %p1409_p3 }
  0x8f   : > { %p1415_p13 = pnand %p1413_p12, %p1410_p11 }
  0x91   : > { %1418 = shalt.err (!%p1415_p13)
}
  0x92   : > { %s1419_s27 = scalar_lea.vmem %s340_s24, 16  ;;  %s1426_s11 = scalar_lea.vmem %s340_s24, 32 }
  0x93   : > { %p1420_p0 = scmp.ne.s32.totalorder %s340_s24, %s1419_s27  ;;  %p1427_p7 = scmp.lt.s32.totalorder %s340_s24, %s340_s24 }
  0x94   : > { %p1428_p9 = scmp.lt.s32.totalorder %s1426_s11, %s1419_s27 }
  0x95   : > { %p1422_p2 = pnand %p1420_p0, %p1819_p8 }
  0x96   : > { %p1429_p5 = por %p1428_p9, %p1427_p7 }
  0x97   : > { %p1423_p4 = pneg %p1422_p2 }
  0x99   : > { %p1430_p10 = pnand %p1429_p5, %p1423_p4 }
  0x9b   : > { %1433 = shalt.err (!%p1430_p10)
}
  0x9c   : > { %1173 = dma.hbm_to_vmem [thread:$0]  (!%p1803_p6), %s2247_s4, 16, %s340_s24, [#allocation9]  }
  0x9d   : > { %s1693_s12 = smov [#allocation13]   ;;  %s1694_s26 = smov [#allocation16]  }
  0x9e   : > { %s360_s29 = sshll.u32 %s1693_s12, 4  ;;  %s384_s28 = sshll.u32 %s1694_s26, 4  ;;  %s361_s29 = int_to_ptr.vmem [resolvable:$true] %s360_s29  ;;  %s385_s28 = int_to_ptr.vmem [resolvable:$true] %s384_s28 }
  0x9f   : > { %s1434_s25 = scalar_lea.hbm %s2218_s6, 256 }
  0xa0   : > { %p1435_p1 = scmp.ne.s32.totalorder %s2218_s6, %s1434_s25  ;;  %p1441_p12 = scmp.lt.u32.totalorder %s1434_s25, %s2218_s6 }
  0xa2   : > { %p1437_p3 = pnand %p1435_p1, %p1819_p8 }
  0xa4   : > { %p1438_p11 = pneg %p1437_p3 }
  0xa6   : > { %p1443_p13 = pnand %p1441_p12, %p1438_p11 }
  0xa8   : > { %1446 = shalt.err (!%p1443_p13)
}
  0xa9   : > { %s1447_s24 = scalar_lea.vmem %s361_s29, 256  ;;  %p1455_p7 = scmp.lt.s32.totalorder %s361_s29, %s361_s29 }
  0xaa   : > { %p1448_p0 = scmp.ne.s32.totalorder %s361_s29, %s1447_s24  ;;  %p1456_p9 = scmp.lt.s32.totalorder %s1447_s24, %s1447_s24 }
  0xac   : > { %p1450_p2 = pnand %p1448_p0, %p1819_p8  ;;  %p1457_p5 = por %p1456_p9, %p1455_p7 }
  0xae   : > { %p1451_p4 = pneg %p1450_p2 }
  0xb0   : > { %p1458_p10 = pnand %p1457_p5, %p1451_p4 }
  0xb2   : > { %1461 = shalt.err (!%p1458_p10)
}
  0xb3   : > { %s2248_s20 = smov 64   ;;  %s1462_s25 = scalar_lea.hbm %s2220_s8, 1024 }
  0xb4   : > { %1179 = dma.hbm_to_vmem [thread:$0]  (!%p1803_p6), %s2218_s6, 256, %s361_s29, [#allocation12], %s2248_s20, %s2248_s20, %s1690_s30  }
  0xb5   : > { %p1463_p1 = scmp.ne.s32.totalorder %s2220_s8, %s1462_s25  ;;  %p1469_p12 = scmp.lt.u32.totalorder %s1462_s25, %s2220_s8 }
  0xb7   : > { %p1465_p3 = pnand %p1463_p1, %p1819_p8 }
  0xb9   : > { %p1466_p11 = pneg %p1465_p3 }
  0xbb   : > { %p1471_p13 = pnand %p1469_p12, %p1466_p11 }
  0xbd   : > { %1474 = shalt.err (!%p1471_p13)
}
  0xbe   : > { %s1475_s24 = scalar_lea.vmem %s385_s28, 1024  ;;  %p1483_p7 = scmp.lt.s32.totalorder %s385_s28, %s385_s28 }
  0xbf   : > { %p1476_p0 = scmp.ne.s32.totalorder %s385_s28, %s1475_s24  ;;  %p1484_p9 = scmp.lt.s32.totalorder %s1475_s24, %s1475_s24 }
  0xc1   : > { %p1478_p2 = pnand %p1476_p0, %p1819_p8  ;;  %p1485_p5 = por %p1484_p9, %p1483_p7 }
  0xc3   : > { %p1479_p4 = pneg %p1478_p2 }
  0xc5   : > { %p1486_p10 = pnand %p1485_p5, %p1479_p4 }
  0xc7   : > { %1489 = shalt.err (!%p1486_p10)
}
  0xc8   : > { %1185 = dma.hbm_to_vmem [thread:$0]  (!%p1803_p6), %s2220_s8, 1024, %s385_s28, [#allocation15], %s2248_s20, %s2248_s20, %s1690_s30  }
  0xc9   : > { %s1695_s26 = smov [#allocation17]   ;;  %s1490_s1 = scalar_lea.hbm %s2221_s9, 16 }
  0xca   : > { %s398_s22 = sshll.u32 %s1695_s26, 4  ;;  %p1491_p1 = scmp.ne.s32.totalorder %s2221_s9, %s1490_s1  ;;  %s399_s22 = int_to_ptr.vmem [resolvable:$true] %s398_s22 }
  0xcb   : > { %p1497_p12 = scmp.lt.u32.totalorder %s1490_s1, %s2221_s9 }
  0xcc   : > { %p1493_p3 = pnand %p1491_p1, %p1819_p8 }
  0xce   : > { %p1494_p11 = pneg %p1493_p3 }
  0xd0   : > { %p1499_p13 = pnand %p1497_p12, %p1494_p11 }
  0xd2   : > { %1502 = shalt.err (!%p1499_p13)
}
  0xd3   : > { %s1503_s30 = scalar_lea.vmem %s399_s22, 16  ;;  %s1510_s28 = scalar_lea.vmem %s399_s22, 32 }
  0xd4   : > { %p1504_p0 = scmp.ne.s32.totalorder %s399_s22, %s1503_s30  ;;  %p1511_p7 = scmp.lt.s32.totalorder %s399_s22, %s399_s22 }
  0xd5   : > { %p1512_p9 = scmp.lt.s32.totalorder %s1510_s28, %s1503_s30 }
  0xd6   : > { %p1506_p2 = pnand %p1504_p0, %p1819_p8 }
  0xd7   : > { %p1513_p5 = por %p1512_p9, %p1511_p7 }
  0xd8   : > { %p1507_p4 = pneg %p1506_p2 }
  0xda   : > { %p1514_p10 = pnand %p1513_p5, %p1507_p4 }
  0xdc   : > { %1517 = shalt.err (!%p1514_p10)
}
  0xdd   : > { %1188 = dma.hbm_to_vmem [thread:$0]  (!%p1803_p6), %s2221_s9, 16, %s399_s22, [#allocation18]  }
  0xde   : > { %s1025_s21 = sadd.s32 4294967294, %s1684_s18   ;;  %s45_s12 = sadd.s32 1, %s1680_s17 }
  0xdf   : > { %p47_p8 = scmp.ge.s32.totalorder %s45_s12, 2  ;;  %s54_s23 = sadd.s32 1, %s1672_s15 }
  0xe0   : > { %p61_p1 = scmp.ne.s32.totalorder %s1672_s15, %s1668_s14  ;;  %p62_p3 = scmp.eq.s32.totalorder %s1684_s18, 0 }
  0xe1   : > { %s2283_s12 = smov (%p47_p8, %s45_s12), 0  ;;  %p67_p12 = scmp.ne.s32.totalorder %s1668_s14, %s1664_s13 }
  0xe2   : > { %p1990_p11 = por %p62_p3, %p61_p1  ;;  %s49_s22 = ssub.s32 %s1680_s17, %s2283_s12 }
  0xe3   : > { %p289_p6 = scmp.eq.s32.totalorder %s1787_s19, 1  ;;  %p52_p13 = scmp.eq.s32.totalorder %s49_s22, 0 }
  0xe4   : > { %p2250_p0 = scmp.eq.s32.totalorder %s1787_s19, 0  ;;  %p295_p7 = scmp.eq.s32.totalorder %s1025_s21, 1 }
  0xe5   : > { %p2005_p4 = por %p289_p6, %p61_p1  ;;  %p1208_p5 = scmp.lt.s32.totalorder %s1684_s18, 2 }
  0xe6   : > { %p2001_p2 = por %p2250_p0, %p67_p12  ;;  %p2012_p9 = por %p295_p7, %p67_p12 }
  0xe7   : > { %s2252_s25 = scalar_select %p2005_p4, 1, 0 }
  0xe8   : > { %s2251_s10 = scalar_select %p2001_p2, 1, 0 }
  0xe9   : > { %s2010_s1 = scalar_select %p52_p13, %s1672_s15, %s54_s23  }
  0xea   : > { %s2253_s27 = scalar_select %p2012_p9, 1, 0 }
  0xeb   : > { %s2018_s11 = sand.u32 1, %s1672_s15   ;;  %s1037_s16 = sshll.u32 %s1680_s17, 6 }
  0xec   : > { %s1036_s24 = sshll.u32 %s2018_s11, 2  ;;  %s2254_s0 = sld [smem:[#allocation30_spill]] }
  0xed   : > { %s413_s29 = scalar_lea.vmem [#allocation2], %s1036_s24  ;;  %p2029_p10 = pnand %p1208_p5, %p1990_p11 }
  0xee   : > { %s421_s21 = sshll.u32 %s413_s29, 4  ;;  %s410_s2 = scalar_lea.sflag [#allocation3], %s2018_s11  ;;  %s2033_s21 = int_to_ptr.vmem [resolvable:$true] %s421_s21 }
  0xef   : > { %p1520_p1 = pneg %p2029_p10 }
  0xf2   : > { %s2025_s20 = scalar_lea.hbm %s2254_s0, %s1037_s16  ;;  %s1523_s24 = scalar_lea.hbm %s2254_s0, 128 }
  0xf3   : > { %s1518_s30 = scalar_lea.hbm %s2025_s20, 64  ;;  %p1524_p11 = scmp.lt.u32.totalorder %s2025_s20, %s2254_s0 }
  0xf4   : > { %p1519_p8 = scmp.ne.s32.totalorder %s2025_s20, %s1518_s30  ;;  %p1525_p6 = scmp.lt.u32.totalorder %s1523_s24, %s1518_s30 }
  0xf5   : > { %p1527_p0 = scmp.lt.u32.totalorder %s1518_s30, %s2025_s20 }
  0xf6   : > { %p1521_p3 = pnand %p1520_p1, %p1519_p8  ;;  %p1526_p13 = por %p1525_p6, %p1524_p11 }
  0xf8   : > { %p1522_p12 = pneg %p1521_p3  ;;  %p1528_p7 = por %p1527_p0, %p1526_p13 }
  0xfa   : > { %p1529_p5 = pnand %p1528_p7, %p1522_p12 }
  0xfc   : > { %1532 = shalt.err (!%p1529_p5)
}
  0xfd   : > { %s1533_s22 = scalar_lea.vmem %s2033_s21, 64  ;;  %s1696_s16 = smov [#allocation2]  }
  0xfe   : > { %p1534_p8 = scmp.ne.s32.totalorder %s2033_s21, %s1533_s22  ;;  %s1538_s26 = sshll.u32 %s1696_s16, 4  ;;  %s1539_s26 = int_to_ptr.vmem [resolvable:$false] %s1538_s26 }
  0xff   : > { %s1540_s28 = scalar_lea.vmem %s1539_s26, 128  ;;  %p1541_p4 = scmp.lt.s32.totalorder %s2033_s21, %s1539_s26 }
 0x100   : > { %p1536_p3 = pnand %p1534_p8, %p1520_p1  ;;  %p1542_p11 = scmp.lt.s32.totalorder %s1540_s28, %s1533_s22 }
 0x102   : > { %p1537_p9 = pneg %p1536_p3  ;;  %p1543_p6 = por %p1542_p11, %p1541_p4 }
 0x104   : > { %p1544_p13 = pnand %p1543_p6, %p1537_p9 }
 0x106   : > { %1547 = shalt.err (!%p1544_p13)
}
 0x107   : > { %1192 = dma.hbm_to_vmem [thread:$0]  (!%p2029_p10), %s2025_s20, 64, %s2033_s21, %s410_s2  }
 0x108   : > { %s1038_s30 = sshll.u32 %s2018_s11, 3  ;;  %s1039_s24 = sshll.u32 %s1680_s17, 7 }
 0x109   : > { %s2256_s0 = sld [smem:[#allocation31_spill]]  ;;  %s432_s22 = scalar_lea.vmem [#allocation5], %s1038_s30 }
 0x10a   : > { %s440_s26 = sshll.u32 %s432_s22, 4  ;;  %s2257_s28 = sand.u32 1, %s1684_s18   ;;  %s441_s26 = int_to_ptr.vmem [resolvable:$true] %s440_s26 }
 0x10b   : > { %s429_s4 = scalar_lea.sflag [#allocation6], %s2257_s28 }
 0x10f   : > { %s2067_s3 = scalar_lea.hbm %s2256_s0, %s1039_s24  ;;  %s1553_s20 = scalar_lea.hbm %s2256_s0, 256 }
 0x110   : > { %s1548_s5 = scalar_lea.hbm %s2067_s3, 128  ;;  %p1554_p0 = scmp.lt.u32.totalorder %s2067_s3, %s2256_s0 }
 0x111   : > { %p1549_p4 = scmp.ne.s32.totalorder %s2067_s3, %s1548_s5  ;;  %p1555_p7 = scmp.lt.u32.totalorder %s1553_s20, %s1548_s5 }
 0x112   : > { %p1557_p8 = scmp.lt.u32.totalorder %s1548_s5, %s2067_s3 }
 0x113   : > { %p1551_p9 = pnand %p1549_p4, %p1520_p1  ;;  %p1556_p5 = por %p1555_p7, %p1554_p0 }
 0x115   : > { %p1552_p12 = pneg %p1551_p9  ;;  %p1558_p3 = por %p1557_p8, %p1556_p5 }
 0x117   : > { %p1559_p11 = pnand %p1558_p3, %p1552_p12 }
 0x119   : > { %1562 = shalt.err (!%p1559_p11)
}
 0x11a   : > { %s1563_s30 = scalar_lea.vmem %s441_s26, 128  ;;  %s1697_s29 = smov [#allocation5]  }
 0x11b   : > { %p1564_p6 = scmp.ne.s32.totalorder %s441_s26, %s1563_s30  ;;  %s1568_s16 = sshll.u32 %s1697_s29, 4  ;;  %s1569_s16 = int_to_ptr.vmem [resolvable:$false] %s1568_s16 }
 0x11c   : > { %s1570_s22 = scalar_lea.vmem %s1569_s16, 256  ;;  %p1571_p9 = scmp.lt.s32.totalorder %s441_s26, %s1569_s16 }
 0x11d   : > { %p1566_p13 = pnand %p1564_p6, %p1520_p1  ;;  %p1572_p2 = scmp.lt.s32.totalorder %s1570_s22, %s1563_s30 }
 0x11f   : > { %p1567_p4 = pneg %p1566_p13  ;;  %p1573_p0 = por %p1572_p2, %p1571_p9 }
 0x121   : > { %p1574_p7 = pnand %p1573_p0, %p1567_p4 }
 0x123   : > { %1577 = shalt.err (!%p1574_p7)
}
 0x124   : > { %1195 = dma.hbm_to_vmem [thread:$0]  (!%p2029_p10), %s2067_s3, 128, %s441_s26, %s429_s4  }
 0x125   : > { %s2258_s5 = sld [smem:[#allocation29_spill]] }
 0x12b   : > { %p2259_p12 = scmp.ne.s32.totalorder %s2258_s5, 0 }
 0x12c   : > { %s2093_s28 = sand.u32 (!%p2259_p12), 1, %s1668_s14   ;;  %p2260_p1 = scmp.ne.s32.totalorder (!%p2259_p12), %s2251_s10, 0 }
 0x12d   : > { %449 = sbr.rel (%p2259_p12) target bundleno = 1339 (0x53b), region = 60  ;;  %s1041_s2 = sshll.u32 (!%p2259_p12), %s2093_s28, 2 }
 0x12e   : > { %s452_s11 = scalar_lea.sflag (!%p2259_p12), [#allocation3], %s2093_s28  ;;  %s455_s20 = scalar_lea.vmem (!%p2259_p12), [#allocation2], %s1041_s2 }
 0x134   : > { %1631 = dma.done.wait (%p2260_p1), %s452_s11, 64  }
 0x135   : > { %1633 = vsyncadd (%p2260_p1), %s452_s11, 4294967232  ;;  %s460_s3 = sand.u32 1, %s1787_s19   ;;  %s1042_s4 = sshll.u32 %s2093_s28, 3 }
 0x136   : > { %s461_s23 = scalar_lea.sflag [#allocation6], %s460_s3  ;;  %s2105_s26 = scalar_lea.vmem [#allocation5], %s1042_s4 }
 0x137   : > { %1635 = dma.done.wait (%p2260_p1), %s461_s23, 128  }
 0x138   : > { %1637 = vsyncadd (%p2260_p1), %s461_s23, 4294967168  ;;  %p2261_p2 = scmp.eq.s32.totalorder %s1787_s19, 0 }
 0x13a   : > { %1639 = dma.done.wait (%p2261_p2), [#allocation6], 256   ;;  %p2262_p10 = pmov %p2261_p2 }
 0x13b   : > { %p2263_p5 = pmov %p2261_p2 }
 0x13c   : > { %1641 = vsyncadd (%p2262_p10), [#allocation6], 4294967040 }
 0x13d   : > { %1643 = dma.done.wait (%p2263_p5), [#allocation9], 32   ;;  %p2264_p8 = pmov %p2261_p2 }
 0x13e   : > { %p2265_p3 = pmov %p2261_p2 }
 0x13f   : > { %1645 = vsyncadd (%p2264_p8), [#allocation9], 4294967264 }
 0x140   : > { %1647 = dma.done.wait (%p2265_p3), [#allocation12], 272   ;;  %p2266_p11 = pmov %p2261_p2 }
 0x141   : > { %p2267_p6 = pmov %p2261_p2 }
 0x142   : > { %1649 = vsyncadd (%p2266_p11), [#allocation12], 4294967024 }
 0x143   : > { %1651 = dma.done.wait (%p2267_p6), [#allocation15], 1040   ;;  %p2268_p13 = pmov %p2261_p2 }
 0x144   : > { %p2269_p4 = pmov %p2261_p2 }
 0x145   : > { %1653 = vsyncadd (%p2268_p13), [#allocation15], 4294966256 }
 0x146   : > { %1655 = dma.done.wait (%p2269_p4), [#allocation18], 16   ;;  %p2270_p9 = pmov %p2261_p2 }
 0x147   : > { %v1698_v0 = vmov 0.0   ;;  %vm1699_vm0 = vmmov 0   ;;  %v1278_v1 = vld [vmem:[#allocation7] sm:$0xff]   ;;  %v1279_v2 = vld [vmem:[#allocation7 + $0x8] sm:$0xff]   ;;  %vm563_vm1 = vcmask 261120   ;;  %v607_v6 = vld [vmem:[%s2105_s26] sm:$0xff] }
 0x148   : > { %1657 = vsyncadd (%p2270_p9), [#allocation18], 4294967280  ;;  %1090 = vmatprep.subr.bf16.mxu1 %v1698_v0  ;;  %1094 = vmatprep.mubr.msk.bf16.mxu1 %vm1699_vm0, %v1698_v0  ;;  %v539_v3 = vld [vmem:[%s455_s20] sm:$0xf]  ;;  %v1052_v4 = vld [vmem:[#allocation8] ss:$0 sm:$0xff] }
 0x149   : > { %1106 = vmatprep.subr.bf16.mxu0 %v1698_v0  ;;  %1122 = vmatprep.mubr.msk.bf16.mxu0 %vm1699_vm0, %v1698_v0  ;;  %v1280_v18 = vld [vmem:[#allocation13] sm:$0xff]   ;;  %v1281_v19 = vld [vmem:[#allocation13 + $0x8] sm:$0xff]   ;;  %v1282_v20 = vld [vmem:[#allocation16] sm:$0xff]   ;;  %s2271_s19 = sld [smem:[#allocation28_spill]]  ;;  %s537_s21 = scalar_lea.vmem [#allocation19], %s1042_s4 }
 0x14a   : > { %1091 = vmatpush3.bf16.msra.mxu1 %v1278_v1  ;;  %1107 = vmatpush3.bf16.msra.mxu0 %v1282_v20  ;;  %v1056_v25 = vld [vmem:[#allocation10] ss:$0 sm:$0xff]  ;;  %v1057_v27 = vld [vmem:[#allocation11] ss:$0 sm:$0xff]  ;;  %v1284_v32 = vld [vmem:[#allocation16 + $0x10] sm:$0xff]   ;;  %s844_s24 = sshll.u32 %s537_s21, 4  ;;  %s2164_s24 = int_to_ptr.vmem [resolvable:$true] %s844_s24 }
 0x14b   : > { %1092 = vmatprep.subr.bf16.mxu1 %v1698_v0  ;;  %1108 = vmatprep.subr.bf16.mxu0 %v1698_v0  ;;  %v1283_v31 = vld [vmem:[#allocation16 + $0x8] sm:$0xff]   ;;  %v1285_v33 = vld [vmem:[#allocation16 + $0x18] sm:$0xff]   ;;  %v1286_v34 = vld [vmem:[#allocation16 + $0x20] sm:$0xff]   ;;  %s2272_s16 = sld [smem:[#allocation36_spill]]  ;;  %s830_s2 = scalar_lea.sflag [#allocation4], %s2093_s28 }
 0x14c   : > { %v1287_v35 = vld [vmem:[#allocation16 + $0x28] sm:$0xff]   ;;  %v1288_v36 = vld [vmem:[#allocation16 + $0x30] sm:$0xff]   ;;  %v1289_v37 = vld [vmem:[#allocation16 + $0x38] sm:$0xff]   ;;  %s1578_s11 = scalar_lea.vmem %s2164_s24, 128  ;;  %p2274_p7 = scmp.ne.s32.totalorder %s2252_s25, 0 }
 0x14d   : > { %v1058_v38 = vld [vmem:[#allocation14] ss:$0 sm:$0xff]  ;;  %v1062_v54 = vld [vmem:[#allocation17] ss:$0 sm:$0xff]  ;;  %p1579_p0 = scmp.ne.s32.totalorder %s2164_s24, %s1578_s11  ;;  %s1700_s20 = smov [#allocation19]  }
 0x14e   : > { %1093 = vmatpush3.bf16.msra.mxu1 %v1279_v2  ;;  %1109 = vmatpush3.bf16.msra.mxu0 %v1283_v31  ;;  %s1582_s3 = sshll.u32 %s1700_s20, 4  ;;  %s1583_s3 = int_to_ptr.vmem [resolvable:$false] %s1582_s3 }
 0x14f   : > { %1098 = vmatprep.subr.bf16.mxu1 %v1698_v0  ;;  %1110 = vmatprep.subr.bf16.mxu0 %v1698_v0  ;;  %s1072_s10 = sshll.u32 %s2271_s19, 7  ;;  %p1580_p12 = pnand %p1579_p0, %p2274_p7 }
 0x150   : > { %s1584_s4 = scalar_lea.vmem %s1583_s3, 256  ;;  %p1585_p2 = scmp.lt.s32.totalorder %s2164_s24, %s1583_s3 }
 0x151   : > { %1095 = vmatmul.mubr.msk.bf16.vlgmr.msra.gmra.mrb[0].mxu1 %vm563_vm1, %v539_v3  ;;  %s2273_s22 = smov %s2272_s16  ;;  %s2162_s5 = scalar_lea.hbm %s2272_s16, %s1072_s10 }
 0x152   : > { %1102 = vmatprep.mubr.msk.bf16.mxu1 %vm1699_vm0, %v1698_v0  ;;  %1099 = vmatpush3.bf16.msra.mxu1 %v1280_v18  ;;  %p1581_p1 = pneg %p1580_p12  ;;  %p1586_p10 = scmp.lt.s32.totalorder %s1584_s4, %s1578_s11 }
 0x153   : > { %1100 = vmatprep.subr.bf16.mxu1 %v1698_v0  ;;  %1111 = vmatpush3.bf16.msra.mxu0 %v1284_v32 }
 0x154   : > { %1112 = vmatprep.subr.bf16.mxu0 %v1698_v0  ;;  %p1587_p5 = por %p1586_p10, %p1585_p2 }
 0x156   : > { %1101 = vmatpush3.bf16.msra.mxu1 %v1281_v19  ;;  %p1588_p8 = pnand %p1587_p5, %p1581_p1 }
 0x157   : > { %1113 = vmatpush3.bf16.msra.mxu0 %v1285_v33 }
 0x158   : > { %1114 = vmatprep.subr.bf16.mxu0 %v1698_v0 }
 0x15b   : > { %1115 = vmatpush3.bf16.msra.mxu0 %v1286_v34 }
 0x15c   : > { %1116 = vmatprep.subr.bf16.mxu0 %v1698_v0 }
 0x15f   : > { %1117 = vmatpush3.bf16.msra.mxu0 %v1287_v35 }
 0x160   : > { %1118 = vmatprep.subr.bf16.mxu0 %v1698_v0 }
 0x163   : > { %1119 = vmatpush3.bf16.msra.mxu0 %v1288_v36 }
 0x164   : > { %1120 = vmatprep.subr.bf16.mxu0 %v1698_v0 }
 0x167   : > { %1121 = vmatpush3.bf16.msra.mxu0 %v1289_v37 }
 0x224   : > { %v601_v5 = vpop.f32.mrb[0].mxu1 }
 0x225   : > { %v602_v7 = vadd.f32 %v1052_v4, %v601_v5  ;;  %v1096_v8 = vpop.f32.mrb[1].mxu1 }
 0x226   : > { %v604_v9 = vpop.f32.mrb[2].mxu1 }
 0x227   : > { %v2140_v10 = vadd.f32 %v607_v6, %v602_v7  ;;  %v1097_v11 = vpop.f32.mrb[3].mxu1 }
 0x229   : > { %v611_v12 = vsel %vm563_vm1, %v2140_v10, 0.0 }
 0x22a   : > { %612 = vadd.xlane.f32.xlu0 %v611_v12 }
 0x2b7   : > { %v613_v13 = vpop.xlane.xlu0 %612 }
 0x2b8   : > { %v615_v14 = vmul.f32 0.03125, %v613_v13 }
 0x2ba   : > { %v616_v15 = vsub.f32 %v2140_v10, %v615_v14 }
 0x2bc   : > { %v617_v16 = vmul.f32 %v616_v15, %v616_v15 }
 0x2be   : > { %v618_v17 = vsel %vm563_vm1, %v617_v16, 0.0 }
 0x2bf   : > { %619 = vadd.xlane.f32.xlu0 %v618_v17 }
 0x34c   : > { %v620_v21 = vpop.xlane.xlu0 %619 }
 0x34d   : > { %v621_v22 = vmul.f32 0.03125, %v620_v21 }
 0x34f   : > { %v622_v23 = vadd.f32 1e-05, %v621_v22 }
 0x351   : > { %1290 = vrsqrt.f32 %v622_v23 }
 0x35b   : > { %v1291_v24 = vpop.eup %1290 }
 0x35c   : > { %v624_v26 = vmul.f32 %v1291_v24, %v616_v15 }
 0x35e   : > { %v631_v28 = vmul.f32 %v1056_v25, %v624_v26 }
 0x360   : > { %v638_v29 = vadd.f32 %v1057_v27, %v631_v28 }
 0x362   : > { %v639_v30 = vpack.c.bf16 %v638_v29, %v638_v29 }
 0x364   : > { %1103 = vmatmul.mubr.msk.bf16.vlgmr.msra.gmra.mrb[4].mxu1 %vm563_vm1, %v639_v30 }
 0x437   : > { %v700_v39 = vpop.f32.mrb[4].mxu1 }
 0x438   : > { %v701_v40 = vadd.f32 %v1058_v38, %v700_v39  ;;  %v1104_v41 = vpop.f32.mrb[5].mxu1 }
 0x439   : > { %v703_v42 = vpop.f32.mrb[6].mxu1 }
 0x43a   : > { %v707_v43 = vmul.f32 0.044715, %v701_v40  ;;  %v1105_v44 = vpop.f32.mrb[7].mxu1  ;;  %v706_v50 = vmul.f32 0.5, %v701_v40 }
 0x43c   : > { %v708_v45 = vmul.f32 %v707_v43, %v701_v40 }
 0x43e   : > { %v709_v46 = vmul.f32 %v708_v45, %v701_v40 }
 0x440   : > { %v710_v47 = vadd.f32 %v709_v46, %v701_v40 }
 0x442   : > { %v711_v48 = vmul.f32 0.7978846, %v710_v47 }
 0x444   : > { %1292 = vtanh.f32 %v711_v48 }
 0x44e   : > { %v1293_v49 = vpop.eup %1292 }
 0x44f   : > { %v713_v51 = vadd.f32 1.0, %v1293_v49 }
 0x451   : > { %v714_v52 = vmul.f32 %v713_v51, %v706_v50 }
 0x453   : > { %v715_v53 = vpack.c.bf16 %v714_v52, %v714_v52 }
 0x455   : > { %1123 = vmatmul.mubr.bf16.vlgmr.msra.gmra.mrb[0].mxu0 %v715_v53 }
 0x528   : > { %v821_v55 = vpop.f32.mrb[0].mxu0 }
 0x529   : > { %v822_v56 = vadd.f32 %v1062_v54, %v821_v55  ;;  %v1124_v57 = vpop.f32.mrb[1].mxu0 }
 0x52a   : > { %v824_v58 = vpop.f32.mrb[2].mxu0 }
 0x52b   : > { %v827_v59 = vadd.f32 %v822_v56, %v2140_v10  ;;  %v1125_v60 = vpop.f32.mrb[3].mxu0 }
 0x52d   : > { %828 = vst.msk [vmem:[%s537_s21] sm:$0xff] %vm563_vm1, %v827_v59 }
 0x52e   : > { %1591 = shalt.err (!%p1588_p8)
}
 0x52f   : > { %s1592_s28 = scalar_lea.hbm %s2162_s5, 128  ;;  %s1596_s19 = scalar_lea.hbm %s2273_s22, 256 }
 0x530   : > { %p1593_p3 = scmp.ne.s32.totalorder %s2162_s5, %s1592_s28  ;;  %p1597_p13 = scmp.lt.u32.totalorder %s2162_s5, %s2273_s22 }
 0x531   : > { %p1598_p4 = scmp.lt.u32.totalorder %s1596_s19, %s1592_s28  ;;  %p1600_p0 = scmp.lt.u32.totalorder %s1592_s28, %s2162_s5 }
 0x532   : > { %p1594_p11 = pnand %p1593_p3, %p2274_p7 }
 0x533   : > { %p1599_p9 = por %p1598_p4, %p1597_p13 }
 0x534   : > { %p1595_p6 = pneg %p1594_p11 }
 0x535   : > { %p1601_p12 = por %p1600_p0, %p1599_p9 }
 0x537   : > { %p1602_p1 = pnand %p1601_p12, %p1595_p6 }
 0x539   : > { %1605 = shalt.err (!%p1602_p1)
}
 0x53a   : > { %1162 = dma.vmem_to_hbm [thread:$0]  (%p2274_p7), %s2164_s24, 128, %s2162_s5, %s830_s2  }
 0x53b PF: > { %s856_s30 = sand.u32 1, %s1664_s13   ;;  %p2275_p2 = scmp.ne.s32.totalorder %s2253_s27, 0 }
 0x53c   : > { %p2276_p10 = scmp.ge.s32.totalorder %s1684_s18, 2  ;;  %s857_s29 = scalar_lea.sflag [#allocation4], %s856_s30 }
 0x53e   : > { %p1197_p5 = pnand %p2276_p10, %p2275_p2 }
 0x540   : > { %1659 = dma.done.wait (!%p1197_p5), %s857_s29, 128  }
 0x541   : > { %1661 = vsyncadd (!%p1197_p5), %s857_s29, 4294967168  ;;  %s33_s18 = sadd.s32 1, %s1684_s18   ;;  %s2277_s13 = smov %s1668_s14 }
 0x542   : > { %p30_p8 = scmp.ge.s32.totalorder %s33_s18, 4   ;;  %s2278_s14 = smov %s1672_s15 }
 0x543   : > { %s2279_s15 = smov %s2010_s1  ;;  %s2280_s16 = smov %s1680_s17 }
 0x544   : > { %s2281_s17 = smov %s2283_s12  ;;  %32 = sbr.rel (!%p30_p8) target bundleno = 20 (0x14), region = 150 }
 0x54b   :  { %862 = vsyncpa [#allocation3], 1 }
 0x54c   :  { %864 = vsyncpa [#allocation3 + $0x1], 1 }
 0x54d   :  { %865 = vsyncpa [#allocation6], 1 }
 0x54e   :  { %867 = vsyncpa [#allocation6 + $0x1], 1 }
 0x54f   :  { %868 = vsyncpa [#allocation9], 1 }
 0x550   :  { %869 = vsyncpa [#allocation12], 1 }
 0x551   :  { %870 = vsyncpa [#allocation15], 1 }
 0x552   :  { %871 = vsyncpa [#allocation18], 1 }
 0x553   :  { %872 = vsyncpa [#allocation4], 1 }
 0x554   :  { %874 = vsyncpa [#allocation4 + $0x1], 1 }

// kernel: gpt_forward.8
= control target key start
LH: loop header
LB: loop body
LE: loop exit
PB: predicated region body
PF: predicated region fallthrough
CT: control target
= control target key end

     0   :  { %s1904_s0 = inlined_call_operand.hbm [shape: bf16[2,4,8,8], index: 0, kind: input, shape index: {}]   ;;  %s1905_s1 = inlined_call_operand.hbm [shape: bf16[2,4,8,8], index: 1, kind: input, shape index: {}]   ;;  %s1906_s2 = inlined_call_operand.hbm [shape: bf16[2,4,8,8], index: 2, kind: input, shape index: {}]   ;;  %s1907_s3 = inlined_call_operand.hbm [shape: bf16[2,4,8,8], index: 3, kind: output, shape index: {}]  }
   0x1   :  { %1917 = sst [smem:[#allocation18_spill]] %s1905_s1 }
   0x2   :  { %8 = vsyncpa [#allocation6], 0 }
   0x3   :  { %10 = vsyncpa [#allocation6 + $0x1], 0 }
   0x4   :  { %11 = vsyncpa [#allocation9], 0 }
   0x5   :  { %13 = vsyncpa [#allocation9 + $0x1], 0 }
   0x6   :  { %14 = vsyncpa [#allocation7], 0 }
   0x7   :  { %16 = vsyncpa [#allocation7 + $0x1], 0  ;;  %s1469_s12 = smov 0   ;;  %s1471_s13 = smov 0  }
   0x8   :  { %s1473_s14 = smov 0   ;;  %s1475_s15 = smov 0  }
   0x9   :  { %s1477_s16 = smov 0   ;;  %s1479_s17 = smov 0  }
   0xa LB: > { %1918 = sst [smem:[#allocation15_spill]] %s1431_s16  ;;  %s1500_s18 = sadd.s32 4294967295, %s1435_s17   ;;  %s1435_s17 = sphi %s1479_s17, %s22_s17   ;;  %s1431_s16 = sphi %s1477_s16, %s1941_s16   ;;  %s1427_s15 = sphi %s1475_s15, %s1940_s15   ;;  %s1423_s14 = sphi %s1473_s14, %s1944_s14   ;;  %s1419_s13 = sphi %s1471_s13, %s1943_s13   ;;  %s1415_s12 = sphi %s1469_s12, %s1942_s12  }
   0xb   : > { %s1055_s19 = sadd.s32 4294967294, %s1435_s17   ;;  %s41_s20 = sadd.s32 1, %s1431_s16 }
   0xc   : > { %s50_s21 = sadd.s32 1, %s1423_s14  ;;  %p43_p0 = scmp.ge.s32.totalorder %s41_s20, 2 }
   0xd   : > { %p57_p1 = scmp.ne.s32.totalorder %s1423_s14, %s1419_s13  ;;  %p58_p2 = scmp.eq.s32.totalorder %s1435_s17, 0 }
   0xe   : > { %p63_p3 = scmp.ne.s32.totalorder %s1419_s13, %s1415_s12  ;;  %s1946_s20 = smov (%p43_p0, %s41_s20), 0 }
   0xf   : > { %1919 = sst [smem:[#allocation16_spill]] %s1946_s20  ;;  %p1512_p4 = por %p58_p2, %p57_p1 }
  0x10   : > { %p64_p5 = scmp.eq.s32.totalorder %s1500_s18, 0  ;;  %s45_s23 = ssub.s32 %s1431_s16, %s1946_s20 }
  0x11   : > { %p145_p6 = scmp.eq.s32.totalorder %s1500_s18, 1  ;;  %p48_p7 = scmp.eq.s32.totalorder %s45_s23, 0 }
  0x12   : > { %p1520_p8 = por %p64_p5, %p63_p3  ;;  %p151_p10 = scmp.eq.s32.totalorder %s1055_s19, 1 }
  0x13   : > { %p1524_p9 = por %p145_p6, %p57_p1  ;;  %p1175_p13 = scmp.lt.s32.totalorder %s1435_s17, 2 }
  0x14   : > { %s1921_s24 = scalar_select %p1520_p8, 1, 0 }
  0x15   : > { %s1922_s25 = scalar_select %p1524_p9, 1, 0 }
  0x16   : > { %s1529_s26 = scalar_select %p48_p7, %s1423_s14, %s50_s21  }
  0x17   : > { %p1531_p11 = por %p151_p10, %p63_p3  ;;  %s1910_s28 = sand.u32 1, %s1423_s14  }
  0x18   : > { %1923 = sst [smem:[#allocation17_spill]] %s1529_s26  ;;  %s1540_s29 = sshll.u32 %s1910_s28, 4 }
  0x19   : > { %s1924_s27 = scalar_select %p1531_p11, 1, 0 }
  0x1a   : > { %s1543_s30 = sshll.u32 %s1431_s16, 8  ;;  %p1547_p0 = pnand %p1175_p13, %p1512_p4 }
  0x1b   : > { %s193_s5 = sand.u32 1, %s1435_s17   ;;  %s1926_s1 = sld [smem:[#allocation18_spill]] }
  0x1c   : > { %s197_s9 = scalar_lea.vmem [#allocation8], %s1540_s29  ;;  %s1563_s11 = scalar_lea.sflag [#allocation9], %s193_s5 }
  0x1d   : > { %s205_s10 = sshll.u32 %s197_s9, 4  ;;  %p1569_p4 = pneg %p1547_p0  ;;  %s1560_s10 = int_to_ptr.vmem [resolvable:$true] %s205_s10 }
  0x21   : > { %s1556_s8 = scalar_lea.hbm %s1926_s1, %s1543_s30  ;;  %s1264_s6 = scalar_lea.hbm %s1926_s1, 512 }
  0x22   : > { %s1259_s19 = scalar_lea.hbm %s1556_s8, 256  ;;  %p1265_p7 = scmp.lt.u32.totalorder %s1556_s8, %s1926_s1 }
  0x23   : > { %p1260_p3 = scmp.ne.s32.totalorder %s1556_s8, %s1259_s19  ;;  %p1266_p10 = scmp.lt.u32.totalorder %s1264_s6, %s1259_s19 }
  0x24   : > { %p1268_p12 = scmp.lt.u32.totalorder %s1259_s19, %s1556_s8 }
  0x25   : > { %p1262_p5 = pnand %p1569_p4, %p1260_p3  ;;  %p1267_p13 = por %p1266_p10, %p1265_p7 }
  0x27   : > { %p1263_p6 = pneg %p1262_p5  ;;  %p1269_p1 = por %p1268_p12, %p1267_p13 }
  0x29   : > { %p1270_p2 = pnand %p1269_p1, %p1263_p6 }
  0x2b   : > { %1273 = shalt.err (!%p1270_p2)
}
  0x2c   : > { %s1274_s5 = scalar_lea.vmem %s1560_s10, 256  ;;  %s1437_s22 = smov [#allocation8]  }
  0x2d   : > { %p1275_p3 = scmp.ne.s32.totalorder %s1560_s10, %s1274_s5  ;;  %s1279_s23 = sshll.u32 %s1437_s22, 4  ;;  %s1280_s23 = int_to_ptr.vmem [resolvable:$false] %s1279_s23 }
  0x2e   : > { %s1281_s7 = scalar_lea.vmem %s1280_s23, 512  ;;  %p1282_p9 = scmp.lt.s32.totalorder %s1560_s10, %s1280_s23 }
  0x2f   : > { %p1277_p5 = pnand %p1275_p3, %p1569_p4  ;;  %p1283_p8 = scmp.lt.s32.totalorder %s1281_s7, %s1274_s5 }
  0x31   : > { %p1278_p11 = pneg %p1277_p5  ;;  %p1284_p7 = por %p1283_p8, %p1282_p9 }
  0x33   : > { %p1285_p10 = pnand %p1284_p7, %p1278_p11 }
  0x35   : > { %1288 = shalt.err (!%p1285_p10)
}
  0x36   : > { %s1911_s19 = smov 64   ;;  %s1913_s6 = smov 4  }
  0x37   : > { %1167 = dma.hbm_to_vmem [thread:$0]  (!%p1547_p0), %s1556_s8, 256, %s1560_s10, %s1563_s11, %s1911_s19, %s1911_s19, %s1913_s6  }
  0x38   : > { %p1928_p8 = scmp.lt.s32.totalorder %s1435_s17, 3  ;;  %p1929_p9 = scmp.ge.s32.totalorder %s1435_s17, 1 }
  0x39   : > { %s1608_s23 = scalar_lea.hbm %s1904_s0, %s1543_s30  ;;  %s175_s7 = scalar_lea.vmem [#allocation5], %s1540_s29 }
  0x3a   : > { %p1600_p11 = pnand %p1929_p9, %p1928_p8  ;;  %s183_s28 = sshll.u32 %s175_s7, 4  ;;  %s1611_s28 = int_to_ptr.vmem [resolvable:$true] %s183_s28 }
  0x3b   : > { %s1617_s19 = scalar_lea.hbm %s1906_s2, %s1543_s30  ;;  %s1931_s6 = sand.u32 1, %s1423_s14  }
  0x3c   : > { %s1930_s9 = scalar_select %p1600_p11, 1, 0 }
  0x3d   : > { %s1621_s1 = scalar_lea.sflag [#allocation6], %s1931_s6  ;;  %s1289_s20 = scalar_lea.hbm %s1608_s23, 256 }
  0x3e   : > { %p1290_p12 = scmp.ne.s32.totalorder %s1608_s23, %s1289_s20  ;;  %s1294_s16 = scalar_lea.hbm %s1904_s0, 512 }
  0x3f   : > { %p1295_p6 = scmp.lt.u32.totalorder %s1608_s23, %s1904_s0  ;;  %p1296_p13 = scmp.lt.u32.totalorder %s1294_s16, %s1289_s20 }
  0x40   : > { %p1292_p1 = pnand %p1290_p12, %p1569_p4  ;;  %p1298_p5 = scmp.lt.u32.totalorder %s1289_s20, %s1608_s23 }
  0x41   : > { %p1297_p3 = por %p1296_p13, %p1295_p6 }
  0x42   : > { %p1293_p2 = pneg %p1292_p1 }
  0x43   : > { %p1299_p7 = por %p1298_p5, %p1297_p3 }
  0x45   : > { %p1300_p10 = pnand %p1299_p7, %p1293_p2 }
  0x47   : > { %1303 = shalt.err (!%p1300_p10)
}
  0x48   : > { %s1304_s30 = scalar_lea.vmem %s1611_s28, 256  ;;  %s1440_s6 = smov [#allocation5]  }
  0x49   : > { %p1305_p8 = scmp.ne.s32.totalorder %s1611_s28, %s1304_s30  ;;  %s1309_s8 = sshll.u32 %s1440_s6, 4  ;;  %s1310_s8 = int_to_ptr.vmem [resolvable:$false] %s1309_s8 }
  0x4a   : > { %s1311_s26 = scalar_lea.vmem %s1310_s8, 512  ;;  %p1312_p1 = scmp.lt.s32.totalorder %s1611_s28, %s1310_s8 }
  0x4b   : > { %p1307_p9 = pnand %p1305_p8, %p1569_p4  ;;  %p1313_p11 = scmp.lt.s32.totalorder %s1311_s26, %s1304_s30 }
  0x4d   : > { %p1308_p12 = pneg %p1307_p9  ;;  %p1314_p6 = por %p1313_p11, %p1312_p1 }
  0x4f   : > { %p1315_p13 = pnand %p1314_p6, %p1308_p12 }
  0x51   : > { %1318 = shalt.err (!%p1315_p13)
}
  0x52   : > { %s1932_s16 = smov 4   ;;  %s1933_s20 = smov 64  }
  0x53   : > { %1164 = dma.hbm_to_vmem [thread:$0]  (!%p1547_p0), %s1608_s23, 256, %s1611_s28, %s1621_s1, %s1933_s20, %s1933_s20, %s1932_s16  }
  0x54   : > { %s219_s10 = scalar_lea.vmem [#allocation10], %s1540_s29  ;;  %s1319_s22 = scalar_lea.hbm %s1617_s19, 256 }
  0x55   : > { %s227_s5 = sshll.u32 %s219_s10, 4  ;;  %p1320_p11 = scmp.ne.s32.totalorder %s1617_s19, %s1319_s22  ;;  %s1649_s5 = int_to_ptr.vmem [resolvable:$true] %s227_s5 }
  0x56   : > { %s1324_s6 = scalar_lea.hbm %s1906_s2, 512  ;;  %p1325_p5 = scmp.lt.u32.totalorder %s1617_s19, %s1906_s2 }
  0x57   : > { %p1322_p2 = pnand %p1320_p11, %p1569_p4  ;;  %p1326_p7 = scmp.lt.u32.totalorder %s1324_s6, %s1319_s22 }
  0x58   : > { %p1328_p8 = scmp.lt.u32.totalorder %s1319_s22, %s1617_s19 }
  0x59   : > { %p1323_p3 = pneg %p1322_p2  ;;  %p1327_p10 = por %p1326_p7, %p1325_p5 }
  0x5b   : > { %p1329_p9 = por %p1328_p8, %p1327_p10 }
  0x5d   : > { %p1330_p12 = pnand %p1329_p9, %p1323_p3 }
  0x5f   : > { %1333 = shalt.err (!%p1330_p12)
}
  0x60   : > { %s1334_s1 = scalar_lea.vmem %s1649_s5, 256  ;;  %s1441_s28 = smov [#allocation10]  }
  0x61   : > { %p1335_p1 = scmp.ne.s32.totalorder %s1649_s5, %s1334_s1  ;;  %s1339_s29 = sshll.u32 %s1441_s28, 4  ;;  %s1340_s29 = int_to_ptr.vmem [resolvable:$false] %s1339_s29 }
  0x62   : > { %s1341_s23 = scalar_lea.vmem %s1340_s29, 512  ;;  %p1342_p11 = scmp.lt.s32.totalorder %s1649_s5, %s1340_s29 }
  0x63   : > { %p1337_p6 = pnand %p1335_p1, %p1569_p4  ;;  %p1343_p2 = scmp.lt.s32.totalorder %s1341_s23, %s1334_s1 }
  0x65   : > { %p1338_p13 = pneg %p1337_p6  ;;  %p1344_p5 = por %p1343_p2, %p1342_p11 }
  0x67   : > { %p1345_p7 = pnand %p1344_p5, %p1338_p13 }
  0x69   : > { %1348 = shalt.err (!%p1345_p7)
}
  0x6a   : > { %1170 = dma.hbm_to_vmem [thread:$0]  (!%p1547_p0), %s1617_s19, 256, %s1649_s5, %s1563_s11, %s1933_s20, %s1933_s20, %s1932_s16  }
  0x6b   : > { %p1934_p4 = scmp.ne.s32.totalorder %s1930_s9, 0 }
  0x6c   : > { %s1679_s21 = sand.u32 (!%p1934_p4), 1, %s1419_s13   ;;  %p1935_p3 = scmp.ne.s32.totalorder (!%p1934_p4), %s1921_s24, 0 }
  0x6d   : > { %239 = sbr.rel (%p1934_p4) target bundleno = 954 (0x3ba), region = 32  ;;  %s1682_s10 = sshll.u32 (!%p1934_p4), %s1679_s21, 4 }
  0x6e   : > { %s242_s4 = scalar_lea.sflag (!%p1934_p4), [#allocation6], %s1679_s21  ;;  %s1686_s22 = scalar_lea.vmem (!%p1934_p4), [#allocation5], %s1682_s10 }
  0x74   : > { %1402 = dma.done.wait (%p1935_p3), %s242_s4, 256  }
  0x75   : > { %1404 = vsyncadd (%p1935_p3), %s242_s4, 4294967040  ;;  %s250_s11 = sand.u32 1, %s1500_s18   ;;  %s254_s9 = scalar_lea.vmem [#allocation8], %s1682_s10 }
  0x76   : > { %s251_s19 = scalar_lea.sflag [#allocation9], %s250_s11 }
  0x77   : > { %1406 = dma.done.wait (%p1935_p3), %s251_s19, 512  }
  0x78   : > { %1408 = vsyncadd (%p1935_p3), %s251_s19, 4294966784  ;;  %vm310_vm0 = vcmask 64512   ;;  %v1442_v0 = vmov 0.0   ;;  %vm1443_vm1 = vmmov 0   ;;  %v323_v1 = vld [vmem:[%s254_s9] sm:$0xf]  ;;  %v517_v14 = vlaneseq }
  0x79   : > { %1105 = vmatprep.subr.bf16.mxu0 %v1442_v0  ;;  %311 = vst.msk [vmem:[#allocation4] sm:$0xff] %vm310_vm0, %v1442_v0  ;;  %312 = vst.msk [vmem:[#allocation4 + $0x8] sm:$0xff] %vm310_vm0, %v1442_v0  ;;  %1111 = vmatprep.subr.bf16.mxu1 %v1442_v0  ;;  %v324_v2 = vld [vmem:[%s254_s9 + $0x4] sm:$0xf]  ;;  %v336_v3 = vsel %vm310_vm0, %v323_v1, 0  ;;  %vm301_vm2 = vcmask 7168  }
  0x7a   : > { %313 = vst.msk [vmem:[#allocation4 + $0x10] sm:$0xff] %vm310_vm0, %v1442_v0  ;;  %314 = vst.msk [vmem:[#allocation4 + $0x18] sm:$0xff] %vm310_vm0, %v1442_v0  ;;  %1107 = vmatprep.mubr.msk.bf16.mxu0 %vm1443_vm1, %v1442_v0  ;;  %1113 = vmatprep.mubr.msk.bf16.mxu1 %vm1443_vm1, %v1442_v0  ;;  %v382_v4 = vsel %vm310_vm0, %v324_v2, 0  ;;  %v325_v5 = vld [vmem:[%s254_s9 + $0x8] sm:$0xf]  ;;  %v1444_v13 = vmov -inf  }
  0x7b   : > { %1106 = vmatpush3.bf16.xpose.msra.mxu0 %v336_v3  ;;  %1112 = vmatpush3.bf16.xpose.msra.mxu1 %v382_v4  ;;  %v326_v6 = vld [vmem:[%s254_s9 + $0xc] sm:$0xf]  ;;  %v319_v7 = vld [vmem:[%s1686_s22] sm:$0xf]  ;;  %v320_v8 = vld [vmem:[%s1686_s22 + $0x4] sm:$0xf] }
  0x7c   : > { %1117 = vmatprep.subr.bf16.mxu0 %v1442_v0  ;;  %1123 = vmatprep.subr.bf16.mxu1 %v1442_v0  ;;  %v428_v9 = vsel %vm310_vm0, %v325_v5, 0  ;;  %v474_v10 = vsel %vm310_vm0, %v326_v6, 0  ;;  %v321_v11 = vld [vmem:[%s1686_s22 + $0x8] sm:$0xf]  ;;  %v322_v12 = vld [vmem:[%s1686_s22 + $0xc] sm:$0xf] }
  0x7d   : > { %302 = vst.msk [vmem:[#allocation2] sm:$0xff] %vm301_vm2, %v1444_v13  ;;  %303 = vst.msk [vmem:[#allocation2 + $0x8] sm:$0xff] %vm301_vm2, %v1444_v13  ;;  %v518_v15 = vshrl.u32 %v517_v14, 7  ;;  %v523_v16 = vand.u32 127, %v517_v14  ;;  %v1445_v41 = vmov 0   ;;  %s263_s18 = scalar_lea.vmem [#allocation10], %s1682_s10 }
  0x7e   : > { %304 = vst.msk [vmem:[#allocation2 + $0x10] sm:$0xff] %vm301_vm2, %v1444_v13  ;;  %305 = vst.msk [vmem:[#allocation2 + $0x18] sm:$0xff] %vm301_vm2, %v1444_v13  ;;  %1233 = vset.pattern.permute.xlu0 %v1445_v41  ;;  %1234 = vset.pattern.permute.xlu1 %v1445_v41  ;;  %v327_v58 = vld [vmem:[%s263_s18] sm:$0xf]  ;;  %vm661_vm4 = vcmask 1043456   ;;  %vm899_vm5 = vcmask 60416  }
  0x7f   : > { %306 = vst.msk [vmem:[#allocation3] sm:$0xff] %vm301_vm2, %v1442_v0  ;;  %307 = vst.msk [vmem:[#allocation3 + $0x8] sm:$0xff] %vm301_vm2, %v1442_v0  ;;  %vm526_vm3 = vcmp.le.s32.totalorder %v523_v16, %v518_v15  ;;  %v663_v59 = vsel %vm661_vm4, %v327_v58, 0  ;;  %v328_v60 = vld [vmem:[%s263_s18 + $0x4] sm:$0xf]  ;;  %s295_s24 = scalar_lea.vmem [#allocation11], %s1682_s10 }
  0x80   : > { %308 = vst.msk [vmem:[#allocation3 + $0x10] sm:$0xff] %vm301_vm2, %v1442_v0  ;;  %309 = vst.msk [vmem:[#allocation3 + $0x18] sm:$0xff] %vm301_vm2, %v1442_v0  ;;  %v709_v61 = vsel %vm661_vm4, %v328_v60, 0  ;;  %v329_v62 = vld [vmem:[%s263_s18 + $0x8] sm:$0xf]  ;;  %v626_v58 = vld [vmem:[#allocation4] sm:$0xff] }
  0x81   : > { %v755_v63 = vsel %vm661_vm4, %v329_v62, 0  ;;  %v330_v1 = vld [vmem:[%s263_s18 + $0xc] sm:$0xf]  ;;  %s919_s16 = sshll.u32 %s295_s24, 4  ;;  %s1088_s20 = sshll.u32 %s1427_s15, 8  ;;  %s1848_s16 = int_to_ptr.vmem [resolvable:$true] %s919_s16 }
  0x82   : > { %1108 = vmatmul.mubr.msk.bf16.vlgmr.msra.gmra.mrb[0].mxu0 %vm310_vm0, %v319_v7  ;;  %1114 = vmatmul.mubr.msk.bf16.vlgmr.msra.gmra.mrb[0].mxu1 %vm310_vm0, %v320_v8  ;;  %v801_v2 = vsel %vm661_vm4, %v330_v1, 0  ;;  %s1854_s30 = scalar_lea.hbm %s1907_s3, %s1088_s20  ;;  %s905_s6 = scalar_lea.sflag [#allocation7], %s1679_s21 }
  0x83   : > { %1118 = vmatpush3.bf16.xpose.msra.mxu0 %v428_v9  ;;  %1124 = vmatpush3.bf16.xpose.msra.mxu1 %v474_v10  ;;  %s1349_s15 = scalar_lea.vmem %s1848_s16, 256  ;;  %p1936_p10 = scmp.ne.s32.totalorder %s1922_s25, 0 }
  0x84   : > { %1119 = vmatprep.mubr.msk.bf16.mxu0 %vm1443_vm1, %v1442_v0  ;;  %1125 = vmatprep.mubr.msk.bf16.mxu1 %vm1443_vm1, %v1442_v0  ;;  %v1768_v42 = vld [vmem:[#allocation2] sm:$0xff]  ;;  %v1773_v45 = vld [vmem:[#allocation2 + $0x8] sm:$0xff]  ;;  %p1350_p0 = scmp.ne.s32.totalorder %s1848_s16, %s1349_s15  ;;  %s1446_s8 = smov [#allocation11]  }
  0x85   : > { %1129 = vmatprep.subr.bf16.mxu0 %v1442_v0  ;;  %1135 = vmatprep.subr.bf16.mxu1 %v1442_v0  ;;  %v1783_v49 = vld [vmem:[#allocation2 + $0x10] sm:$0xff]  ;;  %v1793_v53 = vld [vmem:[#allocation2 + $0x18] sm:$0xff]  ;;  %s1353_s26 = sshll.u32 %s1446_s8, 4  ;;  %s1354_s26 = int_to_ptr.vmem [resolvable:$false] %s1353_s26 }
  0x86   : > { %p1351_p8 = pnand %p1350_p0, %p1936_p10  ;;  %s1355_s1 = scalar_lea.vmem %s1354_s26, 512 }
  0x87   : > { %v599_v41 = vld [vmem:[#allocation3 + $0x10] sm:$0xff]  ;;  %p1356_p12 = scmp.lt.s32.totalorder %s1848_s16, %s1354_s26  ;;  %p1357_p1 = scmp.lt.s32.totalorder %s1355_s1, %s1349_s15 }
  0x88   : > { %p1352_p9 = pneg %p1351_p8 }
  0x89   : > { %p1358_p6 = por %p1357_p1, %p1356_p12 }
  0x8a   : > { %1120 = vmatmul.mubr.msk.bf16.vlgmr.msra.gmra.mrb[4].mxu0 %vm310_vm0, %v321_v11  ;;  %1126 = vmatmul.mubr.msk.bf16.vlgmr.msra.gmra.mrb[4].mxu1 %vm310_vm0, %v322_v12 }
  0x8b   : > { %1131 = vmatprep.mubr.msk.bf16.mxu0 %vm1443_vm1, %v1442_v0  ;;  %1137 = vmatprep.mubr.msk.bf16.mxu1 %vm1443_vm1, %v1442_v0  ;;  %p1359_p13 = pnand %p1358_p6, %p1352_p9 }
  0x8c   : > { %1130 = vmatpush3.bf16.msra.mxu0 %v663_v59  ;;  %1136 = vmatpush3.bf16.msra.mxu1 %v709_v61  ;;  %v627_v61 = vld [vmem:[#allocation4 + $0x8] sm:$0xff] }
  0x8d   : > { %1141 = vmatprep.subr.bf16.mxu0 %v1442_v0  ;;  %1147 = vmatprep.subr.bf16.mxu1 %v1442_v0 }
 0x155   : > { %v372_v17 = vpop.f32.mrb[0].mxu0  ;;  %v418_v18 = vpop.f32.mrb[0].mxu1 }
 0x156   : > { %v1749_v19 = vsel %vm526_vm3, %v372_v17, -1e+30  ;;  %v1109_v20 = vpop.f32.mrb[1].mxu0  ;;  %v1752_v21 = vsel %vm526_vm3, %v418_v18, -1e+30  ;;  %v1115_v22 = vpop.f32.mrb[1].mxu1 }
 0x157   : > { %v375_v23 = vpop.f32.mrb[2].mxu0  ;;  %v537_v24 = vsel %vm310_vm0, %v1749_v19, -inf  ;;  %v421_v25 = vpop.f32.mrb[2].mxu1  ;;  %v540_v28 = vsel %vm310_vm0, %v1752_v21, -inf }
 0x158   : > { %538 = vmax.xlane.f32.xlu0 %v537_v24  ;;  %v1110_v26 = vpop.f32.mrb[3].mxu0  ;;  %v1116_v27 = vpop.f32.mrb[3].mxu1 }
 0x15c   : > { %541 = vmax.xlane.f32.xlu0 %v540_v28 }
 0x15d   : > { %v464_v29 = vpop.f32.mrb[4].mxu0  ;;  %v510_v30 = vpop.f32.mrb[4].mxu1 }
 0x15e   : > { %v1759_v31 = vsel %vm526_vm3, %v464_v29, -1e+30  ;;  %v1121_v32 = vpop.f32.mrb[5].mxu0  ;;  %v1762_v33 = vsel %vm526_vm3, %v510_v30, -1e+30  ;;  %v1127_v34 = vpop.f32.mrb[5].mxu1 }
 0x15f   : > { %v467_v35 = vpop.f32.mrb[6].mxu0  ;;  %v543_v36 = vsel %vm310_vm0, %v1759_v31, -inf  ;;  %v513_v37 = vpop.f32.mrb[6].mxu1  ;;  %v546_v40 = vsel %vm310_vm0, %v1762_v33, -inf  ;;  %v597_v34 = vld [vmem:[#allocation3] sm:$0xff] }
 0x160   : > { %544 = vmax.xlane.f32.xlu1 %v543_v36  ;;  %v1122_v38 = vpop.f32.mrb[7].mxu0  ;;  %v1128_v39 = vpop.f32.mrb[7].mxu1  ;;  %v598_v37 = vld [vmem:[#allocation3 + $0x8] sm:$0xff] }
 0x164   : > { %547 = vmax.xlane.f32.xlu1 %v546_v40 }
 0x1e5   : > { %v539_v43 = vpop.xlane.xlu0 %538 }
 0x1e6   : > { %v1771_v44 = vmax.f32 %v1768_v42, %v539_v43 }
 0x1e8   : > { %v553_v46 = vsub.f32 %v1768_v42, %v1771_v44  ;;  %851 = vst.msk [vmem:[#allocation2] sm:$0xff] %vm301_vm2, %v1771_v44  ;;  %567 = vperm.xlu0 %1233, %v1771_v44  }
 0x1e9   : > { %v542_v47 = vpop.xlane.xlu0 %541 }
 0x1ea   : > { %v1781_v48 = vmax.f32 %v1773_v45, %v542_v47 }
 0x1ec   : > { %v554_v50 = vsub.f32 %v1773_v45, %v1781_v48  ;;  %852 = vst.msk [vmem:[#allocation2 + $0x8] sm:$0xff] %vm301_vm2, %v1781_v48  ;;  %572 = vperm.xlu1 %1234, %v1781_v48   ;;  %v600_v45 = vld [vmem:[#allocation3 + $0x18] sm:$0xff] }
 0x1ed   : > { %v545_v51 = vpop.xlane.xlu1 %544 }
 0x1ee   : > { %v1791_v52 = vmax.f32 %v1783_v49, %v545_v51  ;;  %v559_v25 = vmul.f32 1.442695, %v554_v50 }
 0x1f0   : > { %v555_v54 = vsub.f32 %v1783_v49, %v1791_v52  ;;  %853 = vst.msk [vmem:[#allocation2 + $0x10] sm:$0xff] %vm301_vm2, %v1791_v52  ;;  %577 = vperm.xlu1 %1234, %v1791_v52  }
 0x1f1   : > { %v548_v55 = vpop.xlane.xlu1 %547 }
 0x1f2   : > { %v1801_v56 = vmax.f32 %v1793_v53, %v548_v55  ;;  %v561_v28 = vmul.f32 1.442695, %v555_v54 }
 0x1f4   : > { %v556_v57 = vsub.f32 %v1793_v53, %v1801_v56  ;;  %854 = vst.msk [vmem:[#allocation2 + $0x18] sm:$0xff] %vm301_vm2, %v1801_v56  ;;  %582 = vperm.xlu1 %1234, %v1801_v56  }
 0x1f6   : > { %v563_v29 = vmul.f32 1.442695, %v556_v57 }
 0x267   : > { %v568_v3 = vpop.permute.xlu0 %567 }
 0x268   : > { %v585_v4 = vsub.f32 %v1749_v19, %v568_v3 }
 0x26a   : > { %v589_v5 = vmul.f32 1.442695, %v585_v4 }
 0x26b   : > { %v573_v6 = vpop.permute.xlu1 %572 }
 0x26c   : > { %1235 = vpow2.f32 %v589_v5  ;;  %v586_v7 = vsub.f32 %v1752_v21, %v573_v6 }
 0x26e   : > { %v591_v8 = vmul.f32 1.442695, %v586_v7  ;;  %v628_v7 = vld [vmem:[#allocation4 + $0x10] sm:$0xff] }
 0x26f   : > { %v578_v9 = vpop.permute.xlu1 %577 }
 0x270   : > { %1237 = vpow2.f32 %v591_v8  ;;  %v587_v10 = vsub.f32 %v1759_v31, %v578_v9 }
 0x272   : > { %v593_v11 = vmul.f32 1.442695, %v587_v10 }
 0x273   : > { %v583_v12 = vpop.permute.xlu1 %582 }
 0x274   : > { %1239 = vpow2.f32 %v593_v11  ;;  %v588_v13 = vsub.f32 %v1762_v33, %v583_v12 }
 0x276   : > { %v1236_v14 = vpop.eup %1235  ;;  %v595_v15 = vmul.f32 1.442695, %v588_v13 }
 0x277   : > { %v605_v16 = vsel %vm310_vm0, %v1236_v14, 0.0  ;;  %v654_v17 = vpack.c.bf16 %v1236_v14, %v1236_v14  ;;  %v629_v14 = vld [vmem:[#allocation4 + $0x18] sm:$0xff] }
 0x278   : > { %1241 = vpow2.f32 %v595_v15  ;;  %606 = vadd.xlane.f32.xlu1 %v605_v16 }
 0x279   : > { %1132 = vmatmul.mubr.msk.bf16.vlgmr.msra.gmra.mrb[8].mxu0 %vm310_vm0, %v654_v17  ;;  %1243 = vpow2.f32 %v559_v25 }
 0x27a   : > { %v1238_v18 = vpop.eup %1237  ;;  %1142 = vmatpush3.bf16.msra.mxu0 %v755_v63  ;;  %1143 = vmatprep.mubr.msk.bf16.mxu0 %vm1443_vm1, %v1442_v0 }
 0x27b   : > { %v608_v19 = vsel %vm310_vm0, %v1238_v18, 0.0  ;;  %v655_v20 = vpack.c.bf16 %v1238_v18, %v1238_v18 }
 0x27c   : > { %609 = vadd.xlane.f32.xlu0 %v608_v19 }
 0x27d   : > { %1138 = vmatmul.mubr.msk.bf16.vlgmr.msra.gmra.mrb[8].mxu1 %vm310_vm0, %v655_v20 }
 0x27e   : > { %v1240_v21 = vpop.eup %1239  ;;  %1148 = vmatpush3.bf16.msra.mxu1 %v801_v2  ;;  %1149 = vmatprep.mubr.msk.bf16.mxu1 %vm1443_vm1, %v1442_v0  ;;  %v557_v0 = vmul.f32 1.442695, %v553_v46 }
 0x27f   : > { %v611_v22 = vsel %vm310_vm0, %v1240_v21, 0.0  ;;  %v656_v23 = vpack.c.bf16 %v1240_v21, %v1240_v21 }
 0x280   : > { %612 = vadd.xlane.f32.xlu1 %v611_v22  ;;  %1245 = vpow2.f32 %v557_v0 }
 0x281   : > { %1144 = vmatmul.mubr.msk.bf16.vlgmr.msra.gmra.mrb[12].mxu0 %vm310_vm0, %v656_v23  ;;  %1247 = vpow2.f32 %v561_v28 }
 0x282   : > { %v1242_v24 = vpop.eup %1241  ;;  %1249 = vpow2.f32 %v563_v29 }
 0x283   : > { %v614_v26 = vsel %vm310_vm0, %v1242_v24, 0.0  ;;  %v657_v27 = vpack.c.bf16 %v1242_v24, %v1242_v24  ;;  %v1244_v30 = vpop.eup %1243 }
 0x284   : > { %615 = vadd.xlane.f32.xlu1 %v614_v26  ;;  %v602_v39 = vmul.f32 %v1244_v30, %v598_v37 }
 0x285   : > { %1150 = vmatmul.mubr.msk.bf16.vlgmr.msra.gmra.mrb[12].mxu1 %vm310_vm0, %v657_v27 }
 0x28a   : > { %v1246_v31 = vpop.eup %1245 }
 0x28b   : > { %v1248_v32 = vpop.eup %1247  ;;  %v601_v35 = vmul.f32 %v1246_v31, %v597_v34 }
 0x28c   : > { %v1250_v33 = vpop.eup %1249  ;;  %v603_v43 = vmul.f32 %v1248_v32, %v599_v41 }
 0x28d   : > { %v604_v48 = vmul.f32 %v1250_v33, %v600_v45 }
 0x292   : > { %637 = vperm.xlu0 %1233, %v1244_v30  }
 0x295   : > { %632 = vperm.xlu1 %1234, %v1246_v31  }
 0x299   : > { %642 = vperm.xlu1 %1234, %v1248_v32  }
 0x29d   : > { %647 = vperm.xlu1 %1234, %v1250_v33  }
 0x305   : > { %v607_v36 = vpop.xlane.xlu1 %606 }
 0x306   : > { %v617_v38 = vadd.f32 %v607_v36, %v601_v35 }
 0x308   : > { %622 = vst.msk [vmem:[#allocation3] sm:$0xff] %vm301_vm2, %v617_v38 }
 0x309   : > { %v610_v40 = vpop.xlane.xlu0 %609 }
 0x30a   : > { %v618_v42 = vadd.f32 %v610_v40, %v602_v39 }
 0x30c   : > { %623 = vst.msk [vmem:[#allocation3 + $0x8] sm:$0xff] %vm301_vm2, %v618_v42 }
 0x30d   : > { %v613_v44 = vpop.xlane.xlu1 %612 }
 0x30e   : > { %v619_v46 = vadd.f32 %v613_v44, %v603_v43 }
 0x30f   : > { %v859_v47 = vld [vmem:[#allocation3] sm:$0xff] }
 0x310   : > { %624 = vst.msk [vmem:[#allocation3 + $0x10] sm:$0xff] %vm301_vm2, %v619_v46  ;;  %1251 = vrcp.f32 %v859_v47 }
 0x311   : > { %v616_v49 = vpop.xlane.xlu1 %615  ;;  %v638_v62 = vpop.permute.xlu0 %637 }
 0x312   : > { %v620_v50 = vadd.f32 %v616_v49, %v604_v48  ;;  %v651_v5 = vmul.f32 %v638_v62, %v627_v61 }
 0x313   : > { %v860_v51 = vld [vmem:[#allocation3 + $0x8] sm:$0xff] }
 0x314   : > { %625 = vst.msk [vmem:[#allocation3 + $0x18] sm:$0xff] %vm301_vm2, %v620_v50  ;;  %1253 = vrcp.f32 %v860_v51 }
 0x315   : > { %v633_v59 = vpop.permute.xlu1 %632 }
 0x316   : > { %v650_v60 = vmul.f32 %v633_v59, %v626_v58 }
 0x317   : > { %v861_v52 = vld [vmem:[#allocation3 + $0x10] sm:$0xff] }
 0x318   : > { %1255 = vrcp.f32 %v861_v52 }
 0x319   : > { %v643_v3 = vpop.permute.xlu1 %642 }
 0x31a   : > { %v1252_v53 = vpop.eup %1251  ;;  %v652_v12 = vmul.f32 %v643_v3, %v628_v7 }
 0x31b   : > { %873 = vperm.xlu1 %1234, %v1252_v53   ;;  %v862_v54 = vld [vmem:[#allocation3 + $0x18] sm:$0xff] }
 0x31c   : > { %1257 = vrcp.f32 %v862_v54 }
 0x31d   : > { %v648_v15 = vpop.permute.xlu1 %647 }
 0x31e   : > { %v1254_v55 = vpop.eup %1253  ;;  %v653_v20 = vmul.f32 %v648_v15, %v629_v14 }
 0x31f   : > { %878 = vperm.xlu0 %1233, %v1254_v55  }
 0x322   : > { %v1256_v56 = vpop.eup %1255 }
 0x323   : > { %883 = vperm.xlu1 %1234, %v1256_v56  }
 0x326   : > { %v1258_v57 = vpop.eup %1257 }
 0x327   : > { %888 = vperm.xlu0 %1233, %v1258_v57  }
 0x34c   : > { %v699_v63 = vpop.f32.mrb[8].mxu0 }
 0x34d   : > { %v843_v1 = vadd.f32 %v699_v63, %v650_v60  ;;  %v1133_v2 = vpop.f32.mrb[9].mxu0 }
 0x34e   : > { %v702_v4 = vpop.f32.mrb[10].mxu0 }
 0x34f   : > { %847 = vst.msk [vmem:[#allocation4] sm:$0xff] %vm310_vm0, %v843_v1  ;;  %v1134_v6 = vpop.f32.mrb[11].mxu0 }
 0x350   : > { %v745_v8 = vpop.f32.mrb[8].mxu1 }
 0x351   : > { %v844_v9 = vadd.f32 %v745_v8, %v651_v5  ;;  %v1139_v10 = vpop.f32.mrb[9].mxu1 }
 0x352   : > { %v748_v11 = vpop.f32.mrb[10].mxu1 }
 0x353   : > { %848 = vst.msk [vmem:[#allocation4 + $0x8] sm:$0xff] %vm310_vm0, %v844_v9  ;;  %v1140_v13 = vpop.f32.mrb[11].mxu1 }
 0x354   : > { %v791_v16 = vpop.f32.mrb[12].mxu0 }
 0x355   : > { %v845_v17 = vadd.f32 %v791_v16, %v652_v12  ;;  %v1145_v18 = vpop.f32.mrb[13].mxu0 }
 0x356   : > { %v794_v19 = vpop.f32.mrb[14].mxu0  ;;  %v867_v27 = vld [vmem:[#allocation4] sm:$0xff] }
 0x357   : > { %849 = vst.msk [vmem:[#allocation4 + $0x10] sm:$0xff] %vm310_vm0, %v845_v17  ;;  %v1146_v21 = vpop.f32.mrb[15].mxu0 }
 0x358   : > { %v837_v22 = vpop.f32.mrb[12].mxu1 }
 0x359   : > { %v846_v23 = vadd.f32 %v837_v22, %v653_v20  ;;  %v1151_v24 = vpop.f32.mrb[13].mxu1 }
 0x35a   : > { %v840_v25 = vpop.f32.mrb[14].mxu1  ;;  %v868_v30 = vld [vmem:[#allocation4 + $0x8] sm:$0xff] }
 0x35b   : > { %850 = vst.msk [vmem:[#allocation4 + $0x18] sm:$0xff] %vm310_vm0, %v846_v23  ;;  %v1152_v26 = vpop.f32.mrb[15].mxu1 }
 0x35e   : > { %v869_v34 = vld [vmem:[#allocation4 + $0x10] sm:$0xff] }
 0x362   : > { %v870_v39 = vld [vmem:[#allocation4 + $0x18] sm:$0xff] }
 0x39a   : > { %v874_v0 = vpop.permute.xlu1 %873 }
 0x39b   : > { %v891_v28 = vmul.f32 %v874_v0, %v867_v27 }
 0x39d   : > { %v895_v29 = vpack.c.bf16 %v891_v28, %v891_v28 }
 0x39e   : > { %v879_v31 = vpop.permute.xlu0 %878 }
 0x39f   : > { %900 = vst.msk [vmem:[%s295_s24] sm:$0xf] %vm899_vm5, %v895_v29  ;;  %v892_v32 = vmul.f32 %v879_v31, %v868_v30 }
 0x3a1   : > { %v896_v33 = vpack.c.bf16 %v892_v32, %v892_v32 }
 0x3a2   : > { %v884_v35 = vpop.permute.xlu1 %883 }
 0x3a3   : > { %901 = vst.msk [vmem:[%s295_s24 + $0x4] sm:$0xf] %vm899_vm5, %v896_v33  ;;  %v893_v36 = vmul.f32 %v884_v35, %v869_v34 }
 0x3a5   : > { %v897_v37 = vpack.c.bf16 %v893_v36, %v893_v36 }
 0x3a6   : > { %v889_v38 = vpop.permute.xlu0 %888 }
 0x3a7   : > { %902 = vst.msk [vmem:[%s295_s24 + $0x8] sm:$0xf] %vm899_vm5, %v897_v37  ;;  %v894_v40 = vmul.f32 %v889_v38, %v870_v39 }
 0x3a9   : > { %v898_v41 = vpack.c.bf16 %v894_v40, %v894_v40 }
 0x3ab   : > { %903 = vst.msk [vmem:[%s295_s24 + $0xc] sm:$0xf] %vm899_vm5, %v898_v41 }
 0x3ac   : > { %1362 = shalt.err (!%p1359_p13)
}
 0x3ad   : > { %s1363_s28 = scalar_lea.hbm %s1854_s30, 256  ;;  %s1367_s10 = scalar_lea.hbm %s1907_s3, 512 }
 0x3ae   : > { %p1364_p11 = scmp.ne.s32.totalorder %s1854_s30, %s1363_s28  ;;  %p1368_p7 = scmp.lt.u32.totalorder %s1854_s30, %s1907_s3 }
 0x3af   : > { %p1369_p4 = scmp.lt.u32.totalorder %s1367_s10, %s1363_s28  ;;  %p1371_p0 = scmp.lt.u32.totalorder %s1363_s28, %s1854_s30 }
 0x3b0   : > { %p1365_p2 = pnand %p1364_p11, %p1936_p10 }
 0x3b1   : > { %p1370_p3 = por %p1369_p4, %p1368_p7 }
 0x3b2   : > { %p1366_p5 = pneg %p1365_p2 }
 0x3b3   : > { %p1372_p8 = por %p1371_p0, %p1370_p3 }
 0x3b5   : > { %p1373_p9 = pnand %p1372_p8, %p1366_p5 }
 0x3b7   : > { %1376 = shalt.err (!%p1373_p9)
}
 0x3b8   : > { %s1447_s11 = smov 64   ;;  %s1448_s19 = smov 4  }
 0x3b9   : > { %1159 = dma.vmem_to_hbm [thread:$0]  (%p1936_p10), %s1848_s16, 256, %s1854_s30, %s905_s6, %s1447_s11, %s1447_s11, %s1448_s19  }
 0x3ba PF: > { %s934_s9 = sand.u32 1, %s1415_s12   ;;  %p1937_p12 = scmp.ne.s32.totalorder %s1924_s27, 0 }
 0x3bb   : > { %p1938_p1 = scmp.ge.s32.totalorder %s1435_s17, 2  ;;  %s935_s18 = scalar_lea.sflag [#allocation7], %s934_s9 }
 0x3bd   : > { %p1172_p6 = pnand %p1938_p1, %p1937_p12 }
 0x3bf   : > { %1410 = dma.done.wait (!%p1172_p6), %s935_s18, 256  }
 0x3c0   : > { %1412 = vsyncadd (!%p1172_p6), %s935_s18, 4294967040  ;;  %s22_s17 = sadd.s32 1, %s1435_s17   ;;  %s1939_s24 = sld [smem:[#allocation17_spill]] }
 0x3c1   : > { %p19_p13 = scmp.ge.s32.totalorder %s22_s17, 4   ;;  %s1940_s15 = sld [smem:[#allocation15_spill]] }
 0x3c2   : > { %s1941_s16 = sld [smem:[#allocation16_spill]]  ;;  %s1942_s12 = smov %s1419_s13 }
 0x3c3   : > { %s1943_s13 = smov %s1423_s14  ;;  %21 = sbr.rel (!%p19_p13) target bundleno = 10 (0xa), region = 113 }
 0x3c6   : > { %s1944_s14 = smov %s1939_s24 }
 0x3ca   :  { %940 = vsyncpa [#allocation6], 1 }
 0x3cb   :  { %942 = vsyncpa [#allocation6 + $0x1], 1 }
 0x3cc   :  { %943 = vsyncpa [#allocation9], 1 }
 0x3cd   :  { %945 = vsyncpa [#allocation9 + $0x1], 1 }
 0x3ce   :  { %946 = vsyncpa [#allocation7], 1 }
 0x3cf   :  { %948 = vsyncpa [#allocation7 + $0x1], 1 }

</bundles_post_ra>
